<compile_context>
chip_gen: v5e
topology: v5e:2x2
jax: 0.10.0
libtpu: 0.0.40
codegen_flags: <defaults>
</compile_context>

<pallas_src>
import functools

import jax
import jax.numpy as jnp
from jax.experimental import pallas as pl
from jax.experimental.pallas import tpu as pltpu

EPS = 1e-5                      # nn.BatchNorm2d default
LANE = 128
VMEM_LIMIT = 48 * 1024 * 1024   # safe on v5e/v6e (128 MiB) and v7x (64 MiB)


def _round_up(x, m):
    return (x + m - 1) // m * m


def _pick_row_block(h):
    for cand in (8, 4, 2):
        if h % cand == 0:
            return cand
    return h                    # odd H: single block


def _im2col_weights(w_hwio, cin_p, cout_p):
    """(3,3,Cin,Cout) f32 -> (9*cin_p, cout_p) bf16, rows ordered (kx, ky, ci)."""
    _, _, cin, cout = w_hwio.shape
    w_pad = jnp.pad(w_hwio, ((0, 0), (0, 0), (0, cin_p - cin), (0, cout_p - cout)))
    parts = []
    for kx in range(3):
        for ky in range(3):
            parts.append(w_pad[ky, kx])                       # (cin_p, cout_p)
    return jnp.concatenate(parts, axis=0).astype(jnp.bfloat16)


# ---------------------------------------------------------------------------
# Kernel 1/2: [optional BN+ReLU of previous stage] -> conv3x3 -> raw output +
# per-block channel sum / sum-of-squares (for the two-pass BatchNorm).
# ---------------------------------------------------------------------------
def _conv_stats_kernel(*refs, bh, width, cin, cout, apply_bn_relu):
    if apply_bn_relu:
        main_ref, top_ref, bot_ref, w_ref, scale_ref, shift_ref, y_ref, st_ref = refs
    else:
        main_ref, top_ref, bot_ref, w_ref, y_ref, st_ref = refs

    i = pl.program_id(1)
    n_blk = pl.num_programs(1)

    # (bh+2)-row window: halo row above + row block + halo row below (bf16).
    window = jnp.concatenate([top_ref[...], main_ref[...], bot_ref[...]], axis=1)

    if apply_bn_relu:
        # Previous stage's BatchNorm (folded scale/shift) + ReLU, f32 math.
        wf = window.astype(jnp.float32)
        wf = (wf * scale_ref[...].reshape(1, 1, 1, cin)
              + shift_ref[...].reshape(1, 1, 1, cin))
        window = jnp.maximum(wf, 0.0).astype(jnp.bfloat16)

    # Zero the halo rows that fall outside the image (= conv zero padding).
    grow = jax.lax.broadcasted_iota(jnp.int32, window.shape, 1) + (i * bh - 1)
    valid = jnp.logical_and(grow >= 0, grow < n_blk * bh)
    window = jnp.where(valid, window, jnp.zeros_like(window))

    # Zero-pad W by one column each side; plain slices below give the kx shift.
    zcol = jnp.zeros((1, bh + 2, 1, cin), window.dtype)
    hpad = jnp.concatenate([zcol, window, zcol], axis=2)      # (1, bh+2, W+2, cin)

    # 3 accumulated MXU dots of K = 3*cin (one per kx), f32 accumulation.
    acc = jnp.zeros((bh * width, cout), jnp.float32)
    for kx in range(3):
        sl = hpad[:, :, kx:kx + width, :]                     # (1, bh+2, W, cin)
        patch = jnp.concatenate([sl[:, ky:ky + bh, :, :] for ky in range(3)],
                                axis=-1)                      # (1, bh, W, 3*cin)
        acc = acc + jnp.dot(patch.reshape(bh * width, 3 * cin),
                            w_ref[kx * 3 * cin:(kx + 1) * 3 * cin, :],
                            preferred_element_type=jnp.float32)

    # Raw conv output (conv bias omitted: cancelled exactly by the batch-stat
    # mean subtraction of training-mode BatchNorm).
    y_ref[...] = acc.reshape(1, bh, width, cout).astype(y_ref.dtype)

    # Per-block channel statistics.
    s = jnp.sum(acc, axis=0, keepdims=True)                   # (1, cout)
    sq = jnp.sum(acc * acc, axis=0, keepdims=True)
    st_ref[...] = jnp.concatenate([s, sq], axis=0).reshape(1, 1, 2, cout)


def _conv_stats_call(src, w_flat, scale, shift, *, bh, apply_bn_relu):
    N, H, W, cin = src.shape
    cout = w_flat.shape[-1]
    n_blk = H // bh

    im_full = lambda n, i: (0, 0)
    in_specs = [
        pl.BlockSpec((1, bh, W, cin), lambda n, i: (n, i, 0, 0)),
        # 1-row halo blocks; clamped index maps, masked in-kernel at boundaries.
        pl.BlockSpec((1, 1, W, cin),
                     lambda n, i: (n, jnp.maximum(i * bh - 1, 0), 0, 0)),
        pl.BlockSpec((1, 1, W, cin),
                     lambda n, i: (n, jnp.minimum(i * bh + bh, H - 1), 0, 0)),
        pl.BlockSpec(w_flat.shape, im_full),                  # resident weights
    ]
    operands = [src, src, src, w_flat]
    if apply_bn_relu:
        in_specs += [pl.BlockSpec(scale.shape, im_full),
                     pl.BlockSpec(shift.shape, im_full)]
        operands += [scale, shift]

    kernel = functools.partial(_conv_stats_kernel, bh=bh, width=W, cin=cin,
                               cout=cout, apply_bn_relu=apply_bn_relu)
    y, stats = pl.pallas_call(
        kernel,
        grid=(N, n_blk),
        in_specs=in_specs,
        out_specs=(
            pl.BlockSpec((1, bh, W, cout), lambda n, i: (n, i, 0, 0)),
            pl.BlockSpec((1, 1, 2, cout), lambda n, i: (n, i, 0, 0)),
        ),
        out_shape=(
            jax.ShapeDtypeStruct((N, H, W, cout), jnp.bfloat16),
            jax.ShapeDtypeStruct((N, n_blk, 2, cout), jnp.float32),
        ),
        compiler_params=pltpu.CompilerParams(
            dimension_semantics=("parallel", "parallel"),
            vmem_limit_bytes=VMEM_LIMIT),
    )(*operands)
    return y, stats


# ---------------------------------------------------------------------------
# Kernel 3: final BatchNorm apply + ReLU (elementwise), bf16 -> f32 output.
# ---------------------------------------------------------------------------
def _bn_relu_kernel(y_ref, scale_ref, shift_ref, out_ref):
    c = y_ref.shape[-1]
    y = y_ref[...].astype(jnp.float32)
    y = y * scale_ref[...].reshape(1, 1, 1, c) + shift_ref[...].reshape(1, 1, 1, c)
    out_ref[...] = jnp.maximum(y, 0.0).astype(out_ref.dtype)


def _bn_relu_call(y, scale, shift, *, bh):
    N, H, W, cout = y.shape
    n_blk = H // bh
    im_full = lambda n, i: (0, 0)
    # NOTE: output stays lane-dense at cout_p; for small real Cout the padded
    # channels are written too and sliced off in the wrapper (HBM overhead noted).
    return pl.pallas_call(
        _bn_relu_kernel,
        grid=(N, n_blk),
        in_specs=[pl.BlockSpec((1, bh, W, cout), lambda n, i: (n, i, 0, 0)),
                  pl.BlockSpec(scale.shape, im_full),
                  pl.BlockSpec(shift.shape, im_full)],
        out_specs=pl.BlockSpec((1, bh, W, cout), lambda n, i: (n, i, 0, 0)),
        out_shape=jax.ShapeDtypeStruct((N, H, W, cout), jnp.float32),
        compiler_params=pltpu.CompilerParams(
            dimension_semantics=("parallel", "parallel"),
            vmem_limit_bytes=VMEM_LIMIT),
    )(y, scale, shift)


def _fold_bn(stats, gamma, beta, count, cout_p):
    """Reduce per-block stats to folded per-channel scale/shift (f32)."""
    cout = gamma.shape[-1]
    g = jnp.pad(gamma, ((0, 0), (0, cout_p - cout)))[0]        # padded gammas = 0
    b = jnp.pad(beta, ((0, 0), (0, cout_p - cout)))[0]
    s = jnp.sum(stats[:, :, 0, :], axis=(0, 1))
    sq = jnp.sum(stats[:, :, 1, :], axis=(0, 1))
    mean = s / count
    # Single-pass biased variance; clamp guards tiny negative from cancellation.
    # TODO(synk): use a shifted/two-pass variance if mean >> std on real data.
    var = jnp.maximum(sq / count - mean * mean, 0.0)
    scale = g * jax.lax.rsqrt(var + EPS)
    shift = b - mean * scale
    return scale.reshape(1, cout_p), shift.reshape(1, cout_p)


@jax.jit
def double_conv(x_nchw, params):
    """Wrapper: NCHW in, NCHW out (like the PyTorch module, training-mode BN)."""
    N, Cin, H, W = x_nchw.shape
    Cout = params["w1"].shape[-1]
    cin_p = _round_up(Cin, LANE)
    cout_p = _round_up(Cout, LANE)
    bh = _pick_row_block(H)
    count = N * H * W

    x = jnp.transpose(x_nchw, (0, 2, 3, 1))                    # NCHW -> NHWC
    x = jnp.pad(x, ((0, 0), (0, 0), (0, 0), (0, cin_p - Cin))).astype(jnp.bfloat16)

    w1f = _im2col_weights(params["w1"], cin_p, cout_p)
    w2f = _im2col_weights(params["w2"], cout_p, cout_p)

    # sweep 1: conv1 -> y1 (raw, bf16) + stats1
    y1, st1 = _conv_stats_call(x, w1f, None, None, bh=bh, apply_bn_relu=False)
    scale1, shift1 = _fold_bn(st1, params["g1"], params["be1"], count, cout_p)

    # sweep 2: relu(bn1(y1)) -> conv2 -> y2 (raw, bf16) + stats2
    y2, st2 = _conv_stats_call(y1, w2f, scale1, shift1, bh=bh, apply_bn_relu=True)
    scale2, shift2 = _fold_bn(st2, params["g2"], params["be2"], count, cout_p)

    # sweep 3: relu(bn2(y2)) -> out (f32)
    out = _bn_relu_call(y2, scale2, shift2, bh=bh)

    out = out[..., :Cout]                                      # drop channel pad
    return jnp.transpose(out, (0, 3, 1, 2))                    # NHWC -> NCHW


def make_params(key, in_channels, out_channels):
    """Deterministic synthetic parameters (shapes match nn.Conv2d / nn.BatchNorm2d)."""
    ks = jax.random.split(key, 8)
    w1 = jax.random.normal(ks[0], (3, 3, in_channels, out_channels), jnp.float32) * 0.1
    b1 = jax.random.normal(ks[1], (1, out_channels), jnp.float32) * 0.1
    w2 = jax.random.normal(ks[2], (3, 3, out_channels, out_channels), jnp.float32) * 0.1
    b2 = jax.random.normal(ks[3], (1, out_channels), jnp.float32) * 0.1
    g1 = 1.0 + 0.1 * jax.random.normal(ks[4], (1, out_channels), jnp.float32)
    be1 = 0.1 * jax.random.normal(ks[5], (1, out_channels), jnp.float32)
    g2 = 1.0 + 0.1 * jax.random.normal(ks[6], (1, out_channels), jnp.float32)
    be2 = 0.1 * jax.random.normal(ks[7], (1, out_channels), jnp.float32)
    return dict(w1=w1, b1=b1, g1=g1, be1=be1, w2=w2, b2=b2, g2=g2, be2=be2)


def _reference(x_nchw, p):
    """Pure-JAX f32 reference replicating the PyTorch forward (training-mode BN)."""
    x = jnp.transpose(x_nchw, (0, 2, 3, 1))
    dn = ("NHWC", "HWIO", "NHWC")

    def block(h, w, b, g, be):
        y = jax.lax.conv_general_dilated(h, w, (1, 1), "SAME",
                                         dimension_numbers=dn) + b.reshape(1, 1, 1, -1)
        m = jnp.mean(y, axis=(0, 1, 2), keepdims=True)
        v = jnp.mean((y - m) ** 2, axis=(0, 1, 2), keepdims=True)  # biased variance
        y = (y - m) * jax.lax.rsqrt(v + EPS)
        y = y * g.reshape(1, 1, 1, -1) + be.reshape(1, 1, 1, -1)
        return jnp.maximum(y, 0.0)

    h = block(x, p["w1"], p["b1"], p["g1"], p["be1"])
    h = block(h, p["w2"], p["b2"], p["g2"], p["be2"])
    return jnp.transpose(h, (0, 3, 1, 2))


if __name__ == "__main__":
    key = jax.random.PRNGKey(0)
    kx_, kp = jax.random.split(key)

    N, Cin, Cout, H, W = 2, 4, 8, 16, 16
    x = jax.random.normal(kx_, (N, Cin, H, W), jnp.float32)        # NCHW, like PyTorch
    params = make_params(kp, Cin, Cout)

    out = jax.block_until_ready(double_conv(x, params))
    ref = _reference(x, params)

    assert out.shape == (N, Cout, H, W), out.shape
    # bf16 MXU inputs + bf16 intermediates (f32 accumulation / BN math) vs. a
    # pure-f32 reference: allow bf16-scale tolerance; indexing/stat bugs would
    # be O(0.5+) off.
    assert jnp.allclose(out, ref, atol=5e-2, rtol=5e-2), \
        float(jnp.max(jnp.abs(out - ref)))

    print("KERNEL_OK")
</pallas_src>

<mosaic_0001>
module attributes {stable_mosaic.version = 11 : i64} {
  func.func @_conv_stats_kernel(%arg0: i32, %arg1: i32, %arg2: memref<1x8x16x128xbf16, #tpu.memory_space<vmem>>, %arg3: memref<1x1x16x128xbf16, #tpu.memory_space<vmem>>, %arg4: memref<1x1x16x128xbf16, #tpu.memory_space<vmem>>, %arg5: memref<1152x128xbf16, #tpu.memory_space<vmem>>, %arg6: memref<1x128xf32, #tpu.memory_space<vmem>>, %arg7: memref<1x128xf32, #tpu.memory_space<vmem>>, %arg8: memref<1x8x16x128xbf16, #tpu.memory_space<vmem>>, %arg9: memref<1x1x2x128xf32, #tpu.memory_space<vmem>>) attributes {dimension_semantics = [#tpu.dimension_semantics<parallel>, #tpu.dimension_semantics<parallel>], iteration_bounds = array<i64: 2, 2>, scalar_prefetch = 0 : i64, scratch_operands = 0 : i64, tpu.core_type = #tpu.core_type<tc>, window_params = [{transform_indices = @transform_0, window_bounds = array<i64: 1, 8, 16, 128>}, {transform_indices = @transform_1, window_bounds = array<i64: 1, 1, 16, 128>}, {transform_indices = @transform_2, window_bounds = array<i64: 1, 1, 16, 128>}, {pipeline_mode = #tpu.pipeline_mode<synchronous>, transform_indices = @transform_3, window_bounds = array<i64: 1152, 128>}, {pipeline_mode = #tpu.pipeline_mode<synchronous>, transform_indices = @transform_4, window_bounds = array<i64: 1, 128>}, {pipeline_mode = #tpu.pipeline_mode<synchronous>, transform_indices = @transform_5, window_bounds = array<i64: 1, 128>}, {transform_indices = @transform_6, window_bounds = array<i64: 1, 8, 16, 128>}, {transform_indices = @transform_7, window_bounds = array<i64: 1, 1, 2, 128>}]} {
    %c0 = arith.constant 0 : index
    %c0_0 = arith.constant 0 : index
    %c0_1 = arith.constant 0 : index
    %c0_2 = arith.constant 0 : index
    %0 = vector.load %arg3[%c0, %c0_0, %c0_1, %c0_2] : memref<1x1x16x128xbf16, #tpu.memory_space<vmem>>, vector<1x1x16x128xbf16>
    %c0_3 = arith.constant 0 : index
    %c0_4 = arith.constant 0 : index
    %c0_5 = arith.constant 0 : index
    %c0_6 = arith.constant 0 : index
    %1 = vector.load %arg2[%c0_3, %c0_4, %c0_5, %c0_6] : memref<1x8x16x128xbf16, #tpu.memory_space<vmem>>, vector<1x8x16x128xbf16>
    %c0_7 = arith.constant 0 : index
    %c0_8 = arith.constant 0 : index
    %c0_9 = arith.constant 0 : index
    %c0_10 = arith.constant 0 : index
    %2 = vector.load %arg4[%c0_7, %c0_8, %c0_9, %c0_10] : memref<1x1x16x128xbf16, #tpu.memory_space<vmem>>, vector<1x1x16x128xbf16>
    %3 = tpu.concatenate %0, %1, %2 in 1 : vector<1x1x16x128xbf16>, vector<1x8x16x128xbf16>, vector<1x1x16x128xbf16> -> vector<1x10x16x128xbf16>
    %4 = arith.extf %3 : vector<1x10x16x128xbf16> to vector<1x10x16x128xf32>
    %c0_11 = arith.constant 0 : index
    %c0_12 = arith.constant 0 : index
    %5 = vector.load %arg6[%c0_11, %c0_12] : memref<1x128xf32, #tpu.memory_space<vmem>>, vector<1x128xf32>
    %6 = vector.shape_cast %5 : vector<1x128xf32> to vector<1x1x1x128xf32>
    %7 = vector.broadcast %6 : vector<1x1x1x128xf32> to vector<1x10x16x128xf32>
    %8 = arith.mulf %4, %7 : vector<1x10x16x128xf32>
    %c0_13 = arith.constant 0 : index
    %c0_14 = arith.constant 0 : index
    %9 = vector.load %arg7[%c0_13, %c0_14] : memref<1x128xf32, #tpu.memory_space<vmem>>, vector<1x128xf32>
    %10 = vector.shape_cast %9 : vector<1x128xf32> to vector<1x1x1x128xf32>
    %11 = vector.broadcast %10 : vector<1x1x1x128xf32> to vector<1x10x16x128xf32>
    %12 = arith.addf %8, %11 : vector<1x10x16x128xf32>
    %cst = arith.constant 0.000000e+00 : f32
    %13 = vector.broadcast %cst : f32 to vector<1x10x16x128xf32>
    %14 = arith.maximumf %12, %13 : vector<1x10x16x128xf32>
    %15 = arith.truncf %14 : vector<1x10x16x128xf32> to vector<1x10x16x128xbf16>
    %16 = tpu.iota {dimensions = array<i32: 1>} : vector<1x10x16x128xi32>
    %c8_i32 = arith.constant 8 : i32
    %17 = arith.muli %arg1, %c8_i32 : i32
    %c1_i32 = arith.constant 1 : i32
    %18 = arith.subi %17, %c1_i32 : i32
    %19 = vector.broadcast %18 : i32 to vector<1x10x16x128xi32>
    %20 = arith.addi %16, %19 : vector<1x10x16x128xi32>
    %c0_i32 = arith.constant 0 : i32
    %21 = vector.broadcast %c0_i32 : i32 to vector<1x10x16x128xi32>
    %22 = arith.cmpi sge, %20, %21 : vector<1x10x16x128xi32>
    %c16_i32 = arith.constant 16 : i32
    %23 = vector.broadcast %c16_i32 : i32 to vector<1x10x16x128xi32>
    %24 = arith.cmpi slt, %20, %23 : vector<1x10x16x128xi32>
    %25 = arith.andi %22, %24 : vector<1x10x16x128xi1>
    %cst_15 = arith.constant 0.000000e+00 : bf16
    %26 = vector.broadcast %cst_15 : bf16 to vector<1x10x16x128xbf16>
    %27 = arith.select %25, %15, %26 : vector<1x10x16x128xi1>, vector<1x10x16x128xbf16>
    %cst_16 = arith.constant 0.000000e+00 : bf16
    %28 = vector.broadcast %cst_16 : bf16 to vector<1x10x1x128xbf16>
    %29 = tpu.concatenate %28, %27, %28 in 2 : vector<1x10x1x128xbf16>, vector<1x10x16x128xbf16>, vector<1x10x1x128xbf16> -> vector<1x10x18x128xbf16>
    %cst_17 = arith.constant 0.000000e+00 : f32
    %30 = vector.broadcast %cst_17 : f32 to vector<128x128xf32>
    %31 = vector.extract_strided_slice %29 {offsets = [0, 0, 0, 0], sizes = [1, 10, 16, 128], strides = [1, 1, 1, 1]} : vector<1x10x18x128xbf16> to vector<1x10x16x128xbf16>
    %32 = vector.extract_strided_slice %31 {offsets = [0, 0, 0, 0], sizes = [1, 8, 16, 128], strides = [1, 1, 1, 1]} : vector<1x10x16x128xbf16> to vector<1x8x16x128xbf16>
    %33 = vector.extract_strided_slice %31 {offsets = [0, 1, 0, 0], sizes = [1, 8, 16, 128], strides = [1, 1, 1, 1]} : vector<1x10x16x128xbf16> to vector<1x8x16x128xbf16>
    %34 = vector.extract_strided_slice %31 {offsets = [0, 2, 0, 0], sizes = [1, 8, 16, 128], strides = [1, 1, 1, 1]} : vector<1x10x16x128xbf16> to vector<1x8x16x128xbf16>
    %35 = tpu.concatenate %32, %33, %34 in 3 : vector<1x8x16x128xbf16>, vector<1x8x16x128xbf16>, vector<1x8x16x128xbf16> -> vector<1x8x16x384xbf16>
    %36 = vector.shape_cast %35 : vector<1x8x16x384xbf16> to vector<128x384xbf16>
    %c0_18 = arith.constant 0 : index
    %c0_19 = arith.constant 0 : index
    %37 = vector.load %arg5[%c0_18, %c0_19] : memref<1152x128xbf16, #tpu.memory_space<vmem>>, vector<384x128xbf16>
    %cst_20 = arith.constant dense<0.000000e+00> : vector<128x128xf32>
    %38 = tpu.matmul %36, %37, %cst_20 {dimension_numbers = #tpu.dot_dimension_numbers<[1], [0], [0], [1], [0, 0, 1, 1], [], []>} : vector<128x384xbf16>, vector<384x128xbf16>, vector<128x128xf32> -> vector<128x128xf32>
    %39 = arith.addf %30, %38 : vector<128x128xf32>
    %40 = vector.extract_strided_slice %29 {offsets = [0, 0, 1, 0], sizes = [1, 10, 16, 128], strides = [1, 1, 1, 1]} : vector<1x10x18x128xbf16> to vector<1x10x16x128xbf16>
    %41 = vector.extract_strided_slice %40 {offsets = [0, 0, 0, 0], sizes = [1, 8, 16, 128], strides = [1, 1, 1, 1]} : vector<1x10x16x128xbf16> to vector<1x8x16x128xbf16>
    %42 = vector.extract_strided_slice %40 {offsets = [0, 1, 0, 0], sizes = [1, 8, 16, 128], strides = [1, 1, 1, 1]} : vector<1x10x16x128xbf16> to vector<1x8x16x128xbf16>
    %43 = vector.extract_strided_slice %40 {offsets = [0, 2, 0, 0], sizes = [1, 8, 16, 128], strides = [1, 1, 1, 1]} : vector<1x10x16x128xbf16> to vector<1x8x16x128xbf16>
    %44 = tpu.concatenate %41, %42, %43 in 3 : vector<1x8x16x128xbf16>, vector<1x8x16x128xbf16>, vector<1x8x16x128xbf16> -> vector<1x8x16x384xbf16>
    %45 = vector.shape_cast %44 : vector<1x8x16x384xbf16> to vector<128x384xbf16>
    %c384 = arith.constant 384 : index
    %c0_21 = arith.constant 0 : index
    %46 = vector.load %arg5[%c384, %c0_21] : memref<1152x128xbf16, #tpu.memory_space<vmem>>, vector<384x128xbf16>
    %cst_22 = arith.constant dense<0.000000e+00> : vector<128x128xf32>
    %47 = tpu.matmul %45, %46, %cst_22 {dimension_numbers = #tpu.dot_dimension_numbers<[1], [0], [0], [1], [0, 0, 1, 1], [], []>} : vector<128x384xbf16>, vector<384x128xbf16>, vector<128x128xf32> -> vector<128x128xf32>
    %48 = arith.addf %39, %47 : vector<128x128xf32>
    %49 = vector.extract_strided_slice %29 {offsets = [0, 0, 2, 0], sizes = [1, 10, 16, 128], strides = [1, 1, 1, 1]} : vector<1x10x18x128xbf16> to vector<1x10x16x128xbf16>
    %50 = vector.extract_strided_slice %49 {offsets = [0, 0, 0, 0], sizes = [1, 8, 16, 128], strides = [1, 1, 1, 1]} : vector<1x10x16x128xbf16> to vector<1x8x16x128xbf16>
    %51 = vector.extract_strided_slice %49 {offsets = [0, 1, 0, 0], sizes = [1, 8, 16, 128], strides = [1, 1, 1, 1]} : vector<1x10x16x128xbf16> to vector<1x8x16x128xbf16>
    %52 = vector.extract_strided_slice %49 {offsets = [0, 2, 0, 0], sizes = [1, 8, 16, 128], strides = [1, 1, 1, 1]} : vector<1x10x16x128xbf16> to vector<1x8x16x128xbf16>
    %53 = tpu.concatenate %50, %51, %52 in 3 : vector<1x8x16x128xbf16>, vector<1x8x16x128xbf16>, vector<1x8x16x128xbf16> -> vector<1x8x16x384xbf16>
    %54 = vector.shape_cast %53 : vector<1x8x16x384xbf16> to vector<128x384xbf16>
    %c768 = arith.constant 768 : index
    %c0_23 = arith.constant 0 : index
    %55 = vector.load %arg5[%c768, %c0_23] : memref<1152x128xbf16, #tpu.memory_space<vmem>>, vector<384x128xbf16>
    %cst_24 = arith.constant dense<0.000000e+00> : vector<128x128xf32>
    %56 = tpu.matmul %54, %55, %cst_24 {dimension_numbers = #tpu.dot_dimension_numbers<[1], [0], [0], [1], [0, 0, 1, 1], [], []>} : vector<128x384xbf16>, vector<384x128xbf16>, vector<128x128xf32> -> vector<128x128xf32>
    %57 = arith.addf %48, %56 : vector<128x128xf32>
    %58 = vector.shape_cast %57 : vector<128x128xf32> to vector<1x8x16x128xf32>
    %59 = arith.truncf %58 : vector<1x8x16x128xf32> to vector<1x8x16x128xbf16>
    %c0_25 = arith.constant 0 : index
    %c0_26 = arith.constant 0 : index
    %c0_27 = arith.constant 0 : index
    %c0_28 = arith.constant 0 : index
    %60 = vector.load %arg8[%c0_25, %c0_26, %c0_27, %c0_28] : memref<1x8x16x128xbf16, #tpu.memory_space<vmem>>, vector<1x8x16x128xbf16>
    tpu.vector_store %arg8[%c0_25, %c0_26, %c0_27, %c0_28], %59 {strides = array<i32>} : memref<1x8x16x128xbf16, #tpu.memory_space<vmem>>, vector<1x8x16x128xbf16>,
    %cst_29 = arith.constant dense<0.000000e+00> : vector<128xf32>
    %61 = vector.multi_reduction <add>, %57, %cst_29 [0] : vector<128x128xf32> to vector<128xf32>
    %62 = vector.shape_cast %61 : vector<128xf32> to vector<1x128xf32>
    %63 = arith.mulf %57, %57 : vector<128x128xf32>
    %cst_30 = arith.constant dense<0.000000e+00> : vector<128xf32>
    %64 = vector.multi_reduction <add>, %63, %cst_30 [0] : vector<128x128xf32> to vector<128xf32>
    %65 = vector.shape_cast %64 : vector<128xf32> to vector<1x128xf32>
    %66 = tpu.concatenate %62, %65 in 0 : vector<1x128xf32>, vector<1x128xf32> -> vector<2x128xf32>
    %67 = vector.shape_cast %66 : vector<2x128xf32> to vector<1x1x2x128xf32>
    %c0_31 = arith.constant 0 : index
    %c0_32 = arith.constant 0 : index
    %c0_33 = arith.constant 0 : index
    %c0_34 = arith.constant 0 : index
    %68 = vector.load %arg9[%c0_31, %c0_32, %c0_33, %c0_34] : memref<1x1x2x128xf32, #tpu.memory_space<vmem>>, vector<1x1x2x128xf32>
    tpu.vector_store %arg9[%c0_31, %c0_32, %c0_33, %c0_34], %67 {strides = array<i32>} : memref<1x1x2x128xf32, #tpu.memory_space<vmem>>, vector<1x1x2x128xf32>,
    return
  }
  func.func @transform_0(%arg0: i32, %arg1: i32) -> (i32, i32, i32, i32) {
    %c0_i32 = arith.constant 0 : i32
    %c0_i32_0 = arith.constant 0 : i32
    %c0_i32_1 = arith.constant 0 : i32
    return %arg0, %arg1, %c0_i32, %c0_i32_0 : i32, i32, i32, i32
  }
  func.func @transform_1(%arg0: i32, %arg1: i32) -> (i32, i32, i32, i32) {
    %c8_i32 = arith.constant 8 : i32
    %0 = arith.muli %arg1, %c8_i32 : i32
    %c1_i32 = arith.constant 1 : i32
    %1 = arith.subi %0, %c1_i32 : i32
    %c0_i32 = arith.constant 0 : i32
    %2 = arith.maxsi %1, %c0_i32 : i32
    %c0_i32_0 = arith.constant 0 : i32
    %c0_i32_1 = arith.constant 0 : i32
    %c0_i32_2 = arith.constant 0 : i32
    return %arg0, %2, %c0_i32_0, %c0_i32_1 : i32, i32, i32, i32
  }
  func.func @transform_2(%arg0: i32, %arg1: i32) -> (i32, i32, i32, i32) {
    %c8_i32 = arith.constant 8 : i32
    %0 = arith.muli %arg1, %c8_i32 : i32
    %c8_i32_0 = arith.constant 8 : i32
    %1 = arith.addi %0, %c8_i32_0 : i32
    %c15_i32 = arith.constant 15 : i32
    %2 = arith.minsi %1, %c15_i32 : i32
    %c0_i32 = arith.constant 0 : i32
    %c0_i32_1 = arith.constant 0 : i32
    %c0_i32_2 = arith.constant 0 : i32
    return %arg0, %2, %c0_i32, %c0_i32_1 : i32, i32, i32, i32
  }
  func.func @transform_3(%arg0: i32, %arg1: i32) -> (i32, i32) {
    %c0_i32 = arith.constant 0 : i32
    %c0_i32_0 = arith.constant 0 : i32
    %c0_i32_1 = arith.constant 0 : i32
    return %c0_i32, %c0_i32_0 : i32, i32
  }
  func.func @transform_4(%arg0: i32, %arg1: i32) -> (i32, i32) {
    %c0_i32 = arith.constant 0 : i32
    %c0_i32_0 = arith.constant 0 : i32
    %c0_i32_1 = arith.constant 0 : i32
    return %c0_i32, %c0_i32_0 : i32, i32
  }
  func.func @transform_5(%arg0: i32, %arg1: i32) -> (i32, i32) {
    %c0_i32 = arith.constant 0 : i32
    %c0_i32_0 = arith.constant 0 : i32
    %c0_i32_1 = arith.constant 0 : i32
    return %c0_i32, %c0_i32_0 : i32, i32
  }
  func.func @transform_6(%arg0: i32, %arg1: i32) -> (i32, i32, i32, i32) {
    %c0_i32 = arith.constant 0 : i32
    %c0_i32_0 = arith.constant 0 : i32
    %c0_i32_1 = arith.constant 0 : i32
    return %arg0, %arg1, %c0_i32, %c0_i32_0 : i32, i32, i32, i32
  }
  func.func @transform_7(%arg0: i32, %arg1: i32) -> (i32, i32, i32, i32) {
    %c0_i32 = arith.constant 0 : i32
    %c0_i32_0 = arith.constant 0 : i32
    %c0_i32_1 = arith.constant 0 : i32
    return %arg0, %arg1, %c0_i32, %c0_i32_0 : i32, i32, i32, i32
  }
}

module attributes {stable_mosaic.version = 11 : i64} {
  func.func @_conv_stats_kernel(%arg0: i32, %arg1: i32, %arg2: memref<1x8x16x128xbf16, #tpu.memory_space<vmem>>, %arg3: memref<1x1x16x128xbf16, #tpu.memory_space<vmem>>, %arg4: memref<1x1x16x128xbf16, #tpu.memory_space<vmem>>, %arg5: memref<1152x128xbf16, #tpu.memory_space<vmem>>, %arg6: memref<1x8x16x128xbf16, #tpu.memory_space<vmem>>, %arg7: memref<1x1x2x128xf32, #tpu.memory_space<vmem>>) attributes {dimension_semantics = [#tpu.dimension_semantics<parallel>, #tpu.dimension_semantics<parallel>], iteration_bounds = array<i64: 2, 2>, scalar_prefetch = 0 : i64, scratch_operands = 0 : i64, tpu.core_type = #tpu.core_type<tc>, window_params = [{transform_indices = @transform_0, window_bounds = array<i64: 1, 8, 16, 128>}, {transform_indices = @transform_1, window_bounds = array<i64: 1, 1, 16, 128>}, {transform_indices = @transform_2, window_bounds = array<i64: 1, 1, 16, 128>}, {pipeline_mode = #tpu.pipeline_mode<synchronous>, transform_indices = @transform_3, window_bounds = array<i64: 1152, 128>}, {transform_indices = @transform_4, window_bounds = array<i64: 1, 8, 16, 128>}, {transform_indices = @transform_5, window_bounds = array<i64: 1, 1, 2, 128>}]} {
    %c0 = arith.constant 0 : index
    %c0_0 = arith.constant 0 : index
    %c0_1 = arith.constant 0 : index
    %c0_2 = arith.constant 0 : index
    %0 = vector.load %arg3[%c0, %c0_0, %c0_1, %c0_2] : memref<1x1x16x128xbf16, #tpu.memory_space<vmem>>, vector<1x1x16x128xbf16>
    %c0_3 = arith.constant 0 : index
    %c0_4 = arith.constant 0 : index
    %c0_5 = arith.constant 0 : index
    %c0_6 = arith.constant 0 : index
    %1 = vector.load %arg2[%c0_3, %c0_4, %c0_5, %c0_6] : memref<1x8x16x128xbf16, #tpu.memory_space<vmem>>, vector<1x8x16x128xbf16>
    %c0_7 = arith.constant 0 : index
    %c0_8 = arith.constant 0 : index
    %c0_9 = arith.constant 0 : index
    %c0_10 = arith.constant 0 : index
    %2 = vector.load %arg4[%c0_7, %c0_8, %c0_9, %c0_10] : memref<1x1x16x128xbf16, #tpu.memory_space<vmem>>, vector<1x1x16x128xbf16>
    %3 = tpu.concatenate %0, %1, %2 in 1 : vector<1x1x16x128xbf16>, vector<1x8x16x128xbf16>, vector<1x1x16x128xbf16> -> vector<1x10x16x128xbf16>
    %4 = tpu.iota {dimensions = array<i32: 1>} : vector<1x10x16x128xi32>
    %c8_i32 = arith.constant 8 : i32
    %5 = arith.muli %arg1, %c8_i32 : i32
    %c1_i32 = arith.constant 1 : i32
    %6 = arith.subi %5, %c1_i32 : i32
    %7 = vector.broadcast %6 : i32 to vector<1x10x16x128xi32>
    %8 = arith.addi %4, %7 : vector<1x10x16x128xi32>
    %c0_i32 = arith.constant 0 : i32
    %9 = vector.broadcast %c0_i32 : i32 to vector<1x10x16x128xi32>
    %10 = arith.cmpi sge, %8, %9 : vector<1x10x16x128xi32>
    %c16_i32 = arith.constant 16 : i32
    %11 = vector.broadcast %c16_i32 : i32 to vector<1x10x16x128xi32>
    %12 = arith.cmpi slt, %8, %11 : vector<1x10x16x128xi32>
    %13 = arith.andi %10, %12 : vector<1x10x16x128xi1>
    %cst = arith.constant 0.000000e+00 : bf16
    %14 = vector.broadcast %cst : bf16 to vector<1x10x16x128xbf16>
    %15 = arith.select %13, %3, %14 : vector<1x10x16x128xi1>, vector<1x10x16x128xbf16>
    %cst_11 = arith.constant 0.000000e+00 : bf16
    %16 = vector.broadcast %cst_11 : bf16 to vector<1x10x1x128xbf16>
    %17 = tpu.concatenate %16, %15, %16 in 2 : vector<1x10x1x128xbf16>, vector<1x10x16x128xbf16>, vector<1x10x1x128xbf16> -> vector<1x10x18x128xbf16>
    %cst_12 = arith.constant 0.000000e+00 : f32
    %18 = vector.broadcast %cst_12 : f32 to vector<128x128xf32>
    %19 = vector.extract_strided_slice %17 {offsets = [0, 0, 0, 0], sizes = [1, 10, 16, 128], strides = [1, 1, 1, 1]} : vector<1x10x18x128xbf16> to vector<1x10x16x128xbf16>
    %20 = vector.extract_strided_slice %19 {offsets = [0, 0, 0, 0], sizes = [1, 8, 16, 128], strides = [1, 1, 1, 1]} : vector<1x10x16x128xbf16> to vector<1x8x16x128xbf16>
    %21 = vector.extract_strided_slice %19 {offsets = [0, 1, 0, 0], sizes = [1, 8, 16, 128], strides = [1, 1, 1, 1]} : vector<1x10x16x128xbf16> to vector<1x8x16x128xbf16>
    %22 = vector.extract_strided_slice %19 {offsets = [0, 2, 0, 0], sizes = [1, 8, 16, 128], strides = [1, 1, 1, 1]} : vector<1x10x16x128xbf16> to vector<1x8x16x128xbf16>
    %23 = tpu.concatenate %20, %21, %22 in 3 : vector<1x8x16x128xbf16>, vector<1x8x16x128xbf16>, vector<1x8x16x128xbf16> -> vector<1x8x16x384xbf16>
    %24 = vector.shape_cast %23 : vector<1x8x16x384xbf16> to vector<128x384xbf16>
    %c0_13 = arith.constant 0 : index
    %c0_14 = arith.constant 0 : index
    %25 = vector.load %arg5[%c0_13, %c0_14] : memref<1152x128xbf16, #tpu.memory_space<vmem>>, vector<384x128xbf16>
    %cst_15 = arith.constant dense<0.000000e+00> : vector<128x128xf32>
    %26 = tpu.matmul %24, %25, %cst_15 {dimension_numbers = #tpu.dot_dimension_numbers<[1], [0], [0], [1], [0, 0, 1, 1], [], []>} : vector<128x384xbf16>, vector<384x128xbf16>, vector<128x128xf32> -> vector<128x128xf32>
    %27 = arith.addf %18, %26 : vector<128x128xf32>
    %28 = vector.extract_strided_slice %17 {offsets = [0, 0, 1, 0], sizes = [1, 10, 16, 128], strides = [1, 1, 1, 1]} : vector<1x10x18x128xbf16> to vector<1x10x16x128xbf16>
    %29 = vector.extract_strided_slice %28 {offsets = [0, 0, 0, 0], sizes = [1, 8, 16, 128], strides = [1, 1, 1, 1]} : vector<1x10x16x128xbf16> to vector<1x8x16x128xbf16>
    %30 = vector.extract_strided_slice %28 {offsets = [0, 1, 0, 0], sizes = [1, 8, 16, 128], strides = [1, 1, 1, 1]} : vector<1x10x16x128xbf16> to vector<1x8x16x128xbf16>
    %31 = vector.extract_strided_slice %28 {offsets = [0, 2, 0, 0], sizes = [1, 8, 16, 128], strides = [1, 1, 1, 1]} : vector<1x10x16x128xbf16> to vector<1x8x16x128xbf16>
    %32 = tpu.concatenate %29, %30, %31 in 3 : vector<1x8x16x128xbf16>, vector<1x8x16x128xbf16>, vector<1x8x16x128xbf16> -> vector<1x8x16x384xbf16>
    %33 = vector.shape_cast %32 : vector<1x8x16x384xbf16> to vector<128x384xbf16>
    %c384 = arith.constant 384 : index
    %c0_16 = arith.constant 0 : index
    %34 = vector.load %arg5[%c384, %c0_16] : memref<1152x128xbf16, #tpu.memory_space<vmem>>, vector<384x128xbf16>
    %cst_17 = arith.constant dense<0.000000e+00> : vector<128x128xf32>
    %35 = tpu.matmul %33, %34, %cst_17 {dimension_numbers = #tpu.dot_dimension_numbers<[1], [0], [0], [1], [0, 0, 1, 1], [], []>} : vector<128x384xbf16>, vector<384x128xbf16>, vector<128x128xf32> -> vector<128x128xf32>
    %36 = arith.addf %27, %35 : vector<128x128xf32>
    %37 = vector.extract_strided_slice %17 {offsets = [0, 0, 2, 0], sizes = [1, 10, 16, 128], strides = [1, 1, 1, 1]} : vector<1x10x18x128xbf16> to vector<1x10x16x128xbf16>
    %38 = vector.extract_strided_slice %37 {offsets = [0, 0, 0, 0], sizes = [1, 8, 16, 128], strides = [1, 1, 1, 1]} : vector<1x10x16x128xbf16> to vector<1x8x16x128xbf16>
    %39 = vector.extract_strided_slice %37 {offsets = [0, 1, 0, 0], sizes = [1, 8, 16, 128], strides = [1, 1, 1, 1]} : vector<1x10x16x128xbf16> to vector<1x8x16x128xbf16>
    %40 = vector.extract_strided_slice %37 {offsets = [0, 2, 0, 0], sizes = [1, 8, 16, 128], strides = [1, 1, 1, 1]} : vector<1x10x16x128xbf16> to vector<1x8x16x128xbf16>
    %41 = tpu.concatenate %38, %39, %40 in 3 : vector<1x8x16x128xbf16>, vector<1x8x16x128xbf16>, vector<1x8x16x128xbf16> -> vector<1x8x16x384xbf16>
    %42 = vector.shape_cast %41 : vector<1x8x16x384xbf16> to vector<128x384xbf16>
    %c768 = arith.constant 768 : index
    %c0_18 = arith.constant 0 : index
    %43 = vector.load %arg5[%c768, %c0_18] : memref<1152x128xbf16, #tpu.memory_space<vmem>>, vector<384x128xbf16>
    %cst_19 = arith.constant dense<0.000000e+00> : vector<128x128xf32>
    %44 = tpu.matmul %42, %43, %cst_19 {dimension_numbers = #tpu.dot_dimension_numbers<[1], [0], [0], [1], [0, 0, 1, 1], [], []>} : vector<128x384xbf16>, vector<384x128xbf16>, vector<128x128xf32> -> vector<128x128xf32>
    %45 = arith.addf %36, %44 : vector<128x128xf32>
    %46 = vector.shape_cast %45 : vector<128x128xf32> to vector<1x8x16x128xf32>
    %47 = arith.truncf %46 : vector<1x8x16x128xf32> to vector<1x8x16x128xbf16>
    %c0_20 = arith.constant 0 : index
    %c0_21 = arith.constant 0 : index
    %c0_22 = arith.constant 0 : index
    %c0_23 = arith.constant 0 : index
    %48 = vector.load %arg6[%c0_20, %c0_21, %c0_22, %c0_23] : memref<1x8x16x128xbf16, #tpu.memory_space<vmem>>, vector<1x8x16x128xbf16>
    tpu.vector_store %arg6[%c0_20, %c0_21, %c0_22, %c0_23], %47 {strides = array<i32>} : memref<1x8x16x128xbf16, #tpu.memory_space<vmem>>, vector<1x8x16x128xbf16>,
    %cst_24 = arith.constant dense<0.000000e+00> : vector<128xf32>
    %49 = vector.multi_reduction <add>, %45, %cst_24 [0] : vector<128x128xf32> to vector<128xf32>
    %50 = vector.shape_cast %49 : vector<128xf32> to vector<1x128xf32>
    %51 = arith.mulf %45, %45 : vector<128x128xf32>
    %cst_25 = arith.constant dense<0.000000e+00> : vector<128xf32>
    %52 = vector.multi_reduction <add>, %51, %cst_25 [0] : vector<128x128xf32> to vector<128xf32>
    %53 = vector.shape_cast %52 : vector<128xf32> to vector<1x128xf32>
    %54 = tpu.concatenate %50, %53 in 0 : vector<1x128xf32>, vector<1x128xf32> -> vector<2x128xf32>
    %55 = vector.shape_cast %54 : vector<2x128xf32> to vector<1x1x2x128xf32>
    %c0_26 = arith.constant 0 : index
    %c0_27 = arith.constant 0 : index
    %c0_28 = arith.constant 0 : index
    %c0_29 = arith.constant 0 : index
    %56 = vector.load %arg7[%c0_26, %c0_27, %c0_28, %c0_29] : memref<1x1x2x128xf32, #tpu.memory_space<vmem>>, vector<1x1x2x128xf32>
    tpu.vector_store %arg7[%c0_26, %c0_27, %c0_28, %c0_29], %55 {strides = array<i32>} : memref<1x1x2x128xf32, #tpu.memory_space<vmem>>, vector<1x1x2x128xf32>,
    return
  }
  func.func @transform_0(%arg0: i32, %arg1: i32) -> (i32, i32, i32, i32) {
    %c0_i32 = arith.constant 0 : i32
    %c0_i32_0 = arith.constant 0 : i32
    %c0_i32_1 = arith.constant 0 : i32
    return %arg0, %arg1, %c0_i32, %c0_i32_0 : i32, i32, i32, i32
  }
  func.func @transform_1(%arg0: i32, %arg1: i32) -> (i32, i32, i32, i32) {
    %c8_i32 = arith.constant 8 : i32
    %0 = arith.muli %arg1, %c8_i32 : i32
    %c1_i32 = arith.constant 1 : i32
    %1 = arith.subi %0, %c1_i32 : i32
    %c0_i32 = arith.constant 0 : i32
    %2 = arith.maxsi %1, %c0_i32 : i32
    %c0_i32_0 = arith.constant 0 : i32
    %c0_i32_1 = arith.constant 0 : i32
    %c0_i32_2 = arith.constant 0 : i32
    return %arg0, %2, %c0_i32_0, %c0_i32_1 : i32, i32, i32, i32
  }
  func.func @transform_2(%arg0: i32, %arg1: i32) -> (i32, i32, i32, i32) {
    %c8_i32 = arith.constant 8 : i32
    %0 = arith.muli %arg1, %c8_i32 : i32
    %c8_i32_0 = arith.constant 8 : i32
    %1 = arith.addi %0, %c8_i32_0 : i32
    %c15_i32 = arith.constant 15 : i32
    %2 = arith.minsi %1, %c15_i32 : i32
    %c0_i32 = arith.constant 0 : i32
    %c0_i32_1 = arith.constant 0 : i32
    %c0_i32_2 = arith.constant 0 : i32
    return %arg0, %2, %c0_i32, %c0_i32_1 : i32, i32, i32, i32
  }
  func.func @transform_3(%arg0: i32, %arg1: i32) -> (i32, i32) {
    %c0_i32 = arith.constant 0 : i32
    %c0_i32_0 = arith.constant 0 : i32
    %c0_i32_1 = arith.constant 0 : i32
    return %c0_i32, %c0_i32_0 : i32, i32
  }
  func.func @transform_4(%arg0: i32, %arg1: i32) -> (i32, i32, i32, i32) {
    %c0_i32 = arith.constant 0 : i32
    %c0_i32_0 = arith.constant 0 : i32
    %c0_i32_1 = arith.constant 0 : i32
    return %arg0, %arg1, %c0_i32, %c0_i32_0 : i32, i32, i32, i32
  }
  func.func @transform_5(%arg0: i32, %arg1: i32) -> (i32, i32, i32, i32) {
    %c0_i32 = arith.constant 0 : i32
    %c0_i32_0 = arith.constant 0 : i32
    %c0_i32_1 = arith.constant 0 : i32
    return %arg0, %arg1, %c0_i32, %c0_i32_0 : i32, i32, i32, i32
  }
}

module attributes {stable_mosaic.version = 11 : i64} {
  func.func @_bn_relu_kernel(%arg0: i32, %arg1: i32, %arg2: memref<1x8x16x128xbf16, #tpu.memory_space<vmem>>, %arg3: memref<1x128xf32, #tpu.memory_space<vmem>>, %arg4: memref<1x128xf32, #tpu.memory_space<vmem>>, %arg5: memref<1x8x16x128xf32, #tpu.memory_space<vmem>>) attributes {dimension_semantics = [#tpu.dimension_semantics<parallel>, #tpu.dimension_semantics<parallel>], iteration_bounds = array<i64: 2, 2>, scalar_prefetch = 0 : i64, scratch_operands = 0 : i64, tpu.core_type = #tpu.core_type<tc>, window_params = [{transform_indices = @transform_0, window_bounds = array<i64: 1, 8, 16, 128>}, {pipeline_mode = #tpu.pipeline_mode<synchronous>, transform_indices = @transform_1, window_bounds = array<i64: 1, 128>}, {pipeline_mode = #tpu.pipeline_mode<synchronous>, transform_indices = @transform_2, window_bounds = array<i64: 1, 128>}, {transform_indices = @transform_3, window_bounds = array<i64: 1, 8, 16, 128>}]} {
    %c0 = arith.constant 0 : index
    %c0_0 = arith.constant 0 : index
    %c0_1 = arith.constant 0 : index
    %c0_2 = arith.constant 0 : index
    %0 = vector.load %arg2[%c0, %c0_0, %c0_1, %c0_2] : memref<1x8x16x128xbf16, #tpu.memory_space<vmem>>, vector<1x8x16x128xbf16>
    %1 = arith.extf %0 : vector<1x8x16x128xbf16> to vector<1x8x16x128xf32>
    %c0_3 = arith.constant 0 : index
    %c0_4 = arith.constant 0 : index
    %2 = vector.load %arg3[%c0_3, %c0_4] : memref<1x128xf32, #tpu.memory_space<vmem>>, vector<1x128xf32>
    %3 = vector.shape_cast %2 : vector<1x128xf32> to vector<1x1x1x128xf32>
    %4 = vector.broadcast %3 : vector<1x1x1x128xf32> to vector<1x8x16x128xf32>
    %5 = arith.mulf %1, %4 : vector<1x8x16x128xf32>
    %c0_5 = arith.constant 0 : index
    %c0_6 = arith.constant 0 : index
    %6 = vector.load %arg4[%c0_5, %c0_6] : memref<1x128xf32, #tpu.memory_space<vmem>>, vector<1x128xf32>
    %7 = vector.shape_cast %6 : vector<1x128xf32> to vector<1x1x1x128xf32>
    %8 = vector.broadcast %7 : vector<1x1x1x128xf32> to vector<1x8x16x128xf32>
    %9 = arith.addf %5, %8 : vector<1x8x16x128xf32>
    %cst = arith.constant 0.000000e+00 : f32
    %10 = vector.broadcast %cst : f32 to vector<1x8x16x128xf32>
    %11 = arith.maximumf %9, %10 : vector<1x8x16x128xf32>
    %c0_7 = arith.constant 0 : index
    %c0_8 = arith.constant 0 : index
    %c0_9 = arith.constant 0 : index
    %c0_10 = arith.constant 0 : index
    %12 = vector.load %arg5[%c0_7, %c0_8, %c0_9, %c0_10] : memref<1x8x16x128xf32, #tpu.memory_space<vmem>>, vector<1x8x16x128xf32>
    tpu.vector_store %arg5[%c0_7, %c0_8, %c0_9, %c0_10], %11 {strides = array<i32>} : memref<1x8x16x128xf32, #tpu.memory_space<vmem>>, vector<1x8x16x128xf32>,
    return
  }
  func.func @transform_0(%arg0: i32, %arg1: i32) -> (i32, i32, i32, i32) {
    %c0_i32 = arith.constant 0 : i32
    %c0_i32_0 = arith.constant 0 : i32
    %c0_i32_1 = arith.constant 0 : i32
    return %arg0, %arg1, %c0_i32, %c0_i32_0 : i32, i32, i32, i32
  }
  func.func @transform_1(%arg0: i32, %arg1: i32) -> (i32, i32) {
    %c0_i32 = arith.constant 0 : i32
    %c0_i32_0 = arith.constant 0 : i32
    %c0_i32_1 = arith.constant 0 : i32
    return %c0_i32, %c0_i32_0 : i32, i32
  }
  func.func @transform_2(%arg0: i32, %arg1: i32) -> (i32, i32) {
    %c0_i32 = arith.constant 0 : i32
    %c0_i32_0 = arith.constant 0 : i32
    %c0_i32_1 = arith.constant 0 : i32
    return %c0_i32, %c0_i32_0 : i32, i32
  }
  func.func @transform_3(%arg0: i32, %arg1: i32) -> (i32, i32, i32, i32) {
    %c0_i32 = arith.constant 0 : i32
    %c0_i32_0 = arith.constant 0 : i32
    %c0_i32_1 = arith.constant 0 : i32
    return %arg0, %arg1, %c0_i32, %c0_i32_0 : i32, i32, i32, i32
  }
}

</mosaic_0001>

<bundles_post_ra>
// kernel: double_conv.5
= control target key start
LH: loop header
LB: loop body
LE: loop exit
PB: predicated region body
PF: predicated region fallthrough
CT: control target
= control target key end

     0   :  { %s574_s12 = smov 0   ;;  %s576_s13 = smov 0   ;;  %s699_s0 = inlined_call_operand.vmem [shape: bf16[2,16,16,128], index: 0, kind: input, shape index: {}]   ;;  %s700_s1 = inlined_call_operand.vmem [shape: f32[1,128], index: 1, kind: input, shape index: {}]   ;;  %s701_s2 = inlined_call_operand.vmem [shape: f32[1,128], index: 2, kind: input, shape index: {}]   ;;  %s702_s3 = inlined_call_operand.vmem [shape: f32[2,16,16,128], index: 3, kind: output, shape index: {}]  }
   0x1   :  { %s578_s14 = smov 0   ;;  %s580_s15 = smov 0  }
   0x2   :  { %s582_s16 = smov 0  }
   0x3 LB: > { %s22_s17 = sadd.s32 1, %s544_s14  ;;  %s25_s18 = sadd.s32 1, %s548_s15  ;;  %s552_s16 = sphi %s582_s16, %s13_s16   ;;  %s548_s15 = sphi %s580_s15, %s706_s15   ;;  %s544_s14 = sphi %s578_s14, %s705_s14   ;;  %s540_s13 = sphi %s576_s13, %s704_s13   ;;  %s536_s12 = sphi %s574_s12, %s703_s12  }
   0x4   : > { %p23_p0 = scmp.ge.s32.totalorder %s22_s17, 2  ;;  %p422_p1 = scmp.ge.s32.totalorder %s552_s16, 1 }
   0x5   : > { %p159_p2 = scmp.lt.s32.totalorder %s552_s16, 5 }
   0x6   : > { %s708_s17 = smov (%p23_p0, %s22_s17), 0  ;;  %s710_s18 = smov (!%p23_p0, %s25_s18), %s548_s15 }
   0x7   : > { %p160_p3 = pnand %p422_p1, %p159_p2  ;;  %p27_p4 = scmp.ge.s32.totalorder %s710_s18, 2 }
   0x8   : > { %s423_s19 = sshll.u32 (!%p160_p3), %s536_s12, 3  ;;  %p194_p5 = scmp.lt.s32.totalorder (!%p160_p3), %s540_s13, 1 }
   0x9   : > { %s712_s18 = smov (%p27_p4, %s710_s18), 0  ;;  %163 = sbr.rel (%p160_p3) target bundleno = 44 (0x2c), region = 32 }
   0xa   : > { %p196_p6 = scmp.lt.s32.totalorder (!%p160_p3), %s423_s19, 15 }
   0xe   : > { %s714_s13 = smov (!%p194_p5, %s540_s13), 1  ;;  %s716_s19 = smov (!%p196_p6, %s423_s19), 15  ;;  %v615_v0 = vld [vmem:[%s700_s1] ss:$0 sm:$0xff] }
   0xf   : > { %s425_s20 = sshll.u32 %s714_s13, 5  ;;  %s424_s21 = sshll.u32 %s716_s19, 1  ;;  %v623_v5 = vld [vmem:[%s701_s2] ss:$0 sm:$0xff] }
  0x10   : > { %s604_s22 = sadd.s32 %s425_s20, %s424_s21 }
  0x11   : > { %s426_s23 = sshll.u32 %s604_s22, 2  ;;  %s430_s4 = sshll.u32 %s604_s22, 3 }
  0x12   : > { %s610_s26 = scalar_lea.vmem %s699_s0, %s426_s23  ;;  %s642_s7 = scalar_lea.vmem %s702_s3, %s430_s4 }
  0x13   : > { %v434_v1 = vld [vmem:[%s610_s26] sm:$0xff]   ;;  %v465_v2 = vld [vmem:[%s610_s26 + $0x8] sm:$0xff]   ;;  %v466_v3 = vld [vmem:[%s610_s26 + $0x10] sm:$0xff]  }
  0x14   : > { %v435_v4 = vunpack.c.l.bf16 %v434_v1  ;;  %v436_v6 = vunpack.c.h.bf16 %v434_v1  ;;  %v439_v7 = vunpack.c.l.bf16 %v465_v2  ;;  %v440_v8 = vunpack.c.h.bf16 %v465_v2  ;;  %v467_v9 = vld [vmem:[%s610_s26 + $0x18] sm:$0xff]   ;;  %v468_v30 = vld [vmem:[%s610_s26 + $0x20] sm:$0xff]   ;;  %v469_v31 = vld [vmem:[%s610_s26 + $0x28] sm:$0xff]  }
  0x15   : > { %v443_v10 = vunpack.c.l.bf16 %v466_v3  ;;  %v444_v11 = vunpack.c.h.bf16 %v466_v3  ;;  %v447_v12 = vunpack.c.l.bf16 %v467_v9  ;;  %v448_v13 = vunpack.c.h.bf16 %v467_v9  ;;  %v470_v36 = vld [vmem:[%s610_s26 + $0x30] sm:$0xff]   ;;  %v471_v37 = vld [vmem:[%s610_s26 + $0x38] sm:$0xff]  }
  0x16   : > { %v251_v14 = vmul.f32 %v615_v0, %v435_v4  ;;  %v252_v15 = vmul.f32 %v615_v0, %v436_v6  ;;  %v253_v16 = vmul.f32 %v615_v0, %v439_v7  ;;  %v254_v17 = vmul.f32 %v615_v0, %v440_v8 }
  0x17   : > { %v255_v18 = vmul.f32 %v615_v0, %v443_v10  ;;  %v256_v19 = vmul.f32 %v615_v0, %v444_v11  ;;  %v257_v20 = vmul.f32 %v615_v0, %v447_v12  ;;  %v258_v21 = vmul.f32 %v615_v0, %v448_v13 }
  0x18   : > { %v271_v22 = vadd.f32 %v623_v5, %v251_v14  ;;  %v272_v23 = vadd.f32 %v623_v5, %v252_v15  ;;  %v273_v24 = vadd.f32 %v623_v5, %v253_v16  ;;  %v274_v25 = vadd.f32 %v623_v5, %v254_v17 }
  0x19   : > { %v275_v26 = vadd.f32 %v623_v5, %v255_v18  ;;  %v276_v27 = vadd.f32 %v623_v5, %v256_v19  ;;  %v277_v28 = vadd.f32 %v623_v5, %v257_v20  ;;  %v278_v29 = vadd.f32 %v623_v5, %v258_v21 }
  0x1a   : > { %v287_v32 = vmax.f32 %v271_v22, 0.0  ;;  %v288_v33 = vmax.f32 %v272_v23, 0.0  ;;  %v289_v34 = vmax.f32 %v273_v24, 0.0  ;;  %v290_v35 = vmax.f32 %v274_v25, 0.0 }
  0x1b   : > { %v291_v38 = vmax.f32 %v275_v26, 0.0  ;;  %v292_v39 = vmax.f32 %v276_v27, 0.0  ;;  %v293_v40 = vmax.f32 %v277_v28, 0.0  ;;  %v294_v41 = vmax.f32 %v278_v29, 0.0 }
  0x1c   : > { %303 = vst [vmem:[%s642_s7] sm:$0xff] %v287_v32  ;;  %v451_v42 = vunpack.c.l.bf16 %v468_v30  ;;  %v452_v43 = vunpack.c.h.bf16 %v468_v30  ;;  %v455_v44 = vunpack.c.l.bf16 %v469_v31  ;;  %v456_v45 = vunpack.c.h.bf16 %v469_v31 }
  0x1d   : > { %304 = vst [vmem:[%s642_s7 + $0x8] sm:$0xff] %v288_v33  ;;  %v459_v46 = vunpack.c.l.bf16 %v470_v36  ;;  %v460_v47 = vunpack.c.h.bf16 %v470_v36  ;;  %v463_v48 = vunpack.c.l.bf16 %v471_v37  ;;  %v464_v49 = vunpack.c.h.bf16 %v471_v37 }
  0x1e   : > { %305 = vst [vmem:[%s642_s7 + $0x10] sm:$0xff] %v289_v34  ;;  %v259_v50 = vmul.f32 %v615_v0, %v451_v42  ;;  %v260_v51 = vmul.f32 %v615_v0, %v452_v43  ;;  %v261_v52 = vmul.f32 %v615_v0, %v455_v44  ;;  %v262_v53 = vmul.f32 %v615_v0, %v456_v45 }
  0x1f   : > { %306 = vst [vmem:[%s642_s7 + $0x18] sm:$0xff] %v290_v35  ;;  %v263_v54 = vmul.f32 %v615_v0, %v459_v46  ;;  %v264_v55 = vmul.f32 %v615_v0, %v460_v47  ;;  %v265_v56 = vmul.f32 %v615_v0, %v463_v48  ;;  %v266_v57 = vmul.f32 %v615_v0, %v464_v49 }
  0x20   : > { %307 = vst [vmem:[%s642_s7 + $0x20] sm:$0xff] %v291_v38  ;;  %v279_v58 = vadd.f32 %v623_v5, %v259_v50  ;;  %v280_v59 = vadd.f32 %v623_v5, %v260_v51  ;;  %v281_v60 = vadd.f32 %v623_v5, %v261_v52  ;;  %v282_v61 = vadd.f32 %v623_v5, %v262_v53 }
  0x21   : > { %308 = vst [vmem:[%s642_s7 + $0x28] sm:$0xff] %v292_v39  ;;  %v283_v62 = vadd.f32 %v623_v5, %v263_v54  ;;  %v284_v63 = vadd.f32 %v623_v5, %v264_v55  ;;  %v285_v3 = vadd.f32 %v623_v5, %v265_v56  ;;  %v286_v6 = vadd.f32 %v623_v5, %v266_v57 }
  0x22   : > { %309 = vst [vmem:[%s642_s7 + $0x30] sm:$0xff] %v293_v40  ;;  %v295_v0 = vmax.f32 %v279_v58, 0.0  ;;  %v296_v1 = vmax.f32 %v280_v59, 0.0  ;;  %v297_v2 = vmax.f32 %v281_v60, 0.0  ;;  %v298_v4 = vmax.f32 %v282_v61, 0.0 }
  0x23   : > { %310 = vst [vmem:[%s642_s7 + $0x38] sm:$0xff] %v294_v41  ;;  %v299_v7 = vmax.f32 %v283_v62, 0.0  ;;  %v300_v8 = vmax.f32 %v284_v63, 0.0  ;;  %v301_v9 = vmax.f32 %v285_v3, 0.0  ;;  %v302_v10 = vmax.f32 %v286_v6, 0.0 }
  0x24   : > { %311 = vst [vmem:[%s642_s7 + $0x40] sm:$0xff] %v295_v0 }
  0x25   : > { %312 = vst [vmem:[%s642_s7 + $0x48] sm:$0xff] %v296_v1 }
  0x26   : > { %313 = vst [vmem:[%s642_s7 + $0x50] sm:$0xff] %v297_v2 }
  0x27   : > { %314 = vst [vmem:[%s642_s7 + $0x58] sm:$0xff] %v298_v4 }
  0x28   : > { %315 = vst [vmem:[%s642_s7 + $0x60] sm:$0xff] %v299_v7 }
  0x29   : > { %316 = vst [vmem:[%s642_s7 + $0x68] sm:$0xff] %v300_v8 }
  0x2a   : > { %317 = vst [vmem:[%s642_s7 + $0x70] sm:$0xff] %v301_v9 }
  0x2b   : > { %318 = vst [vmem:[%s642_s7 + $0x78] sm:$0xff] %v302_v10 }
  0x2c PF: > { %s13_s16 = sadd.s32 1, %s552_s16   ;;  %s703_s12 = smov %s544_s14 }
  0x2d   : > { %p10_p7 = scmp.ge.s32.totalorder %s13_s16, 6   ;;  %s704_s13 = smov %s548_s15 }
  0x2e   : > { %s705_s14 = smov %s708_s17  ;;  %s706_s15 = smov %s712_s18 }
  0x2f   :  { %12 = sbr.rel (!%p10_p7) target bundleno = 3 (0x3), region = 62 }

// kernel: double_conv.3
= control target key start
LH: loop header
LB: loop body
LE: loop exit
PB: predicated region body
PF: predicated region fallthrough
CT: control target
= control target key end

     0   :  { %s2751_s18 = smov 0   ;;  %s2753_s19 = smov 0   ;;  %s3525_s0 = inlined_call_operand.vmem [shape: bf16[2,16,16,128], index: 0, kind: input, shape index: {}, may-alias: {0,1,2}]   ;;  %s3526_s1 = inlined_call_operand.vmem [shape: bf16[2,16,16,128], index: 1, kind: input, shape index: {}, may-alias: {0,1,2}]   ;;  %s3527_s2 = inlined_call_operand.vmem [shape: bf16[2,16,16,128], index: 2, kind: input, shape index: {}, may-alias: {0,1,2}]   ;;  %s3528_s3 = inlined_call_operand.vmem [shape: bf16[1152,128], index: 3, kind: input, shape index: {}]   ;;  %s3529_s4 = inlined_call_operand.vmem [shape: bf16[2,16,16,128], index: 4, kind: output, shape index: {0}]   ;;  %s3530_s5 = inlined_call_operand.vmem [shape: f32[2,2,2,128], index: 5, kind: output, shape index: {1}]  }
   0x1   :  { %s2755_s20 = smov 0   ;;  %s2757_s21 = smov 0  }
   0x2   :  { %s2759_s22 = smov 0  }
   0x3 LB: > { %s25_s23 = sadd.s32 1, %s2711_s20  ;;  %s28_s24 = sadd.s32 1, %s2715_s21  ;;  %s2719_s22 = sphi %s2759_s22, %s16_s22   ;;  %s2715_s21 = sphi %s2757_s21, %s3555_s21   ;;  %s2711_s20 = sphi %s2755_s20, %s3554_s20   ;;  %s2707_s19 = sphi %s2753_s19, %s3553_s19   ;;  %s2703_s18 = sphi %s2751_s18, %s3552_s18  }
   0x4   : > { %p26_p0 = scmp.ge.s32.totalorder %s25_s23, 2  ;;  %p2176_p1 = scmp.ge.s32.totalorder %s2719_s22, 1 }
   0x5   : > { %p278_p2 = scmp.lt.s32.totalorder %s2719_s22, 5 }
   0x6   : > { %s3557_s23 = smov (%p26_p0, %s25_s23), 0  ;;  %s3559_s24 = smov (!%p26_p0, %s28_s24), %s2715_s21 }
   0x7   : > { %p279_p3 = pnand %p2176_p1, %p278_p2  ;;  %p30_p4 = scmp.ge.s32.totalorder %s3559_s24, 2 }
   0x8   : > { %s2787_s27 = sshll.u32 (!%p279_p3), %s2703_s18, 3  ;;  %p351_p5 = scmp.lt.s32.totalorder (!%p279_p3), %s2707_s19, 1 }
   0x9   : > { %s3561_s24 = smov (%p30_p4, %s3559_s24), 0  ;;  %282 = sbr.rel (%p279_p3) target bundleno = 490 (0x1ea), region = 36 }
   0xa   : > { %p353_p6 = scmp.lt.s32.totalorder (!%p279_p3), %s2787_s27, 15  ;;  %s2791_s28 = sadd.s32 (!%p279_p3), 4294967295, %s2787_s27 }
   0xb   : > { %p363_p7 = scmp.gt.s32.totalorder (!%p279_p3), %s2791_s28, 0  ;;  %p2183_p8 = scmp.lt.s32.totalorder (!%p279_p3), %s2791_s28, 15 }
   0xc   : > { %p408_p10 = scmp.lt.s32.totalorder (!%p279_p3), %s2703_s18, 1 }
   0xe   : > { %v2529_v0 = vld [vmem:[%s3528_s3 + $0xf8] sm:$0xff]  ;;  %v2528_v1 = vld [vmem:[%s3528_s3 + $0xf0] sm:$0xff]  ;;  %s3563_s19 = smov (!%p351_p5, %s2707_s19), 1  ;;  %v2799_v2 = vstv %s2791_s28  ;;  %v2527_v6 = vld [vmem:[%s3528_s3 + $0xe8] sm:$0xff]  ;;  %vm637_vm13 = vcmask 1040384   ;;  %s3571_s18 = smov (!%p408_p10, %s2703_s18), 1 }
   0xf   : > { %1031 = vmatpush.bf16.msra.mxu0 %v2529_v0  ;;  %2617 = vmatpush.bf16.msra.mxu1 %v2529_v0  ;;  %s354_s6 = scalar_select %p353_p6, %s2787_s27, 15  ;;  %v439_v3 = vadd.s32 2, %v2799_v2  ;;  %v441_v4 = vadd.s32 4, %v2799_v2  ;;  %v443_v5 = vadd.s32 6, %v2799_v2  ;;  %v2526_v8 = vld [vmem:[%s3528_s3 + $0xe0] sm:$0xff]  ;;  %vm447_vm7 = vcmp.ge.s32.totalorder %v2799_v2, 0 }
  0x10   : > { %2618 = vmatpush.bf16.msra.mxu2 %v2529_v0  ;;  %2619 = vmatpush.bf16.msra.mxu3 %v2529_v0  ;;  %s2804_s7 = sshll.u32 %s3563_s19, 5  ;;  %v438_v10 = vadd.s32 1, %v2799_v2  ;;  %vm457_vm9 = vcmp.lt.s32.totalorder %v2799_v2, 16  ;;  %v2869_v31 = vadd.s32 3, %v2799_v2  ;;  %v2525_v32 = vld [vmem:[%s3528_s3 + $0xd8] sm:$0xff]  ;;  %v2892_v40 = vadd.s32 5, %v2799_v2 }
  0x11   : > { %s2178_s8 = sshll.u32 %s354_s6, 1  ;;  %vm449_vm0 = vcmp.ge.s32.totalorder %v439_v3, 0  ;;  %vm459_vm1 = vcmp.lt.s32.totalorder %v439_v3, 16  ;;  %vm451_vm2 = vcmp.ge.s32.totalorder %v441_v4, 0  ;;  %vm461_vm3 = vcmp.lt.s32.totalorder %v441_v4, 16  ;;  %vm2879_vm12 = vmand %vm447_vm7, %vm457_vm9  ;;  %v2524_v50 = vld [vmem:[%s3528_s3 + $0xd0] sm:$0xff] }
  0x12   : > { %s2813_s11 = sadd.s32 %s2804_s7, %s2178_s8  ;;  %vm453_vm4 = vcmp.ge.s32.totalorder %v443_v5, 0  ;;  %vm463_vm5 = vcmp.lt.s32.totalorder %v443_v5, 16  ;;  %vm2817_vm6 = vmand %vm449_vm0, %vm459_vm1  ;;  %vm448_vm11 = vcmp.ge.s32.totalorder %v438_v10, 0  ;;  %vm458_vm14 = vcmp.lt.s32.totalorder %v438_v10, 16  ;;  %v2523_v5 = vld [vmem:[%s3528_s3 + $0xc8] sm:$0xff] }
  0x13   : > { %1032 = vmatpush.bf16.msra.mxu0 %v2528_v1  ;;  %2620 = vmatpush.bf16.msra.mxu1 %v2528_v1  ;;  %s2180_s12 = sshll.u32 %s2813_s11, 2  ;;  %vm2832_vm8 = vmand %vm451_vm2, %vm461_vm3  ;;  %vm638_vm15 = vsmask.f32 256  ;;  %vm708_vm1 = vsmask.f32 7424  ;;  %vm450_vm2 = vcmp.ge.s32.totalorder %v2869_v31, 0 }
  0x14   : > { %2621 = vmatpush.bf16.msra.mxu2 %v2528_v1  ;;  %2622 = vmatpush.bf16.msra.mxu3 %v2528_v1  ;;  %s2829_s17 = scalar_lea.vmem %s3525_s0, %s2180_s12  ;;  %vm2845_vm10 = vmand %vm453_vm4, %vm463_vm5  ;;  %vm460_vm4 = vcmp.lt.s32.totalorder %v2869_v31, 16  ;;  %vm452_vm5 = vcmp.ge.s32.totalorder %v2892_v40, 0  ;;  %vm462_vm7 = vcmp.lt.s32.totalorder %v2892_v40, 16  ;;  %s2202_s11 = sshll.u32 %s3563_s19, 1 }
  0x15   : > { %s364_s25 = scalar_select %p363_p7, %s2791_s28, 0  ;;  %v419_v11 = vld [vmem:[%s2829_s17 + $0x8] sm:$0xf]  ;;  %v420_v12 = vld [vmem:[%s2829_s17 + $0xc] sm:$0xf]  ;;  %vm2887_vm0 = vmand %vm448_vm11, %vm458_vm14 }
  0x16   : > { %v481_v14 = vsel %vm2817_vm6, %v419_v11, 0  ;;  %v482_v15 = vsel %vm2817_vm6, %v420_v12, 0  ;;  %v423_v16 = vld [vmem:[%s2829_s17 + $0x18] sm:$0xf]  ;;  %v424_v17 = vld [vmem:[%s2829_s17 + $0x1c] sm:$0xf]  ;;  %vm2914_vm3 = vmand %vm637_vm13, %vm638_vm15 }
  0x17   : > { %1033 = vmatpush.bf16.msra.mxu0 %v2527_v6  ;;  %2623 = vmatpush.bf16.msra.mxu1 %v2527_v6  ;;  %s3565_s25 = smov (!%p2183_p8, %s364_s25), 15  ;;  %v521_v18 = vunpack.c.l.b16 %v481_v14  ;;  %v522_v19 = vunpack.c.l.b16 %v482_v15  ;;  %v485_v20 = vsel %vm2832_vm8, %v423_v16, 0  ;;  %v486_v21 = vsel %vm2832_vm8, %v424_v17, 0  ;;  %v427_v22 = vld [vmem:[%s2829_s17 + $0x28] sm:$0xf]  ;;  %vm2982_vm6 = vmand %vm450_vm2, %vm460_vm4 }
  0x18   : > { %2624 = vmatpush.bf16.msra.mxu2 %v2527_v6  ;;  %2625 = vmatpush.bf16.msra.mxu3 %v2527_v6  ;;  %v525_v23 = vunpack.c.l.b16 %v485_v20  ;;  %v526_v24 = vunpack.c.l.b16 %v486_v21  ;;  %v428_v25 = vld [vmem:[%s2829_s17 + $0x2c] sm:$0xf]  ;;  %v489_v26 = vsel %vm2845_vm10, %v427_v22, 0  ;;  %s2188_s26 = sshll.u32 %s3565_s25, 1  ;;  %v417_v30 = vld [vmem:[%s2829_s17] sm:$0xf] }
  0x19   : > { %v539_v27 = vpack.c.b16 %v522_v19, %v521_v18  ;;  %v490_v28 = vsel %vm2845_vm10, %v428_v25, 0  ;;  %v529_v29 = vunpack.c.l.b16 %v489_v26  ;;  %s371_s30 = sadd.s32 %s2188_s26, %s2804_s7  ;;  %v2884_v36 = vld [vmem:[%s2829_s17 + $0x4] sm:$0xf]  ;;  %v479_v44 = vsel %vm2887_vm0, %v417_v30, 0  ;;  %v421_v30 = vld [vmem:[%s2829_s17 + $0x10] sm:$0xf]  ;;  %vm3037_vm10 = vmand %vm452_vm5, %vm462_vm7 }
  0x1a   : > { %v541_v34 = vpack.c.b16 %v526_v24, %v525_v23  ;;  %v530_v35 = vunpack.c.l.b16 %v490_v28  ;;  %s2190_s6 = sshll.u32 %s371_s30, 2  ;;  %v480_v48 = vsel %vm2887_vm0, %v2884_v36, 0  ;;  %v2902_v49 = vunpack.c.l.b16 %v479_v44  ;;  %v2522_v22 = vld [vmem:[%s3528_s3 + $0xc0] sm:$0xff]  ;;  %v2505_v36 = vld [vmem:[%s3528_s3 + $0x38] sm:$0xff] }
  0x1b   : > { %1034 = vmatpush.bf16.msra.mxu0 %v2526_v8  ;;  %2626 = vmatpush.bf16.msra.mxu1 %v2526_v8  ;;  %v562_v37 = vshrl.u32 %v539_v27, 16  ;;  %v565_v38 = vshll.u32 %v539_v27, 16  ;;  %s373_s10 = scalar_lea.vmem %s3526_s1, %s2190_s6  ;;  %v520_v21 = vunpack.c.l.b16 %v480_v48  ;;  %v2957_v25 = vadd.s32 7, %v2799_v2  ;;  %v2537_v48 = vld [vmem:[%s3528_s3 + $0x138] sm:$0xff] }
  0x1c   : > { %2627 = vmatpush.bf16.msra.mxu2 %v2526_v8  ;;  %2628 = vmatpush.bf16.msra.mxu3 %v2526_v8  ;;  %v576_v41 = vshrl.u32 %v541_v34, 16  ;;  %v579_v42 = vshll.u32 %v541_v34, 16  ;;  %v543_v43 = vpack.c.b16 %v530_v35, %v529_v29  ;;  %v415_v45 = vld [vmem:[%s373_s10] sm:$0xf]  ;;  %v416_v46 = vld [vmem:[%s373_s10 + $0x4] sm:$0xf] }
  0x1d   : > { %v564_v47 = vrot.slane %v562_v37, 7  ;;  %v477_v51 = vsel %vm2879_vm12, %v415_v45, 0  ;;  %v478_v52 = vsel %vm2879_vm12, %v416_v46, 0  ;;  %v2545_v29 = vld [vmem:[%s3528_s3 + $0x178] sm:$0xff]  ;;  %v422_v37 = vld [vmem:[%s2829_s17 + $0x14] sm:$0xf]  ;;  %v538_v44 = vpack.c.b16 %v520_v21, %v2902_v49 }
  0x1e   : > { %v578_v54 = vrot.slane %v576_v41, 7  ;;  %v590_v55 = vshrl.u32 %v543_v43, 16  ;;  %v517_v56 = vunpack.c.l.b16 %v477_v51  ;;  %v518_v57 = vunpack.c.l.b16 %v478_v52  ;;  %s379_s10 = sadd.s32 8, %s2787_s27  ;;  %v2544_v49 = vld [vmem:[%s3528_s3 + $0x170] sm:$0xff] }
  0x1f   : > { %1035 = vmatpush.bf16.msra.mxu0 %v2525_v32  ;;  %2629 = vmatpush.bf16.msra.mxu1 %v2525_v32  ;;  %v567_v58 = vor.u32 %v565_v38, %v564_v47  ;;  %v2920_v59 = vsel %vm2914_vm3, %v564_v47, 0  ;;  %v593_v4 = vshll.u32 %v543_v43, 16  ;;  %v2513_v43 = vld [vmem:[%s3528_s3 + $0x78] sm:$0xff]  ;;  %v555_v51 = vshrl.u32 %v538_v44, 16  ;;  %p3017_p9 = scmp.lt.s32.totalorder %s379_s10, 15  ;;  %v2542_v38 = vld [vmem:[%s3528_s3 + $0x160] sm:$0xff] }
  0x20   : > { %2630 = vmatpush.bf16.msra.mxu2 %v2525_v32  ;;  %2631 = vmatpush.bf16.msra.mxu3 %v2525_v32  ;;  %v741_v60 = vshll.u32 %v2920_v59, 16  ;;  %v581_v61 = vor.u32 %v579_v42, %v578_v54  ;;  %v2925_v62 = vsel %vm2914_vm3, %v578_v54, 0  ;;  %v592_v63 = vrot.slane %v590_v55, 7 }
  0x21   : > { %v537_v0 = vpack.c.b16 %v518_v57, %v517_v56  ;;  %v2929_v1 = vsel %vm2914_vm3, 0, %v567_v58  ;;  %v765_v3 = vshll.u32 %v2925_v62, 16  ;;  %v558_v52 = vshll.u32 %v538_v44, 16  ;;  %s3567_s10 = smov (!%p3017_p9, %s379_s10), 15 }
  0x22   : > { %v734_v6 = vshrl.u32 %v2929_v1, 16  ;;  %v736_v7 = vshll.u32 %v2929_v1, 16  ;;  %v743_v8 = vrot.slane %v741_v60, 1  ;;  %v2939_v9 = vsel %vm2914_vm3, 0, %v581_v61  ;;  %v425_v61 = vld [vmem:[%s2829_s17 + $0x20] sm:$0xf] }
  0x23   : > { %1036 = vmatpush.bf16.msra.mxu0 %v2524_v50  ;;  %2632 = vmatpush.bf16.msra.mxu1 %v2524_v50  ;;  %v548_v10 = vshrl.u32 %v537_v0, 16  ;;  %v551_v11 = vshll.u32 %v537_v0, 16  ;;  %v758_v12 = vshrl.u32 %v2939_v9, 16  ;;  %v760_v13 = vshll.u32 %v2939_v9, 16  ;;  %s3569_s10 = smov (!%p3017_p9, %s3567_s10), 15 }
  0x24   : > { %2633 = vmatpush.bf16.msra.mxu2 %v2524_v50  ;;  %2634 = vmatpush.bf16.msra.mxu3 %v2524_v50  ;;  %v738_v14 = vrot.slane %v736_v7, 1  ;;  %v767_v15 = vrot.slane %v765_v3, 1  ;;  %v595_v16 = vor.u32 %v593_v4, %v592_v63  ;;  %v2945_v17 = vsel %vm2914_vm3, %v592_v63, 0  ;;  %v2504_v50 = vld [vmem:[%s3528_s3 + $0x30] sm:$0xff]  ;;  %v426_v63 = vld [vmem:[%s2829_s17 + $0x24] sm:$0xf] }
  0x25   : > { %v550_v18 = vrot.slane %v548_v10, 7  ;;  %v762_v19 = vrot.slane %v760_v13, 1  ;;  %v789_v20 = vshll.u32 %v2945_v17, 16  ;;  %v483_v54 = vsel %vm2982_vm6, %v421_v30, 0  ;;  %v2543_v10 = vld [vmem:[%s3528_s3 + $0x168] sm:$0xff]  ;;  %s3085_s28 = sshll.u32 %s3569_s10, 1 }
  0x26   : > { %v739_v23 = vor.u32 %v738_v14, %v734_v6  ;;  %v2953_v24 = vsel %vm2914_vm3, 0, %v595_v16  ;;  %v484_v55 = vsel %vm2982_vm6, %v422_v37, 0  ;;  %v523_v58 = vunpack.c.l.b16 %v483_v54  ;;  %v2512_v6 = vld [vmem:[%s3528_s3 + $0x70] sm:$0xff]  ;;  %s388_s29 = sadd.s32 %s3085_s28, %s2804_s7 }
  0x27   : > { %1037 = vmatpush.bf16.msra.mxu0 %v2523_v5  ;;  %2635 = vmatpush.bf16.msra.mxu1 %v2523_v5  ;;  %v553_v26 = vor.u32 %v551_v11, %v550_v18  ;;  %v2961_v27 = vsel %vm2914_vm3, %v550_v18, 0  ;;  %v763_v28 = vor.u32 %v762_v19, %v758_v12  ;;  %v782_v34 = vshrl.u32 %v2953_v24, 16  ;;  %v2503_v11 = vld [vmem:[%s3528_s3 + $0x28] sm:$0xff]  ;;  %v429_v18 = vld [vmem:[%s2829_s17 + $0x30] sm:$0xf] }
  0x28   : > { %2636 = vmatpush.bf16.msra.mxu2 %v2523_v5  ;;  %2637 = vmatpush.bf16.msra.mxu3 %v2523_v5  ;;  %v717_v32 = vshll.u32 %v2961_v27, 16  ;;  %v2970_v33 = vsel %vm708_vm1, %v739_v23, %v743_v8  ;;  %v784_v35 = vshll.u32 %v2953_v24, 16  ;;  %v791_v42 = vrot.slane %v789_v20, 1  ;;  %v2536_v5 = vld [vmem:[%s3528_s3 + $0x130] sm:$0xff] }
  0x29   : > { %v2988_v39 = vsel %vm2914_vm3, 0, %v553_v26  ;;  %v2991_v41 = vsel %vm708_vm1, %v763_v28, %v767_v15  ;;  %v524_v60 = vunpack.c.l.b16 %v484_v55  ;;  %v557_v0 = vrot.slane %v555_v51, 7  ;;  %v430_v19 = vld [vmem:[%s2829_s17 + $0x34] sm:$0xf]  ;;  %v2511_v28 = vld [vmem:[%s3528_s3 + $0x68] sm:$0xff]  ;;  %v2510_v51 = vld [vmem:[%s3528_s3 + $0x60] sm:$0xff] }
  0x2a   : > { %v710_v31 = vshrl.u32 %v2988_v39, 16  ;;  %v712_v45 = vshll.u32 %v2988_v39, 16  ;;  %v719_v46 = vrot.slane %v717_v32, 1  ;;  %v786_v47 = vrot.slane %v784_v35, 1  ;;  %v2500_v20 = vld [vmem:[%s3528_s3 + $0x10] sm:$0xff] }
  0x2b   : > { %1038 = vmatpush.bf16.msra.mxu0 %v2522_v22  ;;  %2638 = vmatpush.bf16.msra.mxu1 %v2522_v22  ;;  %vm454_vm8 = vcmp.ge.s32.totalorder %v2957_v25, 0  ;;  %vm464_vm9 = vcmp.lt.s32.totalorder %v2957_v25, 16  ;;  %v540_v7 = vpack.c.b16 %v524_v60, %v523_v58  ;;  %v560_v12 = vor.u32 %v558_v52, %v557_v0  ;;  %v2535_v25 = vld [vmem:[%s3528_s3 + $0x128] sm:$0xff] }
  0x2c   : > { %2639 = vmatpush.bf16.msra.mxu2 %v2522_v22  ;;  %2640 = vmatpush.bf16.msra.mxu3 %v2522_v22  ;;  %v714_v56 = vrot.slane %v712_v45, 1  ;;  %v787_v57 = vor.u32 %v786_v47, %v782_v34  ;;  %v3054_v40 = vsel %vm2914_vm3, %v557_v0, 0  ;;  %v487_v13 = vsel %vm3037_vm10, %v425_v61, 0  ;;  %vm3067_vm11 = vmand %vm454_vm8, %vm464_vm9  ;;  %v2541_v61 = vld [vmem:[%s3528_s3 + $0x158] sm:$0xff] }
  0x2d   : > { %v488_v14 = vsel %vm3037_vm10, %v426_v63, 0  ;;  %v569_v16 = vshrl.u32 %v540_v7, 16  ;;  %v3075_v21 = vsel %vm2914_vm3, 0, %v560_v12  ;;  %v572_v22 = vshll.u32 %v540_v7, 16  ;;  %v2501_v63 = vld [vmem:[%s3528_s3 + $0x18] sm:$0xff] }
  0x2e   : > { %1049 = vmatmul.bf16.vlgmr.msra.gmra.mxu1 %v2970_v33  ;;  %v715_v3 = vor.u32 %v714_v56, %v710_v31  ;;  %v3027_v4 = vsel %vm708_vm1, %v787_v57, %v791_v42  ;;  %v527_v23 = vunpack.c.l.b16 %v487_v13  ;;  %v528_v26 = vunpack.c.l.b16 %v488_v14  ;;  %v2502_v42 = vld [vmem:[%s3528_s3 + $0x20] sm:$0xff]  ;;  %v2533_v14 = vld [vmem:[%s3528_s3 + $0x118] sm:$0xff] }
  0x2f   : > { %1371 = vmatpush.bf16.msrb.mxu0 %v2513_v43  ;;  %1059 = vmatmul.bf16.vlgmr.msra.gmra.mxu2 %v2991_v41  ;;  %v729_v30 = vshll.u32 %v3054_v40, 16  ;;  %v571_v32 = vrot.slane %v569_v16, 7  ;;  %v722_v34 = vshrl.u32 %v3075_v21, 16  ;;  %v492_v37 = vsel %vm3067_vm11, %v430_v19, 0  ;;  %v2540_v19 = vld [vmem:[%s3528_s3 + $0x150] sm:$0xff] }
  0x30   : > { %1129 = vmatpush.bf16.msrb.mxu2 %v2545_v29  ;;  %1322 = vmatpush.bf16.msrb.mxu3 %v2505_v36  ;;  %v720_v15 = vsel %vm708_vm1, %v715_v3, %v719_v46  ;;  %v724_v29 = vshll.u32 %v3075_v21, 16  ;;  %v542_v35 = vpack.c.b16 %v528_v26, %v527_v23  ;;  %v491_v36 = vsel %vm3067_vm11, %v429_v18, 0 }
  0x31   : > { %1080 = vmatpush.bf16.msrb.mxu1 %v2537_v48  ;;  %1069 = vmatmul.bf16.vlgmr.msra.gmra.mxu3 %v3027_v4  ;;  %v574_v44 = vor.u32 %v572_v22, %v571_v32  ;;  %v3102_v31 = vsel %vm2914_vm3, %v571_v32, 0  ;;  %v531_v45 = vunpack.c.l.b16 %v491_v36  ;;  %v731_v58 = vrot.slane %v729_v30, 1  ;;  %v2508_v30 = vld [vmem:[%s3528_s3 + $0x50] sm:$0xff] }
  0x32   : > { %1039 = vmatmul.bf16.vlgmr.msra.gmra.mxu0 %v720_v15  ;;  %v726_v43 = vrot.slane %v724_v29, 1  ;;  %v753_v46 = vshll.u32 %v3102_v31, 16  ;;  %v583_v47 = vshrl.u32 %v542_v35, 16  ;;  %v586_v48 = vshll.u32 %v542_v35, 16 }
  0x33   : > { %1372 = vmatpush.bf16.msrb.mxu0 %v2512_v6  ;;  %v3113_v52 = vsel %vm2914_vm3, 0, %v574_v44 }
  0x34   : > { %1130 = vmatpush.bf16.msrb.mxu2 %v2544_v49  ;;  %1323 = vmatpush.bf16.msrb.mxu3 %v2504_v50  ;;  %v532_v49 = vunpack.c.l.b16 %v492_v37  ;;  %v2534_v50 = vld [vmem:[%s3528_s3 + $0x120] sm:$0xff]  ;;  %v746_v54 = vshrl.u32 %v3113_v52, 16  ;;  %v748_v55 = vshll.u32 %v3113_v52, 16  ;;  %v585_v56 = vrot.slane %v583_v47, 7  ;;  %v2539_v37 = vld [vmem:[%s3528_s3 + $0x148] sm:$0xff] }
  0x35   : > { %1081 = vmatpush.bf16.msrb.mxu1 %v2536_v5  ;;  %v727_v57 = vor.u32 %v726_v43, %v722_v34  ;;  %v755_v3 = vrot.slane %v753_v46, 1  ;;  %v2532_v34 = vld [vmem:[%s3528_s3 + $0x110] sm:$0xff] }
  0x36   : > { %v544_v60 = vpack.c.b16 %v532_v49, %v531_v45  ;;  %v750_v0 = vrot.slane %v748_v55, 1  ;;  %v588_v5 = vor.u32 %v586_v48, %v585_v56  ;;  %v3125_v6 = vsel %vm2914_vm3, %v585_v56, 0  ;;  %v2507_v45 = vld [vmem:[%s3528_s3 + $0x48] sm:$0xff]  ;;  %v2538_v49 = vld [vmem:[%s3528_s3 + $0x140] sm:$0xff]  ;;  %v2561_v56 = vld [vmem:[%s3528_s3 + $0x1f8] sm:$0xff] }
  0x37   : > { %1373 = vmatpush.bf16.msrb.mxu0 %v2511_v28  ;;  %v777_v7 = vshll.u32 %v3125_v6, 16  ;;  %v732_v22 = vsel %vm708_vm1, %v727_v57, %v731_v58  ;;  %v2531_v48 = vld [vmem:[%s3528_s3 + $0x108] sm:$0xff]  ;;  %v2506_v55 = vld [vmem:[%s3528_s3 + $0x40] sm:$0xff] }
  0x38   : > { %1131 = vmatpush.bf16.msrb.mxu2 %v2543_v10  ;;  %1324 = vmatpush.bf16.msrb.mxu3 %v2503_v11  ;;  %v597_v8 = vshrl.u32 %v544_v60, 16  ;;  %v600_v10 = vshll.u32 %v544_v60, 16  ;;  %v2509_v11 = vld [vmem:[%s3528_s3 + $0x58] sm:$0xff]  ;;  %v751_v12 = vor.u32 %v750_v0, %v746_v54  ;;  %v3133_v13 = vsel %vm2914_vm3, 0, %v588_v5  ;;  %v2530_v58 = vld [vmem:[%s3528_s3 + $0x100] sm:$0xff]  ;;  %v2560_v0 = vld [vmem:[%s3528_s3 + $0x1f0] sm:$0xff] }
  0x39   : > { %1082 = vmatpush.bf16.msrb.mxu1 %v2535_v25  ;;  %v770_v15 = vshrl.u32 %v3133_v13, 16  ;;  %v772_v16 = vshll.u32 %v3133_v13, 16  ;;  %v779_v25 = vrot.slane %v777_v7, 1  ;;  %v2553_v54 = vld [vmem:[%s3528_s3 + $0x1b8] sm:$0xff]  ;;  %v2520_v5 = vld [vmem:[%s3528_s3 + $0xb0] sm:$0xff]  ;;  %v2551_v7 = vld [vmem:[%s3528_s3 + $0x1a8] sm:$0xff] }
  0x3a   : > { %v599_v18 = vrot.slane %v597_v8, 7  ;;  %v3148_v23 = vsel %vm708_vm1, %v751_v12, %v755_v3  ;;  %v2569_v60 = vld [vmem:[%s3528_s3 + $0x238] sm:$0xff]  ;;  %v2568_v3 = vld [vmem:[%s3528_s3 + $0x230] sm:$0xff]  ;;  %v2559_v8 = vld [vmem:[%s3528_s3 + $0x1e8] sm:$0xff] }
  0x3b   : > { %1374 = vmatpush.bf16.msrb.mxu0 %v2510_v51  ;;  %v774_v26 = vrot.slane %v772_v16, 1  ;;  %v2498_v51 = vld [vmem:[%s3528_s3] sm:$0xff]  ;;  %v2549_v16 = vld [vmem:[%s3528_s3 + $0x198] sm:$0xff] }
  0x3c   : > { %1132 = vmatpush.bf16.msrb.mxu2 %v2542_v38  ;;  %1325 = vmatpush.bf16.msrb.mxu3 %v2502_v42  ;;  %v602_v28 = vor.u32 %v600_v10, %v599_v18  ;;  %v3153_v29 = vsel %vm2914_vm3, %v599_v18, 0  ;;  %v2499_v38 = vld [vmem:[%s3528_s3 + $0x8] sm:$0xff]  ;;  %v2550_v12 = vld [vmem:[%s3528_s3 + $0x1a0] sm:$0xff]  ;;  %v2557_v18 = vld [vmem:[%s3528_s3 + $0x1d8] sm:$0xff] }
  0x3d   : > { %1083 = vmatpush.bf16.msrb.mxu1 %v2534_v50  ;;  %v801_v32 = vshll.u32 %v3153_v29, 16  ;;  %v775_v35 = vor.u32 %v774_v26, %v770_v15  ;;  %v2519_v10 = vld [vmem:[%s3528_s3 + $0xa8] sm:$0xff]  ;;  %v2518_v15 = vld [vmem:[%s3528_s3 + $0xa0] sm:$0xff]  ;;  %v432_v26 = vld [vmem:[%s2829_s17 + $0x3c] sm:$0xf] }
  0x3e   : > { %1054 = vmatmul.bf16.gmra.mxu1 %v3148_v23  ;;  %v3164_v36 = vsel %vm2914_vm3, 0, %v602_v28  ;;  %v2516_v28 = vld [vmem:[%s3528_s3 + $0x90] sm:$0xff] }
  0x3f   : > { %1375 = vmatpush.bf16.msrb.mxu0 %v2509_v11  ;;  %v794_v42 = vshrl.u32 %v3164_v36, 16  ;;  %v796_v43 = vshll.u32 %v3164_v36, 16  ;;  %v3175_v44 = vsel %vm708_vm1, %v775_v35, %v779_v25  ;;  %v803_v47 = vrot.slane %v801_v32, 1  ;;  %v2567_v11 = vld [vmem:[%s3528_s3 + $0x228] sm:$0xff]  ;;  %v2548_v25 = vld [vmem:[%s3528_s3 + $0x190] sm:$0xff] }
  0x40   : > { %1133 = vmatpush.bf16.msrb.mxu2 %v2541_v61  ;;  %1326 = vmatpush.bf16.msrb.mxu3 %v2501_v63  ;;  %v2521_v61 = vld [vmem:[%s3528_s3 + $0xb8] sm:$0xff]  ;;  %v2552_v63 = vld [vmem:[%s3528_s3 + $0x1b0] sm:$0xff] }
  0x41   : > { %1084 = vmatpush.bf16.msrb.mxu1 %v2533_v14  ;;  %1064 = vmatmul.bf16.gmra.mxu2 %v3175_v44  ;;  %v798_v46 = vrot.slane %v796_v43, 1  ;;  %v2558_v14 = vld [vmem:[%s3528_s3 + $0x1e0] sm:$0xff] }
  0x42   : > { %1044 = vmatmul.bf16.gmra.mxu0 %v732_v22 }
  0x43   : > { %1376 = vmatpush.bf16.msrb.mxu0 %v2508_v30  ;;  %v799_v50 = vor.u32 %v798_v46, %v794_v42  ;;  %v2564_v30 = vld [vmem:[%s3528_s3 + $0x210] sm:$0xff]  ;;  %v446_v42 = vadd.s32 9, %v2799_v2 }
  0x44   : > { %1134 = vmatpush.bf16.msrb.mxu2 %v2540_v19  ;;  %1327 = vmatpush.bf16.msrb.mxu3 %v2500_v20  ;;  %v2517_v19 = vld [vmem:[%s3528_s3 + $0x98] sm:$0xff] }
  0x45   : > { %1085 = vmatpush.bf16.msrb.mxu1 %v2532_v34  ;;  %v3200_v57 = vsel %vm708_vm1, %v799_v50, %v803_v47  ;;  %v2565_v20 = vld [vmem:[%s3528_s3 + $0x218] sm:$0xff]  ;;  %vm456_vm0 = vcmp.ge.s32.totalorder %v446_v42, 0  ;;  %vm466_vm2 = vcmp.lt.s32.totalorder %v446_v42, 16  ;;  %v2555_v47 = vld [vmem:[%s3528_s3 + $0x1c8] sm:$0xff] }
  0x46   : > { %1074 = vmatmul.bf16.gmra.mxu3 %v3200_v57  ;;  %vm3300_vm4 = vmand %vm456_vm0, %vm466_vm2 }
  0x47   : > { %1377 = vmatpush.bf16.msrb.mxu0 %v2507_v45 }
  0x48   : > { %1135 = vmatpush.bf16.msrb.mxu2 %v2539_v37  ;;  %1328 = vmatpush.bf16.msrb.mxu3 %v2499_v38 }
  0x49   : > { %1086 = vmatpush.bf16.msrb.mxu1 %v2531_v48  ;;  %v2515_v48 = vld [vmem:[%s3528_s3 + $0x88] sm:$0xff] }
  0x4b   : > { %1378 = vmatpush.bf16.msrb.mxu0 %v2506_v55 }
  0x4c   : > { %1136 = vmatpush.bf16.msrb.mxu2 %v2538_v49  ;;  %1329 = vmatpush.bf16.msrb.mxu3 %v2498_v51  ;;  %v2563_v51 = vld [vmem:[%s3528_s3 + $0x208] sm:$0xff] }
  0x4d   : > { %1087 = vmatpush.bf16.msrb.mxu1 %v2530_v58 }
  0x4f   : > { %1820 = vmatpush.bf16.msra.mxu0 %v2569_v60 }
  0x50   : > { %1722 = vmatpush.bf16.msra.mxu2 %v2553_v54  ;;  %1771 = vmatpush.bf16.msra.mxu3 %v2561_v56 }
  0x51   : > { %1420 = vmatpush.bf16.msra.mxu1 %v2521_v61  ;;  %1137 = vmatmul.bf16.vlgmr.msrb.gmra.mxu2 %v2970_v33 }
  0x52   : > { %1088 = vmatmul.bf16.vlgmr.msrb.gmra.mxu1 %v732_v22  ;;  %1379 = vmatmul.bf16.vlgmr.msrb.gmra.mxu0 %v3075_v21  ;;  %v445_v22 = vadd.s32 8, %v2799_v2  ;;  %v2547_v2 = vld [vmem:[%s3528_s3 + $0x188] sm:$0xff] }
  0x53   : > { %1821 = vmatpush.bf16.msra.mxu0 %v2568_v3 }
  0x54   : > { %1723 = vmatpush.bf16.msra.mxu2 %v2552_v63  ;;  %1772 = vmatpush.bf16.msra.mxu3 %v2560_v0  ;;  %vm455_vm12 = vcmp.ge.s32.totalorder %v445_v22, 0  ;;  %vm465_vm14 = vcmp.lt.s32.totalorder %v445_v22, 16 }
  0x55   : > { %1421 = vmatpush.bf16.msra.mxu1 %v2520_v5  ;;  %vm475_vm15 = vmand %vm455_vm12, %vm465_vm14 }
  0x56   : > { %1330 = vmatmul.bf16.vlgmr.msrb.gmra.mxu3 %v2988_v39  ;;  %v494_v34 = vsel %vm475_vm15, %v432_v26, 0 }
  0x57   : > { %1822 = vmatpush.bf16.msra.mxu0 %v2567_v11  ;;  %v534_v37 = vunpack.c.l.b16 %v494_v34  ;;  %v2554_v11 = vld [vmem:[%s3528_s3 + $0x1c0] sm:$0xff] }
  0x58   : > { %1724 = vmatpush.bf16.msra.mxu2 %v2551_v7  ;;  %1773 = vmatpush.bf16.msra.mxu3 %v2559_v8 }
  0x59   : > { %1422 = vmatpush.bf16.msra.mxu1 %v2519_v10  ;;  %v2546_v10 = vld [vmem:[%s3528_s3 + $0x180] sm:$0xff] }
  0x5c   : > { %1725 = vmatpush.bf16.msra.mxu2 %v2550_v12  ;;  %1774 = vmatpush.bf16.msra.mxu3 %v2558_v14 }
  0x5d   : > { %1423 = vmatpush.bf16.msra.mxu1 %v2518_v15 }
  0x60   : > { %1726 = vmatpush.bf16.msra.mxu2 %v2549_v16  ;;  %1775 = vmatpush.bf16.msra.mxu3 %v2557_v18  ;;  %v2562_v16 = vld [vmem:[%s3528_s3 + $0x200] sm:$0xff] }
  0x61   : > { %1142 = vmatmul.bf16.gmra.mxu2 %v3148_v23  ;;  %1424 = vmatpush.bf16.msra.mxu1 %v2517_v19 }
  0x62   : > { %1093 = vmatmul.bf16.gmra.mxu1 %v2970_v33  ;;  %1384 = vmatmul.bf16.gmra.mxu0 %v2929_v1  ;;  %v2566_v33 = vld [vmem:[%s3528_s3 + $0x220] sm:$0xff] }
  0x63   : > { %1823 = vmatpush.bf16.msra.mxu0 %v2566_v33  ;;  %v2514_v33 = vld [vmem:[%s3528_s3 + $0x80] sm:$0xff] }
  0x64   : > { %1727 = vmatpush.bf16.msra.mxu2 %v2548_v25 }
  0x65   : > { %1425 = vmatpush.bf16.msra.mxu1 %v2516_v28 }
  0x66   : > { %1335 = vmatmul.bf16.gmra.mxu3 %v3075_v21 }
  0x67   : > { %1824 = vmatpush.bf16.msra.mxu0 %v2565_v20 }
  0x68   : > { %1728 = vmatpush.bf16.msra.mxu2 %v2547_v2 }
  0x69   : > { %1426 = vmatpush.bf16.msra.mxu1 %v2515_v48 }
  0x6b   : > { %1825 = vmatpush.bf16.msra.mxu0 %v2564_v30 }
  0x6c   : > { %1729 = vmatpush.bf16.msra.mxu2 %v2546_v10 }
  0x6d   : > { %1427 = vmatpush.bf16.msra.mxu1 %v2514_v33 }
  0x6f   : > { %1826 = vmatpush.bf16.msra.mxu0 %v2563_v51 }
  0x71   : > { %1147 = vmatmul.bf16.gmra.mxu2 %v2991_v41 }
  0x72   : > { %1098 = vmatmul.bf16.gmra.mxu1 %v3148_v23  ;;  %1389 = vmatmul.bf16.gmra.mxu0 %v3113_v52  ;;  %v431_v23 = vld [vmem:[%s2829_s17 + $0x38] sm:$0xf]  ;;  %s2197_s17 = sshll.u32 %s388_s29, 2  ;;  %s3479_s29 = scalar_lea.vmem %s3529_s4, %s2180_s12 }
  0x73   : > { %v493_v32 = vsel %vm475_vm15, %v431_v23, 0  ;;  %s390_s14 = scalar_lea.vmem %s3527_s2, %s2197_s17  ;;  %1827 = vmatpush.bf16.msra.mxu0 %v2562_v16  ;;  %s411_s12 = sadd.s32 %s2202_s11, %s3571_s18 }
  0x74   : > { %v533_v35 = vunpack.c.l.b16 %v493_v32  ;;  %v433_v45 = vld [vmem:[%s390_s14] sm:$0xf]  ;;  %v434_v46 = vld [vmem:[%s390_s14 + $0x4] sm:$0xf]  ;;  %s2203_s15 = sshll.u32 %s411_s12, 1 }
  0x75   : > { %v495_v54 = vsel %vm3300_vm4, %v433_v45, 0  ;;  %v496_v55 = vsel %vm3300_vm4, %v434_v46, 0  ;;  %s413_s25 = scalar_lea.vmem %s3530_s5, %s2203_s15 }
  0x76   : > { %1340 = vmatmul.bf16.gmra.mxu3 %v2929_v1  ;;  %v545_v38 = vpack.c.b16 %v534_v37, %v533_v35  ;;  %v535_v58 = vunpack.c.l.b16 %v495_v54  ;;  %v536_v60 = vunpack.c.l.b16 %v496_v55  ;;  %v1491_v55 = vrot.slane %v2961_v27, 1 }
  0x78   : > { %v604_v43 = vshrl.u32 %v545_v38, 16  ;;  %v607_v50 = vshll.u32 %v545_v38, 16  ;;  %v546_v63 = vpack.c.b16 %v536_v60, %v535_v58  ;;  %v1490_v58 = vrot.slane %v2988_v39, 1 }
  0x7a   : > { %v606_v49 = vrot.slane %v604_v43, 7  ;;  %v611_v5 = vshrl.u32 %v546_v63, 16  ;;  %v614_v14 = vshll.u32 %v546_v63, 16 }
  0x7c   : > { %v609_v56 = vor.u32 %v607_v50, %v606_v49  ;;  %v3331_v3 = vsel %vm2914_vm3, %v606_v49, 0  ;;  %v613_v12 = vrot.slane %v611_v5, 7  ;;  %v1496_v49 = vrot.slane %v2929_v1, 1 }
  0x7d   : > { %v813_v8 = vshll.u32 %v3331_v3, 16  ;;  %v1497_v50 = vrot.slane %v2920_v59, 1  ;;  %v1494_v59 = vrot.slane %v3054_v40, 1 }
  0x7e   : > { %v3325_v61 = vsel %vm2914_vm3, 0, %v609_v56  ;;  %v616_v20 = vor.u32 %v614_v14, %v613_v12  ;;  %v3364_v30 = vsel %vm2914_vm3, %v613_v12, 0  ;;  %v1500_v14 = vrot.slane %v3102_v31, 1 }
  0x7f   : > { %v808_v0 = vshll.u32 %v3325_v61, 16  ;;  %v815_v19 = vrot.slane %v813_v8, 1  ;;  %v825_v37 = vshll.u32 %v3364_v30, 16 }
  0x80   : > { %v3355_v26 = vsel %vm2914_vm3, 0, %v616_v20 }
  0x81   : > { %1152 = vmatmul.bf16.gmra.mxu2 %v3175_v44  ;;  %v810_v7 = vrot.slane %v808_v0, 1  ;;  %v820_v28 = vshll.u32 %v3355_v26, 16  ;;  %v818_v34 = vshrl.u32 %v3355_v26, 16  ;;  %v827_v45 = vrot.slane %v825_v37, 1 }
  0x82   : > { %1103 = vmatmul.bf16.gmra.mxu1 %v2991_v41  ;;  %1394 = vmatmul.bf16.gmra.mxu0 %v2939_v9  ;;  %v2556_v41 = vld [vmem:[%s3528_s3 + $0x1d0] sm:$0xff] }
  0x83   : > { %1776 = vmatpush.bf16.msra.mxu3 %v2556_v41  ;;  %v822_v35 = vrot.slane %v820_v28, 1 }
  0x85   : > { %v823_v43 = vor.u32 %v822_v35, %v818_v34 }
  0x86   : > { %1345 = vmatmul.bf16.gmra.mxu3 %v3113_v52 }
  0x87   : > { %1777 = vmatpush.bf16.msra.mxu3 %v2555_v47  ;;  %v828_v53 = vsel %vm708_vm1, %v823_v43, %v827_v45 }
  0x8b   : > { %1778 = vmatpush.bf16.msra.mxu3 %v2554_v11 }
  0x91   : > { %1157 = vmatmul.bf16.gmra.mxu2 %v3027_v4 }
  0x92   : > { %1108 = vmatmul.bf16.gmra.mxu1 %v3175_v44  ;;  %1399 = vmatmul.bf16.gmra.mxu0 %v3133_v13 }
  0x96   : > { %1350 = vmatmul.bf16.gmra.mxu3 %v2939_v9 }
  0xa1   : > { %1162 = vmatmul.bf16.gmra.mxu2 %v3200_v57 }
  0xa2   : > { %1113 = vmatmul.bf16.gmra.mxu1 %v3027_v4  ;;  %1404 = vmatmul.bf16.gmra.mxu0 %v2953_v24  ;;  %v806_v4 = vshrl.u32 %v3325_v61, 16 }
  0xa4   : > { %v811_v18 = vor.u32 %v810_v7, %v806_v4  ;;  %v1493_v4 = vrot.slane %v3075_v21, 1 }
  0xa6   : > { %1355 = vmatmul.bf16.gmra.mxu3 %v3133_v13  ;;  %v816_v23 = vsel %vm708_vm1, %v811_v18, %v815_v19  ;;  %vm1489_vm1 = vcmask 1046528  }
  0xa7   : > { %v1498_v0 = vsel %vm1489_vm1, %v1496_v49, %v1497_v50  ;;  %v1492_v5 = vsel %vm1489_vm1, %v1490_v58, %v1491_v55  ;;  %v1495_v39 = vsel %vm1489_vm1, %v1493_v4, %v1494_v59 }
  0xab   : > { %v3342_v15 = vpop.f32.mrf.mxu1 }
  0xaf   : > { %v1040_v22 = vpop.f32.mrf.mxu0 }
  0xb1   : > { %1167 = vmatmul.bf16.gmra.mxu2 %v816_v23 }
  0xb2   : > { %1118 = vmatmul.bf16.gmra.mxu1 %v3200_v57  ;;  %1409 = vmatmul.bf16.gmra.mxu0 %v3164_v36  ;;  %v3357_v25 = vpop.f32.mrf.mxu2 }
  0xb3   : > { %v3359_v41 = vpop.f32.mrf.mxu1 }
  0xb4   : > { %v3366_v32 = vpop.f32.mrf.mxu3 }
  0xb6   : > { %1360 = vmatmul.bf16.gmra.mxu3 %v2953_v24 }
  0xb7   : > { %v1042_v57 = vpop.f32.mrf.mxu0 }
  0xba   : > { %v3373_v42 = vpop.f32.mrf.mxu2 }
  0xbb   : > { %v3371_v38 = vpop.f32.mrf.mxu1 }
  0xbc   : > { %v3376_v44 = vpop.f32.mrf.mxu3 }
  0xbf   : > { %v1045_v46 = vpop.f32.mrf.mxu0 }
  0xc1   : > { %1172 = vmatmul.bf16.gmra.mxu2 %v828_v53 }
  0xc2   : > { %1123 = vmatmul.bf16.gmra.mxu1 %v816_v23  ;;  %1414 = vmatmul.bf16.gmra.mxu0 %v3325_v61 }
  0xc3   : > { %v3379_v2 = vpop.f32.mrf.mxu1 }
  0xc4   : > { %v3381_v47 = vpop.f32.mrf.mxu2 }
  0xc6   : > { %1365 = vmatmul.bf16.gmra.mxu3 %v3164_v36 }
  0xc7   : > { %v1047_v48 = vpop.f32.mrf.mxu0 }
  0xc9   : > { %v3386_v51 = vpop.f32.mrf.mxu3 }
  0xcc   : > { %v3390_v60 = vpop.f32.mrf.mxu2 }
  0xcf   : > { %v1089_v54 = vpop.f32.mrf.mxu1  ;;  %v1380_v63 = vpop.f32.mrf.mxu0 }
  0xd0   : > { %v1090_v56 = vadd.f32 %v1089_v54, %v1040_v22 }
  0xd1   : > { %v3397_v7 = vpop.f32.mrf.mxu3  ;;  %1730 = vmatmul.bf16.vlgmr.msra.gmra.mxu2 %v1492_v5 }
  0xd2   : > { %1428 = vmatmul.bf16.vlgmr.msra.gmra.mxu1 %v2929_v1  ;;  %1828 = vmatmul.bf16.vlgmr.msra.gmra.mxu0 %v1498_v0  ;;  %v1499_v1 = vrot.slane %v3113_v52, 1 }
  0xd4   : > { %v1138_v10 = vpop.f32.mrf.mxu2  ;;  %v1501_v20 = vsel %vm1489_vm1, %v1499_v1, %v1500_v14 }
  0xd5   : > { %v1139_v12 = vadd.f32 %v1138_v10, %v1090_v56  ;;  %v1506_v10 = vrot.slane %v3125_v6, 1 }
  0xd6   : > { %1779 = vmatmul.bf16.vlgmr.msra.gmra.mxu3 %v1495_v39 }
  0xd7   : > { %v1091_v27 = vpop.f32.mrf.mxu1  ;;  %v1382_v11 = vpop.f32.mrf.mxu0 }
  0xd8   : > { %v1092_v8 = vadd.f32 %v1091_v27, %v1042_v57 }
  0xd9   : > { %v1331_v33 = vpop.f32.mrf.mxu3 }
  0xda   : > { %v1332_v16 = vadd.f32 %v1331_v33, %v1139_v12 }
  0xdc   : > { %v1140_v18 = vpop.f32.mrf.mxu2  ;;  %v3404_v22 = vadd.f32 %v1380_v63, %v1332_v16 }
  0xdd   : > { %v1141_v23 = vadd.f32 %v1140_v18, %v1092_v8 }
  0xdf   : > { %v1094_v40 = vpop.f32.mrf.mxu1  ;;  %v1385_v19 = vpop.f32.mrf.mxu0 }
  0xe0   : > { %v1095_v21 = vadd.f32 %v1094_v40, %v1045_v46  ;;  %v1502_v46 = vrot.slane %v2939_v9, 1 }
  0xe1   : > { %v1333_v28 = vpop.f32.mrf.mxu3  ;;  %1735 = vmatmul.bf16.gmra.mxu2 %v1495_v39 }
  0xe2   : > { %1433 = vmatmul.bf16.gmra.mxu1 %v3113_v52  ;;  %1833 = vmatmul.bf16.gmra.mxu0 %v1501_v20  ;;  %v1334_v34 = vadd.f32 %v1333_v28, %v1141_v23  ;;  %v1503_v52 = vrot.slane %v2925_v62, 1 }
  0xe4   : > { %v1143_v31 = vpop.f32.mrf.mxu2  ;;  %v3406_v43 = vadd.f32 %v1382_v11, %v1334_v34  ;;  %v1509_v34 = vrot.slane %v2945_v17, 1 }
  0xe5   : > { %v1144_v45 = vadd.f32 %v1143_v31, %v1095_v21 }
  0xe6   : > { %1784 = vmatmul.bf16.gmra.mxu3 %v1498_v0 }
  0xe7   : > { %v1096_v57 = vpop.f32.mrf.mxu1  ;;  %v1387_v37 = vpop.f32.mrf.mxu0 }
  0xe8   : > { %v1097_v35 = vadd.f32 %v1096_v57, %v1047_v48  ;;  %v1504_v48 = vsel %vm1489_vm1, %v1502_v46, %v1503_v52 }
  0xe9   : > { %v1336_v53 = vpop.f32.mrf.mxu3 }
  0xea   : > { %v1337_v50 = vadd.f32 %v1336_v53, %v1144_v45 }
  0xec   : > { %v1145_v55 = vpop.f32.mrf.mxu2  ;;  %v3413_v58 = vadd.f32 %v1385_v19, %v1337_v50 }
  0xed   : > { %v1146_v63 = vadd.f32 %v1145_v55, %v1097_v35 }
  0xef   : > { %v1099_v49 = vpop.f32.mrf.mxu1  ;;  %v1390_v56 = vpop.f32.mrf.mxu0 }
  0xf0   : > { %v1100_v54 = vadd.f32 %v1099_v49, %v3342_v15 }
  0xf1   : > { %v1338_v5 = vpop.f32.mrf.mxu3  ;;  %1740 = vmatmul.bf16.gmra.mxu2 %v1498_v0 }
  0xf2   : > { %1438 = vmatmul.bf16.gmra.mxu1 %v2939_v9  ;;  %1838 = vmatmul.bf16.gmra.mxu0 %v1504_v48  ;;  %v1339_v4 = vadd.f32 %v1338_v5, %v1146_v63  ;;  %v1505_v9 = vrot.slane %v3133_v13, 1  ;;  %v1512_v5 = vrot.slane %v3153_v29, 1 }
  0xf4   : > { %v1148_v27 = vpop.f32.mrf.mxu2  ;;  %v3416_v39 = vadd.f32 %v1387_v37, %v1339_v4 }
  0xf5   : > { %v1149_v15 = vadd.f32 %v1148_v27, %v1100_v54 }
  0xf6   : > { %1789 = vmatmul.bf16.gmra.mxu3 %v1501_v20 }
  0xf7   : > { %v1101_v59 = vpop.f32.mrf.mxu1  ;;  %v1392_v8 = vpop.f32.mrf.mxu0 }
  0xf8   : > { %v1102_v62 = vadd.f32 %v1101_v59, %v3359_v41  ;;  %v1507_v41 = vsel %vm1489_vm1, %v1505_v9, %v1506_v10 }
  0xf9   : > { %v1341_v11 = vpop.f32.mrf.mxu3 }
  0xfa   : > { %v1342_v1 = vadd.f32 %v1341_v11, %v1149_v15 }
  0xfc   : > { %v1150_v0 = vpop.f32.mrf.mxu2  ;;  %v3423_v40 = vadd.f32 %v1390_v56, %v1342_v1 }
  0xfd   : > { %v1151_v16 = vadd.f32 %v1150_v0, %v1102_v62 }
  0xff   : > { %v1104_v12 = vpop.f32.mrf.mxu1  ;;  %v1395_v33 = vpop.f32.mrf.mxu0 }
 0x100   : > { %v1105_v14 = vadd.f32 %v1104_v12, %v3371_v38 }
 0x101   : > { %v1343_v21 = vpop.f32.mrf.mxu3  ;;  %1745 = vmatmul.bf16.gmra.mxu2 %v1501_v20 }
 0x102   : > { %1443 = vmatmul.bf16.gmra.mxu1 %v3133_v13  ;;  %1843 = vmatmul.bf16.gmra.mxu0 %v1507_v41  ;;  %v1344_v19 = vadd.f32 %v1343_v21, %v1151_v16  ;;  %v1508_v13 = vrot.slane %v2953_v24, 1 }
 0x104   : > { %v1153_v23 = vpop.f32.mrf.mxu2  ;;  %v3426_v57 = vadd.f32 %v1392_v8, %v1344_v19  ;;  %v1510_v20 = vsel %vm1489_vm1, %v1508_v13, %v1509_v34 }
 0x105   : > { %v1154_v38 = vadd.f32 %v1153_v23, %v1105_v14 }
 0x106   : > { %1794 = vmatmul.bf16.gmra.mxu3 %v1504_v48 }
 0x107   : > { %v1106_v18 = vpop.f32.mrf.mxu1  ;;  %v1397_v28 = vpop.f32.mrf.mxu0 }
 0x108   : > { %v1107_v6 = vadd.f32 %v1106_v18, %v3379_v2 }
 0x109   : > { %v1346_v35 = vpop.f32.mrf.mxu3 }
 0x10a   : > { %v1347_v37 = vadd.f32 %v1346_v35, %v1154_v38 }
 0x10c   : > { %v1155_v45 = vpop.f32.mrf.mxu2  ;;  %v3432_v2 = vadd.f32 %v1395_v33, %v1347_v37  ;;  %v1515_v33 = vrot.slane %v3331_v3, 1 }
 0x10d   : > { %v1156_v52 = vadd.f32 %v1155_v45, %v1107_v6  ;;  %v1518_v45 = vrot.slane %v3364_v30, 1 }
 0x10f   : > { %v1109_v31 = vpop.f32.mrf.mxu1  ;;  %v1400_v46 = vpop.f32.mrf.mxu0 }
 0x110   : > { %v1110_v54 = vadd.f32 %v1109_v31, %v3357_v25 }
 0x111   : > { %v1348_v53 = vpop.f32.mrf.mxu3  ;;  %1750 = vmatmul.bf16.gmra.mxu2 %v1504_v48 }
 0x112   : > { %1448 = vmatmul.bf16.gmra.mxu1 %v2953_v24  ;;  %1848 = vmatmul.bf16.gmra.mxu0 %v1510_v20  ;;  %v1349_v50 = vadd.f32 %v1348_v53, %v1156_v52  ;;  %v1511_v24 = vrot.slane %v3164_v36, 1 }
 0x114   : > { %v1158_v17 = vpop.f32.mrf.mxu2  ;;  %v3435_v56 = vadd.f32 %v1397_v28, %v1349_v50  ;;  %v1513_v25 = vsel %vm1489_vm1, %v1511_v24, %v1512_v5 }
 0x115   : > { %v1159_v63 = vadd.f32 %v1158_v17, %v1110_v54 }
 0x116   : > { %1799 = vmatmul.bf16.gmra.mxu3 %v1507_v41 }
 0x117   : > { %v1111_v49 = vpop.f32.mrf.mxu1  ;;  %v1402_v55 = vpop.f32.mrf.mxu0 }
 0x118   : > { %v1112_v27 = vadd.f32 %v1111_v49, %v3373_v42 }
 0x119   : > { %v1351_v59 = vpop.f32.mrf.mxu3 }
 0x11a   : > { %v1352_v62 = vadd.f32 %v1351_v59, %v1159_v63 }
 0x11c   : > { %v1160_v48 = vpop.f32.mrf.mxu2  ;;  %v3442_v15 = vadd.f32 %v1400_v46, %v1352_v62 }
 0x11d   : > { %v1161_v9 = vadd.f32 %v1160_v48, %v1112_v27 }
 0x11f   : > { %v1114_v4 = vpop.f32.mrf.mxu1  ;;  %v1405_v8 = vpop.f32.mrf.mxu0 }
 0x120   : > { %v1115_v29 = vadd.f32 %v1114_v4, %v3381_v47 }
 0x121   : > { %v1353_v10 = vpop.f32.mrf.mxu3  ;;  %1755 = vmatmul.bf16.gmra.mxu2 %v1507_v41 }
 0x122   : > { %1453 = vmatmul.bf16.gmra.mxu1 %v3164_v36  ;;  %1853 = vmatmul.bf16.gmra.mxu0 %v1513_v25  ;;  %v1354_v12 = vadd.f32 %v1353_v10, %v1161_v9  ;;  %v1514_v36 = vrot.slane %v3325_v61, 1 }
 0x124   : > { %v1163_v1 = vpop.f32.mrf.mxu2  ;;  %v3445_v0 = vadd.f32 %v1402_v55, %v1354_v12  ;;  %v1516_v47 = vsel %vm1489_vm1, %v1514_v36, %v1515_v33 }
 0x125   : > { %v1164_v42 = vadd.f32 %v1163_v1, %v1115_v29 }
 0x126   : > { %1804 = vmatmul.bf16.gmra.mxu3 %v1510_v20 }
 0x127   : > { %v1116_v11 = vpop.f32.mrf.mxu1  ;;  %v1407_v14 = vpop.f32.mrf.mxu0 }
 0x128   : > { %v1117_v19 = vadd.f32 %v1116_v11, %v3390_v60 }
 0x129   : > { %v1356_v16 = vpop.f32.mrf.mxu3 }
 0x12a   : > { %v1357_v18 = vadd.f32 %v1356_v16, %v1164_v42 }
 0x12c   : > { %v1165_v41 = vpop.f32.mrf.mxu2  ;;  %v3452_v23 = vadd.f32 %v1405_v8, %v1357_v18 }
 0x12d   : > { %v1166_v28 = vadd.f32 %v1165_v41, %v1117_v19 }
 0x12f   : > { %v1119_v21 = vpop.f32.mrf.mxu1  ;;  %v1410_v6 = vpop.f32.mrf.mxu0 }
 0x130   : > { %v1120_v3 = vadd.f32 %v1119_v21, %v3366_v32 }
 0x131   : > { %v1358_v38 = vpop.f32.mrf.mxu3  ;;  %1760 = vmatmul.bf16.gmra.mxu2 %v1510_v20 }
 0x132   : > { %1458 = vmatmul.bf16.gmra.mxu1 %v3325_v61  ;;  %1858 = vmatmul.bf16.gmra.mxu0 %v1516_v47  ;;  %v1359_v34 = vadd.f32 %v1358_v38, %v1166_v28  ;;  %v1517_v61 = vrot.slane %v3355_v26, 1 }
 0x134   : > { %v1168_v35 = vpop.f32.mrf.mxu2  ;;  %v3455_v37 = vadd.f32 %v1407_v14, %v1359_v34  ;;  %v1519_v32 = vsel %vm1489_vm1, %v1517_v61, %v1518_v45 }
 0x135   : > { %v1169_v60 = vadd.f32 %v1168_v35, %v1120_v3 }
 0x136   : > { %1809 = vmatmul.bf16.gmra.mxu3 %v1513_v25 }
 0x137   : > { %v1121_v13 = vpop.f32.mrf.mxu1  ;;  %v1412_v31 = vpop.f32.mrf.mxu0 }
 0x138   : > { %v1122_v49 = vadd.f32 %v1121_v13, %v3376_v44 }
 0x139   : > { %v1361_v46 = vpop.f32.mrf.mxu3 }
 0x13a   : > { %v1362_v53 = vadd.f32 %v1361_v46, %v1169_v60 }
 0x13c   : > { %v1170_v20 = vpop.f32.mrf.mxu2  ;;  %v3462_v54 = vadd.f32 %v1410_v6, %v1362_v53 }
 0x13d   : > { %v1171_v17 = vadd.f32 %v1170_v20, %v1122_v49 }
 0x13f   : > { %v1124_v52 = vpop.f32.mrf.mxu1  ;;  %v1415_v50 = vpop.f32.mrf.mxu0 }
 0x140   : > { %v1125_v30 = vadd.f32 %v1124_v52, %v3386_v51 }
 0x141   : > { %v1363_v55 = vpop.f32.mrf.mxu3  ;;  %1765 = vmatmul.bf16.gmra.mxu2 %v1513_v25 }
 0x142   : > { %1463 = vmatmul.bf16.gmra.mxu1 %v3355_v26  ;;  %1863 = vmatmul.bf16.gmra.mxu0 %v1519_v32  ;;  %v1364_v24 = vadd.f32 %v1363_v55, %v1171_v17 }
 0x144   : > { %v1173_v5 = vpop.f32.mrf.mxu2  ;;  %v3465_v4 = vadd.f32 %v1412_v31, %v1364_v24 }
 0x145   : > { %v1174_v44 = vadd.f32 %v1173_v5, %v1125_v30 }
 0x146   : > { %1814 = vmatmul.bf16.gmra.mxu3 %v1516_v47 }
 0x147   : > { %v1126_v63 = vpop.f32.mrf.mxu1  ;;  %v1417_v59 = vpop.f32.mrf.mxu0 }
 0x148   : > { %v1127_v48 = vadd.f32 %v1126_v63, %v3397_v7 }
 0x149   : > { %v1366_v62 = vpop.f32.mrf.mxu3 }
 0x14a   : > { %v1367_v27 = vadd.f32 %v1366_v62, %v1174_v44 }
 0x14c   : > { %v1175_v8 = vpop.f32.mrf.mxu2  ;;  %v3468_v10 = vadd.f32 %v1415_v50, %v1367_v27 }
 0x14d   : > { %v1176_v25 = vadd.f32 %v1175_v8, %v1127_v48 }
 0x14f   : > { %v1429_v26 = vpop.f32.mrf.mxu1  ;;  %v1829_v9 = vpop.f32.mrf.mxu0 }
 0x150   : > { %v1430_v41 = vadd.f32 %v1429_v26, %v3404_v22 }
 0x151   : > { %v1368_v11 = vpop.f32.mrf.mxu3 }
 0x152   : > { %v1369_v29 = vadd.f32 %v1368_v11, %v1176_v25 }
 0x154   : > { %v1731_v51 = vpop.f32.mrf.mxu2  ;;  %v3470_v14 = vadd.f32 %v1417_v59, %v1369_v29 }
 0x157   : > { %v1431_v12 = vpop.f32.mrf.mxu1  ;;  %v1831_v1 = vpop.f32.mrf.mxu0 }
 0x158   : > { %v1432_v28 = vadd.f32 %v1431_v12, %v3406_v43 }
 0x159   : > { %v1780_v42 = vpop.f32.mrf.mxu3 }
 0x15a   : > { %v1781_v33 = vadd.f32 %v1780_v42, %v1731_v51 }
 0x15c   : > { %v1733_v16 = vpop.f32.mrf.mxu2  ;;  %v1830_v18 = vadd.f32 %v1829_v9, %v1781_v33 }
 0x15e   : > { %v1869_v47 = vadd.f32 %v1830_v18, %v1430_v41 }
 0x15f   : > { %v1434_v36 = vpop.f32.mrf.mxu1  ;;  %v1834_v21 = vpop.f32.mrf.mxu0 }
 0x160   : > { %v1938_v35 = vmul.f32 %v1869_v47, %v1869_v47  ;;  %v1435_v52 = vadd.f32 %v1434_v36, %v3413_v58 }
 0x161   : > { %v1782_v7 = vpop.f32.mrf.mxu3 }
 0x162   : > { %v1783_v6 = vadd.f32 %v1782_v7, %v1733_v16 }
 0x164   : > { %v1832_v38 = vadd.f32 %v1831_v1, %v1783_v6  ;;  %v1736_v13 = vpop.f32.mrf.mxu2 }
 0x166   : > { %v1870_v3 = vadd.f32 %v1832_v38, %v1432_v28 }
 0x167   : > { %v1436_v19 = vpop.f32.mrf.mxu1  ;;  %v1836_v34 = vpop.f32.mrf.mxu0 }
 0x168   : > { %v2573_v31 = vpack.c.bf16 %v1870_v3, %v1869_v47  ;;  %v1917_v60 = vadd.f32 %v1870_v3, %v1869_v47  ;;  %v1939_v61 = vmul.f32 %v1870_v3, %v1870_v3  ;;  %v1437_v5 = vadd.f32 %v1436_v19, %v3416_v39 }
 0x169   : > { %v1785_v22 = vpop.f32.mrf.mxu3 }
 0x16a   : > { %2574 = vst [vmem:[%s3479_s29] sm:$0xff] %v2573_v31   ;;  %v1954_v46 = vadd.f32 %v1939_v61, %v1938_v35  ;;  %v1786_v43 = vadd.f32 %v1785_v22, %v1736_v13 }
 0x16c   : > { %v1835_v53 = vadd.f32 %v1834_v21, %v1786_v43  ;;  %v1738_v49 = vpop.f32.mrf.mxu2 }
 0x16e   : > { %v1871_v50 = vadd.f32 %v1835_v53, %v1435_v52 }
 0x16f   : > { %v1439_v45 = vpop.f32.mrf.mxu1  ;;  %v1839_v20 = vpop.f32.mrf.mxu0 }
 0x170   : > { %v1918_v32 = vadd.f32 %v1917_v60, %v1871_v50  ;;  %v1940_v17 = vmul.f32 %v1871_v50, %v1871_v50  ;;  %v1440_v12 = vadd.f32 %v1439_v45, %v3423_v40 }
 0x171   : > { %v1787_v55 = vpop.f32.mrf.mxu3 }
 0x172   : > { %v1955_v24 = vadd.f32 %v1954_v46, %v1940_v17  ;;  %v1788_v30 = vadd.f32 %v1787_v55, %v1738_v49 }
 0x174   : > { %v1837_v59 = vadd.f32 %v1836_v34, %v1788_v30  ;;  %v1741_v44 = vpop.f32.mrf.mxu2 }
 0x176   : > { %v1872_v26 = vadd.f32 %v1837_v59, %v1437_v5 }
 0x177   : > { %v1441_v63 = vpop.f32.mrf.mxu1  ;;  %v1841_v62 = vpop.f32.mrf.mxu0 }
 0x178   : > { %v2578_v27 = vpack.c.bf16 %v1872_v26, %v1871_v50  ;;  %v1919_v48 = vadd.f32 %v1918_v32, %v1872_v26  ;;  %v1941_v58 = vmul.f32 %v1872_v26, %v1872_v26  ;;  %v1442_v7 = vadd.f32 %v1441_v63, %v3426_v57 }
 0x179   : > { %v1790_v8 = vpop.f32.mrf.mxu3 }
 0x17a   : > { %2610 = vst [vmem:[%s3479_s29 + $0x8] sm:$0xff] %v2578_v27   ;;  %v1956_v25 = vadd.f32 %v1955_v24, %v1941_v58  ;;  %v1791_v11 = vadd.f32 %v1790_v8, %v1741_v44 }
 0x17c   : > { %v1840_v29 = vadd.f32 %v1839_v20, %v1791_v11  ;;  %v1743_v51 = vpop.f32.mrf.mxu2 }
 0x17e   : > { %v1873_v42 = vadd.f32 %v1840_v29, %v1440_v12 }
 0x17f   : > { %v1444_v9 = vpop.f32.mrf.mxu1  ;;  %v1844_v1 = vpop.f32.mrf.mxu0 }
 0x180   : > { %v1920_v39 = vadd.f32 %v1919_v48, %v1873_v42  ;;  %v1942_v36 = vmul.f32 %v1873_v42, %v1873_v42  ;;  %v1445_v31 = vadd.f32 %v1444_v9, %v3432_v2 }
 0x181   : > { %v1792_v33 = vpop.f32.mrf.mxu3 }
 0x182   : > { %v1957_v21 = vadd.f32 %v1956_v25, %v1942_v36  ;;  %v1793_v18 = vadd.f32 %v1792_v33, %v1743_v51 }
 0x184   : > { %v1842_v19 = vadd.f32 %v1841_v62, %v1793_v18  ;;  %v1746_v41 = vpop.f32.mrf.mxu2 }
 0x186   : > { %v1874_v47 = vadd.f32 %v1842_v19, %v1442_v7 }
 0x187   : > { %v1446_v16 = vpop.f32.mrf.mxu1  ;;  %v1846_v6 = vpop.f32.mrf.mxu0 }
 0x188   : > { %v2583_v28 = vpack.c.bf16 %v1874_v47, %v1873_v42  ;;  %v1921_v38 = vadd.f32 %v1920_v39, %v1874_v47  ;;  %v1943_v40 = vmul.f32 %v1874_v47, %v1874_v47  ;;  %v1447_v49 = vadd.f32 %v1446_v16, %v3435_v56 }
 0x189   : > { %v1795_v13 = vpop.f32.mrf.mxu3 }
 0x18a   : > { %2611 = vst [vmem:[%s3479_s29 + $0x10] sm:$0xff] %v2583_v28   ;;  %v1958_v34 = vadd.f32 %v1957_v21, %v1943_v40  ;;  %v1796_v3 = vadd.f32 %v1795_v13, %v1746_v41 }
 0x18c   : > { %v1845_v60 = vadd.f32 %v1844_v1, %v1796_v3  ;;  %v1748_v61 = vpop.f32.mrf.mxu2 }
 0x18e   : > { %v1875_v45 = vadd.f32 %v1845_v60, %v1445_v31 }
 0x18f   : > { %v1449_v35 = vpop.f32.mrf.mxu1  ;;  %v1849_v22 = vpop.f32.mrf.mxu0 }
 0x190   : > { %v1922_v57 = vadd.f32 %v1921_v38, %v1875_v45  ;;  %v1944_v46 = vmul.f32 %v1875_v45, %v1875_v45  ;;  %v1450_v44 = vadd.f32 %v1449_v35, %v3442_v15 }
 0x191   : > { %v1797_v43 = vpop.f32.mrf.mxu3 }
 0x192   : > { %v1959_v52 = vadd.f32 %v1958_v34, %v1944_v46  ;;  %v1798_v53 = vadd.f32 %v1797_v43, %v1748_v61 }
 0x194   : > { %v1847_v20 = vadd.f32 %v1846_v6, %v1798_v53  ;;  %v1751_v50 = vpop.f32.mrf.mxu2 }
 0x196   : > { %v1876_v17 = vadd.f32 %v1847_v20, %v1447_v49 }
 0x197   : > { %v1451_v32 = vpop.f32.mrf.mxu1  ;;  %v1851_v55 = vpop.f32.mrf.mxu0 }
 0x198   : > { %v2588_v63 = vpack.c.bf16 %v1876_v17, %v1875_v45  ;;  %v1923_v24 = vadd.f32 %v1922_v57, %v1876_v17  ;;  %v1945_v2 = vmul.f32 %v1876_v17, %v1876_v17  ;;  %v1452_v12 = vadd.f32 %v1451_v32, %v3445_v0 }
 0x199   : > { %v1800_v30 = vpop.f32.mrf.mxu3 }
 0x19a   : > { %2612 = vst [vmem:[%s3479_s29 + $0x18] sm:$0xff] %v2588_v63   ;;  %v1960_v5 = vadd.f32 %v1959_v52, %v1945_v2  ;;  %v1801_v59 = vadd.f32 %v1800_v30, %v1751_v50 }
 0x19c   : > { %v1850_v62 = vadd.f32 %v1849_v22, %v1801_v59  ;;  %v1753_v26 = vpop.f32.mrf.mxu2 }
 0x19e   : > { %v1877_v27 = vadd.f32 %v1850_v62, %v1450_v44 }
 0x19f   : > { %v1454_v48 = vpop.f32.mrf.mxu1  ;;  %v1854_v9 = vpop.f32.mrf.mxu0 }
 0x1a0   : > { %v1924_v56 = vadd.f32 %v1923_v24, %v1877_v27  ;;  %v1946_v58 = vmul.f32 %v1877_v27, %v1877_v27  ;;  %v1455_v7 = vadd.f32 %v1454_v48, %v3452_v23 }
 0x1a1   : > { %v1802_v8 = vpop.f32.mrf.mxu3 }
 0x1a2   : > { %v1961_v25 = vadd.f32 %v1960_v5, %v1946_v58  ;;  %v1803_v11 = vadd.f32 %v1802_v8, %v1753_v26 }
 0x1a4   : > { %v1852_v29 = vadd.f32 %v1851_v55, %v1803_v11  ;;  %v1756_v51 = vpop.f32.mrf.mxu2 }
 0x1a6   : > { %v1878_v1 = vadd.f32 %v1852_v29, %v1452_v12 }
 0x1a7   : > { %v1456_v33 = vpop.f32.mrf.mxu1  ;;  %v1856_v18 = vpop.f32.mrf.mxu0 }
 0x1a8   : > { %v2593_v42 = vpack.c.bf16 %v1878_v1, %v1877_v27  ;;  %v1925_v39 = vadd.f32 %v1924_v56, %v1878_v1  ;;  %v1947_v36 = vmul.f32 %v1878_v1, %v1878_v1  ;;  %v1457_v34 = vadd.f32 %v1456_v33, %v3455_v37 }
 0x1a9   : > { %v1805_v15 = vpop.f32.mrf.mxu3 }
 0x1aa   : > { %2613 = vst [vmem:[%s3479_s29 + $0x20] sm:$0xff] %v2593_v42   ;;  %v1962_v16 = vadd.f32 %v1961_v25, %v1947_v36  ;;  %v1806_v21 = vadd.f32 %v1805_v15, %v1756_v51 }
 0x1ac   : > { %v1855_v19 = vadd.f32 %v1854_v9, %v1806_v21  ;;  %v1758_v41 = vpop.f32.mrf.mxu2 }
 0x1ae   : > { %v1879_v6 = vadd.f32 %v1855_v19, %v1455_v7 }
 0x1af   : > { %v1459_v13 = vpop.f32.mrf.mxu1  ;;  %v1859_v31 = vpop.f32.mrf.mxu0 }
 0x1b0   : > { %v1926_v47 = vadd.f32 %v1925_v39, %v1879_v6  ;;  %v1948_v0 = vmul.f32 %v1879_v6, %v1879_v6  ;;  %v1460_v43 = vadd.f32 %v1459_v13, %v3462_v54 }
 0x1b1   : > { %v1807_v28 = vpop.f32.mrf.mxu3 }
 0x1b2   : > { %v1963_v38 = vadd.f32 %v1962_v16, %v1948_v0  ;;  %v1808_v40 = vadd.f32 %v1807_v28, %v1758_v41 }
 0x1b4   : > { %v1857_v3 = vadd.f32 %v1856_v18, %v1808_v40  ;;  %v1761_v35 = vpop.f32.mrf.mxu2 }
 0x1b6   : > { %v1880_v60 = vadd.f32 %v1857_v3, %v1457_v34 }
 0x1b7   : > { %v1461_v49 = vpop.f32.mrf.mxu1  ;;  %v1861_v50 = vpop.f32.mrf.mxu0 }
 0x1b8   : > { %v2598_v61 = vpack.c.bf16 %v1880_v60, %v1879_v6  ;;  %v1927_v22 = vadd.f32 %v1926_v47, %v1880_v60  ;;  %v1949_v45 = vmul.f32 %v1880_v60, %v1880_v60  ;;  %v1462_v24 = vadd.f32 %v1461_v49, %v3465_v4 }
 0x1b9   : > { %v1810_v23 = vpop.f32.mrf.mxu3 }
 0x1ba   : > { %2614 = vst [vmem:[%s3479_s29 + $0x28] sm:$0xff] %v2598_v61   ;;  %v1964_v57 = vadd.f32 %v1963_v38, %v1949_v45  ;;  %v1811_v46 = vadd.f32 %v1810_v23, %v1761_v35 }
 0x1bc   : > { %v1860_v52 = vadd.f32 %v1859_v31, %v1811_v46  ;;  %v1763_v53 = vpop.f32.mrf.mxu2 }
 0x1be   : > { %v1881_v20 = vadd.f32 %v1860_v52, %v1460_v43 }
 0x1bf   : > { %v1464_v59 = vpop.f32.mrf.mxu1  ;;  %v1864_v26 = vpop.f32.mrf.mxu0 }
 0x1c0   : > { %v1928_v37 = vadd.f32 %v1927_v22, %v1881_v20  ;;  %v1950_v32 = vmul.f32 %v1881_v20, %v1881_v20  ;;  %v1465_v58 = vadd.f32 %v1464_v59, %v3468_v10 }
 0x1c1   : > { %v1812_v17 = vpop.f32.mrf.mxu3 }
 0x1c2   : > { %v1965_v55 = vadd.f32 %v1964_v57, %v1950_v32  ;;  %v1813_v63 = vadd.f32 %v1812_v17, %v1763_v53 }
 0x1c4   : > { %v1862_v2 = vadd.f32 %v1861_v50, %v1813_v63  ;;  %v1766_v30 = vpop.f32.mrf.mxu2 }
 0x1c6   : > { %v1882_v5 = vadd.f32 %v1862_v2, %v1462_v24 }
 0x1c7   : > { %v1466_v12 = vpop.f32.mrf.mxu1  ;;  %v1866_v42 = vpop.f32.mrf.mxu0 }
 0x1c8   : > { %v2603_v44 = vpack.c.bf16 %v1882_v5, %v1881_v20  ;;  %v1929_v62 = vadd.f32 %v1928_v37, %v1882_v5  ;;  %v1951_v54 = vmul.f32 %v1882_v5, %v1882_v5  ;;  %v1467_v39 = vadd.f32 %v1466_v12, %v3470_v14 }
 0x1c9   : > { %v1815_v27 = vpop.f32.mrf.mxu3 }
 0x1ca   : > { %2615 = vst [vmem:[%s3479_s29 + $0x30] sm:$0xff] %v2603_v44   ;;  %v1966_v48 = vadd.f32 %v1965_v55, %v1951_v54  ;;  %v1816_v56 = vadd.f32 %v1815_v27, %v1766_v30 }
 0x1cc   : > { %v1865_v8 = vadd.f32 %v1864_v26, %v1816_v56  ;;  %v1768_v25 = vpop.f32.mrf.mxu2 }
 0x1ce   : > { %v1883_v9 = vadd.f32 %v1865_v8, %v1465_v58 }
 0x1d0   : > { %v1930_v4 = vadd.f32 %v1929_v62, %v1883_v9  ;;  %v1952_v11 = vmul.f32 %v1883_v9, %v1883_v9 }
 0x1d1   : > { %v1817_v29 = vpop.f32.mrf.mxu3 }
 0x1d2   : > { %v1967_v51 = vadd.f32 %v1966_v48, %v1952_v11  ;;  %v1818_v1 = vadd.f32 %v1817_v29, %v1768_v25 }
 0x1d4   : > { %v1867_v36 = vadd.f32 %v1866_v42, %v1818_v1 }
 0x1d6   : > { %v1884_v15 = vadd.f32 %v1867_v36, %v1467_v39 }
 0x1d8   : > { %v2608_v33 = vpack.c.bf16 %v1884_v15, %v1883_v9  ;;  %v1931_v10 = vadd.f32 %v1930_v4, %v1884_v15  ;;  %v1953_v16 = vmul.f32 %v1884_v15, %v1884_v15 }
 0x1da   : > { %2616 = vst [vmem:[%s3479_s29 + $0x38] sm:$0xff] %v2608_v33   ;;  %v1932_v21 = vrot.slane %v1931_v10, 4  ;;  %v1968_v18 = vadd.f32 %v1967_v51, %v1953_v16 }
 0x1dc   : > { %v1933_v7 = vadd.f32 %v1932_v21, %v1931_v10  ;;  %v1969_v19 = vrot.slane %v1968_v18, 4 }
 0x1de   : > { %v1934_v41 = vrot.slane %v1933_v7, 2  ;;  %v1970_v6 = vadd.f32 %v1969_v19, %v1968_v18 }
 0x1e0   : > { %v1935_v47 = vadd.f32 %v1934_v41, %v1933_v7  ;;  %v1971_v0 = vrot.slane %v1970_v6, 2 }
 0x1e2   : > { %v1936_v28 = vrot.slane %v1935_v47, 1  ;;  %v1972_v14 = vadd.f32 %v1971_v0, %v1970_v6 }
 0x1e4   : > { %v1973_v38 = vrot.slane %v1972_v14, 1  ;;  %v1937_v40 = vadd.f32 %v1936_v28, %v1935_v47 }
 0x1e6   : > { %v1974_v13 = vadd.f32 %v1973_v38, %v1972_v14 }
 0x1e8   : > { %v1976_v34 = vsel %vm637_vm13, %v1937_v40, %v1974_v13 }
 0x1e9   : > { %1977 = vst [vmem:[%s413_s25] sm:$0x3] %v1976_v34 }
 0x1ea PF: > { %s16_s22 = sadd.s32 1, %s2719_s22   ;;  %s3552_s18 = smov %s2711_s20 }
 0x1eb   : > { %p13_p11 = scmp.ge.s32.totalorder %s16_s22, 6   ;;  %s3553_s19 = smov %s2715_s21 }
 0x1ec   : > { %s3554_s20 = smov %s3557_s23  ;;  %s3555_s21 = smov %s3561_s24 }
 0x1ed   :  { %15 = sbr.rel (!%p13_p11) target bundleno = 3 (0x3), region = 84 }

// kernel: double_conv.4
= control target key start
LH: loop header
LB: loop body
LE: loop exit
PB: predicated region body
PF: predicated region fallthrough
CT: control target
= control target key end

     0   :  { %s2972_s24 = smov 0   ;;  %s2974_s25 = smov 0   ;;  %s3774_s0 = inlined_call_operand.vmem [shape: bf16[2,16,16,128], index: 0, kind: input, shape index: {}, may-alias: {0,1,2}]   ;;  %s3775_s1 = inlined_call_operand.vmem [shape: bf16[2,16,16,128], index: 1, kind: input, shape index: {}, may-alias: {0,1,2}]   ;;  %s3776_s2 = inlined_call_operand.vmem [shape: bf16[2,16,16,128], index: 2, kind: input, shape index: {}, may-alias: {0,1,2}]   ;;  %s3777_s3 = inlined_call_operand.vmem [shape: bf16[1152,128], index: 3, kind: input, shape index: {}]   ;;  %s3778_s4 = inlined_call_operand.vmem [shape: f32[1,128], index: 4, kind: input, shape index: {}]   ;;  %s3779_s5 = inlined_call_operand.vmem [shape: f32[1,128], index: 5, kind: input, shape index: {}]   ;;  %s3780_s6 = inlined_call_operand.vmem [shape: bf16[2,16,16,128], index: 6, kind: output, shape index: {0}]   ;;  %s3781_s7 = inlined_call_operand.vmem [shape: f32[2,2,2,128], index: 7, kind: output, shape index: {1}]  }
   0x1   :  { %s2976_s26 = smov 0   ;;  %s2978_s27 = smov 0  }
   0x2   :  { %s2980_s28 = smov 0  }
   0x3 LB: > { %s27_s29 = sadd.s32 1, %s2922_s26  ;;  %s30_s30 = sadd.s32 1, %s2926_s27  ;;  %s2930_s28 = sphi %s2980_s28, %s18_s28   ;;  %s2926_s27 = sphi %s2978_s27, %s3800_s27   ;;  %s2922_s26 = sphi %s2976_s26, %s3799_s26   ;;  %s2918_s25 = sphi %s2974_s25, %s3798_s25   ;;  %s2914_s24 = sphi %s2972_s24, %s3797_s24  }
   0x4   : > { %p28_p0 = scmp.ge.s32.totalorder %s27_s29, 2  ;;  %p2338_p1 = scmp.ge.s32.totalorder %s2930_s28, 1 }
   0x5   : > { %p328_p2 = scmp.lt.s32.totalorder %s2930_s28, 5 }
   0x6   : > { %s3802_s29 = smov (%p28_p0, %s27_s29), 0  ;;  %s3804_s30 = smov (!%p28_p0, %s30_s30), %s2926_s27 }
   0x7   : > { %p329_p3 = pnand %p2338_p1, %p328_p2  ;;  %p32_p4 = scmp.ge.s32.totalorder %s3804_s30, 2 }
   0x8   : > { %s3008_s10 = sshll.u32 (!%p329_p3), %s2914_s24, 3  ;;  %p405_p5 = scmp.lt.s32.totalorder (!%p329_p3), %s2918_s25, 1 }
   0x9   : > { %s3806_s30 = smov (%p32_p4, %s3804_s30), 0  ;;  %332 = sbr.rel (%p329_p3) target bundleno = 506 (0x1fa), region = 44 }
   0xa   : > { %p407_p6 = scmp.lt.s32.totalorder (!%p329_p3), %s3008_s10, 15  ;;  %s3012_s11 = sadd.s32 (!%p329_p3), 4294967295, %s3008_s10 }
   0xb   : > { %p417_p7 = scmp.gt.s32.totalorder (!%p329_p3), %s3012_s11, 0  ;;  %p2345_p8 = scmp.lt.s32.totalorder (!%p329_p3), %s3012_s11, 15 }
   0xc   : > { %s433_s9 = sadd.s32 (!%p329_p3), 8, %s3008_s10  ;;  %p462_p10 = scmp.lt.s32.totalorder (!%p329_p3), %s2914_s24, 1 }
   0xd   : > { %p3273_p9 = scmp.lt.s32.totalorder (!%p329_p3), %s433_s9, 15 }
   0xe   : > { %v2691_v0 = vld [vmem:[%s3777_s3 + $0xf8] sm:$0xff]  ;;  %v2690_v1 = vld [vmem:[%s3777_s3 + $0xf0] sm:$0xff]  ;;  %s3808_s25 = smov (!%p405_p5, %s2918_s25), 1  ;;  %v3020_v2 = vstv %s3012_s11  ;;  %v2689_v6 = vld [vmem:[%s3777_s3 + $0xe8] sm:$0xff]  ;;  %vm799_vm9 = vcmask 1040384   ;;  %s3816_s24 = smov (!%p462_p10, %s2914_s24), 1 }
   0xf   : > { %2826 = vmatpush.bf16.msra.mxu1 %v2691_v0  ;;  %2827 = vmatpush.bf16.msra.mxu2 %v2691_v0  ;;  %s408_s14 = scalar_select %p407_p6, %s3008_s10, 15  ;;  %v3027_v3 = vadd.s32 2, %v3020_v2  ;;  %v3030_v4 = vadd.s32 4, %v3020_v2  ;;  %v3033_v5 = vadd.s32 6, %v3020_v2  ;;  %v3054_v7 = vld [vmem:[%s3778_s4] ss:$0 sm:$0xff] }
  0x10   : > { %2828 = vmatpush.bf16.msra.mxu3 %v2691_v0  ;;  %1193 = vmatpush.bf16.msra.mxu0 %v2691_v0  ;;  %s3024_s15 = sshll.u32 %s3808_s25, 5  ;;  %v2688_v11 = vld [vmem:[%s3777_s3 + $0xe0] sm:$0xff]  ;;  %v2687_v31 = vld [vmem:[%s3777_s3 + $0xd8] sm:$0xff]  ;;  %v3098_v35 = vadd.s32 3, %v3020_v2  ;;  %vm609_vm6 = vcmp.ge.s32.totalorder %v3020_v2, 0  ;;  %vm619_vm7 = vcmp.lt.s32.totalorder %v3020_v2, 16 }
  0x11   : > { %s2340_s16 = sshll.u32 %s408_s14, 1  ;;  %vm611_vm0 = vcmp.ge.s32.totalorder %v3027_v3, 0  ;;  %vm621_vm1 = vcmp.lt.s32.totalorder %v3027_v3, 16  ;;  %vm613_vm2 = vcmp.ge.s32.totalorder %v3030_v4, 0  ;;  %vm623_vm3 = vcmp.lt.s32.totalorder %v3030_v4, 16  ;;  %v2686_v51 = vld [vmem:[%s3777_s3 + $0xd0] sm:$0xff]  ;;  %vm3167_vm13 = vmand %vm609_vm6, %vm619_vm7 }
  0x12   : > { %s3039_s19 = sadd.s32 %s3024_s15, %s2340_s16  ;;  %vm615_vm4 = vcmp.ge.s32.totalorder %v3033_v5, 0  ;;  %vm625_vm5 = vcmp.lt.s32.totalorder %v3033_v5, 16  ;;  %v3074_v14 = vld [vmem:[%s3779_s5] ss:$0 sm:$0xff]  ;;  %vm3110_vm8 = vmand %vm611_vm0, %vm621_vm1  ;;  %vm800_vm10 = vsmask.f32 256 }
  0x13   : > { %2829 = vmatpush.bf16.msra.mxu1 %v2690_v1  ;;  %2830 = vmatpush.bf16.msra.mxu2 %v2690_v1  ;;  %s2342_s20 = sshll.u32 %s3039_s19, 2  ;;  %vm3122_vm11 = vmand %vm613_vm2, %vm623_vm3  ;;  %vm870_vm14 = vsmask.f32 7424  ;;  %vm612_vm0 = vcmp.ge.s32.totalorder %v3098_v35, 0  ;;  %vm622_vm1 = vcmp.lt.s32.totalorder %v3098_v35, 16  ;;  %s3812_s9 = smov (!%p3273_p9, %s433_s9), 15 }
  0x14   : > { %2831 = vmatpush.bf16.msra.mxu3 %v2690_v1  ;;  %1194 = vmatpush.bf16.msra.mxu0 %v2690_v1  ;;  %s3049_s23 = scalar_lea.vmem %s3774_s0, %s2342_s20  ;;  %vm3136_vm12 = vmand %vm615_vm4, %vm625_vm5  ;;  %s3814_s9 = smov (!%p3273_p9, %s3812_s9), 15 }
  0x15   : > { %v2812_v8 = vld [vmem:[%s3049_s23 + $0x8] sm:$0xff]   ;;  %v2814_v9 = vld [vmem:[%s3049_s23 + $0x18] sm:$0xff]   ;;  %s418_s12 = scalar_select %p417_p7, %s3012_s11, 0  ;;  %v2813_v17 = vld [vmem:[%s3049_s23 + $0x10] sm:$0xff]  }
  0x16   : > { %v2816_v10 = vld [vmem:[%s3049_s23 + $0x28] sm:$0xff]   ;;  %v2742_v12 = vunpack.c.l.bf16 %v2812_v8  ;;  %v2743_v13 = vunpack.c.h.bf16 %v2812_v8  ;;  %v2750_v15 = vunpack.c.l.bf16 %v2814_v9  ;;  %v2751_v16 = vunpack.c.h.bf16 %v2814_v9  ;;  %v3084_v26 = vld [vmem:[%s3049_s23 + $0x20] sm:$0xff]   ;;  %vm3175_vm15 = vmand %vm799_vm9, %vm800_vm10  ;;  %s3728_s10 = scalar_lea.vmem %s3780_s6, %s2342_s20  ;;  %s2364_s19 = sshll.u32 %s3808_s25, 1 }
  0x17   : > { %2832 = vmatpush.bf16.msra.mxu1 %v2689_v6  ;;  %2833 = vmatpush.bf16.msra.mxu2 %v2689_v6  ;;  %v2758_v18 = vunpack.c.l.bf16 %v2816_v10  ;;  %v2759_v19 = vunpack.c.h.bf16 %v2816_v10  ;;  %s3810_s12 = smov (!%p2345_p8, %s418_s12), 15  ;;  %v2746_v20 = vunpack.c.l.bf16 %v2813_v17  ;;  %v2747_v21 = vunpack.c.h.bf16 %v2813_v17  ;;  %vm632_vm2 = vmand %vm612_vm0, %vm622_vm1  ;;  %s465_s20 = sadd.s32 %s2364_s19, %s3816_s24 }
  0x18   : > { %2834 = vmatpush.bf16.msra.mxu3 %v2689_v6  ;;  %1195 = vmatpush.bf16.msra.mxu0 %v2689_v6  ;;  %v517_v22 = vmul.f32 %v3054_v7, %v2742_v12  ;;  %v518_v23 = vmul.f32 %v3054_v7, %v2743_v13  ;;  %v521_v24 = vmul.f32 %v3054_v7, %v2750_v15  ;;  %s2350_s18 = sshll.u32 %s3810_s12, 1  ;;  %v2754_v39 = vunpack.c.l.bf16 %v3084_v26  ;;  %v2685_v6 = vld [vmem:[%s3777_s3 + $0xc8] sm:$0xff]  ;;  %s2365_s14 = sshll.u32 %s465_s20, 1 }
  0x19   : > { %v522_v25 = vmul.f32 %v3054_v7, %v2751_v16  ;;  %v525_v27 = vmul.f32 %v3054_v7, %v2758_v18  ;;  %v526_v28 = vmul.f32 %v3054_v7, %v2759_v19  ;;  %v519_v29 = vmul.f32 %v3054_v7, %v2746_v20  ;;  %s425_s22 = sadd.s32 %s2350_s18, %s3024_s15  ;;  %s467_s18 = scalar_lea.vmem %s3781_s7, %s2365_s14 }
  0x1a   : > { %v520_v30 = vmul.f32 %v3054_v7, %v2747_v21  ;;  %v541_v32 = vadd.f32 %v3074_v14, %v517_v22  ;;  %v542_v33 = vadd.f32 %v3074_v14, %v518_v23  ;;  %v545_v34 = vadd.f32 %v3074_v14, %v521_v24  ;;  %s2352_s8 = sshll.u32 %s425_s22, 2 }
  0x1b   : > { %2835 = vmatpush.bf16.msra.mxu1 %v2688_v11  ;;  %2836 = vmatpush.bf16.msra.mxu2 %v2688_v11  ;;  %v546_v36 = vadd.f32 %v3074_v14, %v522_v25  ;;  %v549_v37 = vadd.f32 %v3074_v14, %v525_v27  ;;  %v550_v38 = vadd.f32 %v3074_v14, %v526_v28  ;;  %s427_s13 = scalar_lea.vmem %s3775_s1, %s2352_s8  ;;  %v2684_v25 = vld [vmem:[%s3777_s3 + $0xc0] sm:$0xff] }
  0x1c   : > { %2837 = vmatpush.bf16.msra.mxu3 %v2688_v11  ;;  %1196 = vmatpush.bf16.msra.mxu0 %v2688_v11  ;;  %v561_v40 = vmax.f32 %v541_v32, 0.0  ;;  %v562_v41 = vmax.f32 %v542_v33, 0.0  ;;  %v565_v43 = vmax.f32 %v545_v34, 0.0  ;;  %v543_v44 = vadd.f32 %v3074_v14, %v519_v29  ;;  %v2733_v49 = vld [vmem:[%s427_s13] sm:$0xff]   ;;  %s3323_s13 = sshll.u32 %s3814_s9, 1 }
  0x1d   : > { %v566_v45 = vmax.f32 %v546_v36, 0.0  ;;  %v569_v47 = vmax.f32 %v549_v37, 0.0  ;;  %v570_v48 = vmax.f32 %v550_v38, 0.0  ;;  %v3127_v50 = vadd.f32 %v3074_v14, %v520_v30  ;;  %s442_s17 = sadd.s32 %s3323_s13, %s3024_s15 }
  0x1e   : > { %v581_v52 = vpack.c.bf16 %v561_v40, %v561_v40  ;;  %v582_v53 = vpack.c.bf16 %v562_v41, %v562_v41  ;;  %v585_v54 = vpack.c.bf16 %v565_v43, %v565_v43  ;;  %v2734_v55 = vunpack.c.l.bf16 %v2733_v49  ;;  %v2707_v40 = vld [vmem:[%s3777_s3 + $0x178] sm:$0xff]  ;;  %s2359_s16 = sshll.u32 %s442_s17, 2 }
  0x1f   : > { %2838 = vmatpush.bf16.msra.mxu1 %v2687_v31  ;;  %2839 = vmatpush.bf16.msra.mxu2 %v2687_v31  ;;  %v586_v56 = vpack.c.bf16 %v566_v45, %v566_v45  ;;  %v589_v57 = vpack.c.bf16 %v569_v47, %v569_v47  ;;  %v590_v58 = vpack.c.bf16 %v570_v48, %v570_v48  ;;  %v2735_v60 = vunpack.c.h.bf16 %v2733_v49  ;;  %v2667_v41 = vld [vmem:[%s3777_s3 + $0x38] sm:$0xff]  ;;  %s444_s11 = scalar_lea.vmem %s3776_s2, %s2359_s16 }
  0x20   : > { %2840 = vmatpush.bf16.msra.mxu3 %v2687_v31  ;;  %1197 = vmatpush.bf16.msra.mxu0 %v2687_v31  ;;  %v643_v61 = vsel %vm3110_vm8, %v581_v52, 0  ;;  %v644_v62 = vsel %vm3110_vm8, %v582_v53, 0  ;;  %v647_v63 = vsel %vm3122_vm11, %v585_v54, 0  ;;  %v513_v0 = vmul.f32 %v3054_v7, %v2734_v55  ;;  %v2699_v47 = vld [vmem:[%s3777_s3 + $0x138] sm:$0xff] }
  0x21   : > { %v683_v1 = vunpack.c.l.b16 %v643_v61  ;;  %v684_v3 = vunpack.c.l.b16 %v644_v62  ;;  %v648_v4 = vsel %vm3122_vm11, %v586_v56, 0  ;;  %v687_v5 = vunpack.c.l.b16 %v647_v63  ;;  %v2675_v49 = vld [vmem:[%s3777_s3 + $0x78] sm:$0xff]  ;;  %v2706_v62 = vld [vmem:[%s3777_s3 + $0x170] sm:$0xff] }
  0x22   : > { %v688_v8 = vunpack.c.l.b16 %v648_v4  ;;  %v651_v9 = vsel %vm3136_vm12, %v589_v57, 0  ;;  %v652_v10 = vsel %vm3136_vm12, %v590_v58, 0  ;;  %v514_v11 = vmul.f32 %v3054_v7, %v2735_v60  ;;  %v2666_v63 = vld [vmem:[%s3777_s3 + $0x30] sm:$0xff] }
  0x23   : > { %2841 = vmatpush.bf16.msra.mxu1 %v2686_v51  ;;  %2842 = vmatpush.bf16.msra.mxu2 %v2686_v51  ;;  %v701_v12 = vpack.c.b16 %v684_v3, %v683_v1  ;;  %v691_v13 = vunpack.c.l.b16 %v651_v9  ;;  %v692_v15 = vunpack.c.l.b16 %v652_v10  ;;  %v537_v16 = vadd.f32 %v3074_v14, %v513_v0 }
  0x24   : > { %2843 = vmatpush.bf16.msra.mxu3 %v2686_v51  ;;  %1198 = vmatpush.bf16.msra.mxu0 %v2686_v51  ;;  %v703_v17 = vpack.c.b16 %v688_v8, %v687_v5  ;;  %v538_v18 = vadd.f32 %v3074_v14, %v514_v11  ;;  %v563_v19 = vmax.f32 %v543_v44, 0.0  ;;  %v564_v20 = vmax.f32 %v3127_v50, 0.0  ;;  %v2698_v5 = vld [vmem:[%s3777_s3 + $0x130] sm:$0xff] }
  0x25   : > { %v724_v21 = vshrl.u32 %v701_v12, 16  ;;  %v727_v22 = vshll.u32 %v701_v12, 16  ;;  %v705_v23 = vpack.c.b16 %v692_v15, %v691_v13  ;;  %v557_v24 = vmax.f32 %v537_v16, 0.0 }
  0x26   : > { %v738_v27 = vshrl.u32 %v703_v17, 16  ;;  %v741_v28 = vshll.u32 %v703_v17, 16  ;;  %v558_v29 = vmax.f32 %v538_v18, 0.0  ;;  %v3171_v31 = vpack.c.bf16 %v563_v19, %v563_v19  ;;  %v2665_v19 = vld [vmem:[%s3777_s3 + $0x28] sm:$0xff] }
  0x27   : > { %2844 = vmatpush.bf16.msra.mxu1 %v2685_v6  ;;  %2845 = vmatpush.bf16.msra.mxu2 %v2685_v6  ;;  %v726_v32 = vrot.slane %v724_v21, 7  ;;  %v752_v33 = vshrl.u32 %v705_v23, 16  ;;  %v755_v34 = vshll.u32 %v705_v23, 16  ;;  %v577_v36 = vpack.c.bf16 %v557_v24, %v557_v24  ;;  %v2705_v23 = vld [vmem:[%s3777_s3 + $0x168] sm:$0xff] }
  0x28   : > { %2846 = vmatpush.bf16.msra.mxu3 %v2685_v6  ;;  %1199 = vmatpush.bf16.msra.mxu0 %v2685_v6  ;;  %v740_v38 = vrot.slane %v738_v27, 7  ;;  %v578_v42 = vpack.c.bf16 %v558_v29, %v558_v29  ;;  %v3185_v43 = vpack.c.bf16 %v564_v20, %v564_v20  ;;  %v2674_v6 = vld [vmem:[%s3777_s3 + $0x70] sm:$0xff]  ;;  %v2755_v20 = vunpack.c.h.bf16 %v3084_v26  ;;  %v2673_v29 = vld [vmem:[%s3777_s3 + $0x68] sm:$0xff] }
  0x29   : > { %v729_v44 = vor.u32 %v727_v22, %v726_v32  ;;  %v3190_v45 = vsel %vm3175_vm15, %v726_v32, 0  ;;  %v754_v46 = vrot.slane %v752_v33, 7  ;;  %v639_v48 = vsel %vm3167_vm13, %v577_v36, 0  ;;  %v2817_v33 = vld [vmem:[%s3049_s23 + $0x30] sm:$0xff]  }
  0x2a   : > { %v903_v50 = vshll.u32 %v3190_v45, 16  ;;  %v743_v51 = vor.u32 %v741_v28, %v740_v38  ;;  %v3203_v52 = vsel %vm3175_vm15, %v740_v38, 0  ;;  %v640_v53 = vsel %vm3167_vm13, %v578_v42, 0  ;;  %v2697_v28 = vld [vmem:[%s3777_s3 + $0x128] sm:$0xff] }
  0x2b   : > { %2847 = vmatpush.bf16.msra.mxu1 %v2684_v25  ;;  %2848 = vmatpush.bf16.msra.mxu2 %v2684_v25  ;;  %v3209_v54 = vsel %vm3175_vm15, 0, %v729_v44  ;;  %v927_v55 = vshll.u32 %v3203_v52, 16  ;;  %v757_v56 = vor.u32 %v755_v34, %v754_v46  ;;  %v3214_v57 = vsel %vm3175_vm15, %v754_v46, 0  ;;  %v2704_v44 = vld [vmem:[%s3777_s3 + $0x160] sm:$0xff] }
  0x2c   : > { %2849 = vmatpush.bf16.msra.mxu3 %v2684_v25  ;;  %1200 = vmatpush.bf16.msra.mxu0 %v2684_v25  ;;  %v896_v58 = vshrl.u32 %v3209_v54, 16  ;;  %v898_v59 = vshll.u32 %v3209_v54, 16  ;;  %v905_v60 = vrot.slane %v903_v50, 1  ;;  %v3220_v61 = vsel %vm3175_vm15, 0, %v743_v51 }
  0x2d   : > { %v920_v0 = vshrl.u32 %v3220_v61, 16  ;;  %v922_v1 = vshll.u32 %v3220_v61, 16  ;;  %v929_v3 = vrot.slane %v927_v55, 1  ;;  %v3232_v4 = vsel %vm3175_vm15, 0, %v757_v56  ;;  %v2672_v55 = vld [vmem:[%s3777_s3 + $0x60] sm:$0xff] }
  0x2e   : > { %v900_v8 = vrot.slane %v898_v59, 1  ;;  %v944_v9 = vshrl.u32 %v3232_v4, 16  ;;  %v946_v10 = vshll.u32 %v3232_v4, 16  ;;  %v951_v11 = vshll.u32 %v3214_v57, 16 }
  0x2f   : > { %1291 = vmatpush.bf16.msrb.mxu2 %v2707_v40  ;;  %1242 = vmatpush.bf16.msrb.mxu1 %v2699_v47  ;;  %v924_v12 = vrot.slane %v922_v1, 1  ;;  %v679_v13 = vunpack.c.l.b16 %v639_v48  ;;  %v680_v15 = vunpack.c.l.b16 %v640_v53  ;;  %v645_v24 = vsel %vm632_vm2, %v3171_v31, 0  ;;  %v2663_v1 = vld [vmem:[%s3777_s3 + $0x18] sm:$0xff] }
  0x30   : > { %1484 = vmatpush.bf16.msrb.mxu3 %v2667_v41  ;;  %1533 = vmatpush.bf16.msrb.mxu0 %v2675_v49  ;;  %v901_v16 = vor.u32 %v900_v8, %v896_v58  ;;  %v948_v17 = vrot.slane %v946_v10, 1  ;;  %v953_v18 = vrot.slane %v951_v11, 1  ;;  %v646_v25 = vsel %vm632_vm2, %v3185_v43, 0  ;;  %v2664_v41 = vld [vmem:[%s3777_s3 + $0x20] sm:$0xff] }
  0x31   : > { %v925_v21 = vor.u32 %v924_v12, %v920_v0  ;;  %v699_v22 = vpack.c.b16 %v680_v15, %v679_v13  ;;  %v685_v30 = vunpack.c.l.b16 %v645_v24  ;;  %v686_v32 = vunpack.c.l.b16 %v646_v25  ;;  %v2696_v49 = vld [vmem:[%s3777_s3 + $0x120] sm:$0xff]  ;;  %v2695_v15 = vld [vmem:[%s3777_s3 + $0x118] sm:$0xff]  ;;  %v2693_v0 = vld [vmem:[%s3777_s3 + $0x108] sm:$0xff] }
  0x32   : > { %v3256_v27 = vsel %vm870_vm14, %v901_v16, %v905_v60  ;;  %v949_v35 = vor.u32 %v948_v17, %v944_v9  ;;  %v523_v38 = vmul.f32 %v3054_v7, %v2754_v39  ;;  %v524_v26 = vmul.f32 %v3054_v7, %v2755_v20  ;;  %v2703_v9 = vld [vmem:[%s3777_s3 + $0x158] sm:$0xff]  ;;  %v2737_v24 = vld [vmem:[%s3049_s23] sm:$0xff]  }
  0x33   : > { %1292 = vmatpush.bf16.msrb.mxu2 %v2706_v62  ;;  %1243 = vmatpush.bf16.msrb.mxu1 %v2698_v5  ;;  %v3268_v31 = vsel %vm870_vm14, %v925_v21, %v929_v3  ;;  %v710_v34 = vshrl.u32 %v699_v22, 16  ;;  %v713_v36 = vshll.u32 %v699_v22, 16  ;;  %v702_v42 = vpack.c.b16 %v686_v32, %v685_v30  ;;  %v2671_v30 = vld [vmem:[%s3777_s3 + $0x58] sm:$0xff] }
  0x34   : > { %1485 = vmatpush.bf16.msrb.mxu3 %v2666_v63  ;;  %1534 = vmatpush.bf16.msrb.mxu0 %v2674_v6  ;;  %v3279_v40 = vsel %vm870_vm14, %v949_v35, %v953_v18  ;;  %v604_v39 = vadd.s32 5, %v3020_v2  ;;  %v547_v46 = vadd.f32 %v3074_v14, %v523_v38  ;;  %v2762_v47 = vunpack.c.l.bf16 %v2817_v33  ;;  %v2702_v38 = vld [vmem:[%s3777_s3 + $0x150] sm:$0xff] }
  0x35   : > { %1211 = vmatmul.bf16.vlgmr.msra.gmra.mxu1 %v3256_v27  ;;  %1221 = vmatmul.bf16.vlgmr.msra.gmra.mxu2 %v3268_v31  ;;  %v712_v43 = vrot.slane %v710_v34, 7  ;;  %v2763_v48 = vunpack.c.h.bf16 %v2817_v33  ;;  %v731_v50 = vshrl.u32 %v702_v42, 16  ;;  %v734_v51 = vshll.u32 %v702_v42, 16  ;;  %v2694_v42 = vld [vmem:[%s3777_s3 + $0x110] sm:$0xff] }
  0x36   : > { %1231 = vmatmul.bf16.vlgmr.msra.gmra.mxu3 %v3279_v40  ;;  %v548_v53 = vadd.f32 %v3074_v14, %v524_v26  ;;  %vm614_vm3 = vcmp.ge.s32.totalorder %v604_v39, 0  ;;  %v567_v59 = vmax.f32 %v547_v46, 0.0  ;;  %vm624_vm4 = vcmp.lt.s32.totalorder %v604_v39, 16  ;;  %v2670_v46 = vld [vmem:[%s3777_s3 + $0x50] sm:$0xff] }
  0x37   : > { %1293 = vmatpush.bf16.msrb.mxu2 %v2705_v23  ;;  %1244 = vmatpush.bf16.msrb.mxu1 %v2697_v28  ;;  %v715_v56 = vor.u32 %v713_v36, %v712_v43  ;;  %v3302_v58 = vsel %vm3175_vm15, %v712_v43, 0  ;;  %v733_v62 = vrot.slane %v731_v50, 7  ;;  %vm3307_vm5 = vmand %vm614_vm3, %vm624_vm4  ;;  %v527_v6 = vmul.f32 %v3054_v7, %v2762_v47 }
  0x38   : > { %1486 = vmatpush.bf16.msrb.mxu3 %v2665_v19  ;;  %1535 = vmatpush.bf16.msrb.mxu0 %v2673_v29  ;;  %v879_v60 = vshll.u32 %v3302_v58, 16  ;;  %v568_v63 = vmax.f32 %v548_v53, 0.0  ;;  %v587_v5 = vpack.c.bf16 %v567_v59, %v567_v59  ;;  %v528_v8 = vmul.f32 %v3054_v7, %v2763_v48 }
  0x39   : > { %v3316_v3 = vsel %vm3175_vm15, 0, %v715_v56  ;;  %v736_v13 = vor.u32 %v734_v51, %v733_v62  ;;  %v3334_v16 = vsel %vm3175_vm15, %v733_v62, 0  ;;  %v551_v19 = vadd.f32 %v3074_v14, %v527_v6  ;;  %v2661_v51 = vld [vmem:[%s3777_s3 + $0x8] sm:$0xff] }
  0x3a   : > { %v872_v10 = vshrl.u32 %v3316_v3, 16  ;;  %v874_v11 = vshll.u32 %v3316_v3, 16  ;;  %v881_v12 = vrot.slane %v879_v60, 1  ;;  %v588_v17 = vpack.c.bf16 %v568_v63, %v568_v63  ;;  %v2701_v56 = vld [vmem:[%s3777_s3 + $0x148] sm:$0xff] }
  0x3b   : > { %1294 = vmatpush.bf16.msrb.mxu2 %v2704_v44  ;;  %1245 = vmatpush.bf16.msrb.mxu1 %v2696_v49  ;;  %v649_v18 = vsel %vm3307_vm5, %v587_v5, 0  ;;  %v3341_v21 = vsel %vm3175_vm15, 0, %v736_v13  ;;  %v915_v22 = vshll.u32 %v3334_v16, 16  ;;  %v552_v29 = vadd.f32 %v3074_v14, %v528_v8 }
  0x3c   : > { %1487 = vmatpush.bf16.msrb.mxu3 %v2664_v41  ;;  %1536 = vmatpush.bf16.msrb.mxu0 %v2672_v55  ;;  %v876_v20 = vrot.slane %v874_v11, 1  ;;  %v689_v23 = vunpack.c.l.b16 %v649_v18  ;;  %v908_v25 = vshrl.u32 %v3341_v21, 16  ;;  %v910_v35 = vshll.u32 %v3341_v21, 16  ;;  %v2662_v41 = vld [vmem:[%s3777_s3 + $0x10] sm:$0xff]  ;;  %v2700_v18 = vld [vmem:[%s3777_s3 + $0x140] sm:$0xff] }
  0x3d   : > { %v650_v28 = vsel %vm3307_vm5, %v588_v17, 0  ;;  %v917_v33 = vrot.slane %v915_v22, 1  ;;  %v571_v36 = vmax.f32 %v551_v19, 0.0  ;;  %v572_v39 = vmax.f32 %v552_v29, 0.0 }
  0x3e   : > { %v877_v32 = vor.u32 %v876_v20, %v872_v10  ;;  %v690_v34 = vunpack.c.l.b16 %v650_v28  ;;  %v912_v26 = vrot.slane %v910_v35, 1  ;;  %v606_v43 = vadd.s32 7, %v3020_v2 }
  0x3f   : > { %1295 = vmatpush.bf16.msrb.mxu2 %v2703_v9  ;;  %1246 = vmatpush.bf16.msrb.mxu1 %v2695_v15  ;;  %v2738_v44 = vunpack.c.l.bf16 %v2737_v24  ;;  %v591_v49 = vpack.c.bf16 %v571_v36, %v571_v36  ;;  %v2739_v50 = vunpack.c.h.bf16 %v2737_v24  ;;  %v592_v55 = vpack.c.bf16 %v572_v39, %v572_v39  ;;  %v2669_v9 = vld [vmem:[%s3777_s3 + $0x48] sm:$0xff]  ;;  %v2660_v15 = vld [vmem:[%s3777_s3] sm:$0xff] }
  0x40   : > { %1488 = vmatpush.bf16.msrb.mxu3 %v2663_v1  ;;  %1537 = vmatpush.bf16.msrb.mxu0 %v2671_v30  ;;  %v882_v47 = vsel %vm870_vm14, %v877_v32, %v881_v12  ;;  %v704_v48 = vpack.c.b16 %v690_v34, %v689_v23  ;;  %v913_v53 = vor.u32 %v912_v26, %v908_v25  ;;  %vm616_vm6 = vcmp.ge.s32.totalorder %v606_v43, 0  ;;  %v2692_v24 = vld [vmem:[%s3777_s3 + $0x100] sm:$0xff]  ;;  %v2715_v25 = vld [vmem:[%s3777_s3 + $0x1b8] sm:$0xff] }
  0x41   : > { %1201 = vmatmul.bf16.vlgmr.msra.gmra.mxu0 %v882_v47  ;;  %vm626_vm7 = vcmp.lt.s32.totalorder %v606_v43, 16  ;;  %v515_v62 = vmul.f32 %v3054_v7, %v2738_v44  ;;  %v516_v63 = vmul.f32 %v3054_v7, %v2739_v50  ;;  %v600_v8 = vadd.s32 1, %v3020_v2  ;;  %v2668_v30 = vld [vmem:[%s3777_s3 + $0x40] sm:$0xff]  ;;  %v2723_v32 = vld [vmem:[%s3777_s3 + $0x1f8] sm:$0xff] }
  0x42   : > { %v745_v59 = vshrl.u32 %v704_v48, 16  ;;  %v748_v60 = vshll.u32 %v704_v48, 16  ;;  %vm636_vm8 = vmand %vm616_vm6, %vm626_vm7  ;;  %v3379_v1 = vsel %vm870_vm14, %v913_v53, %v917_v33 }
  0x43   : > { %1296 = vmatpush.bf16.msrb.mxu2 %v2702_v38  ;;  %1247 = vmatpush.bf16.msrb.mxu1 %v2694_v42  ;;  %v653_v5 = vsel %vm636_vm8, %v591_v49, 0  ;;  %v654_v6 = vsel %vm636_vm8, %v592_v55, 0  ;;  %v539_v13 = vadd.f32 %v3074_v14, %v515_v62  ;;  %v540_v17 = vadd.f32 %v3074_v14, %v516_v63  ;;  %v2731_v62 = vld [vmem:[%s3777_s3 + $0x238] sm:$0xff] }
  0x44   : > { %1489 = vmatpush.bf16.msrb.mxu3 %v2662_v41  ;;  %1538 = vmatpush.bf16.msrb.mxu0 %v2670_v46  ;;  %v747_v10 = vrot.slane %v745_v59, 7  ;;  %v693_v11 = vunpack.c.l.b16 %v653_v5  ;;  %v694_v12 = vunpack.c.l.b16 %v654_v6  ;;  %vm610_vm10 = vcmp.ge.s32.totalorder %v600_v8, 0 }
  0x45   : > { %1216 = vmatmul.bf16.gmra.mxu1 %v3379_v1  ;;  %vm620_vm11 = vcmp.lt.s32.totalorder %v600_v8, 16  ;;  %v559_v23 = vmax.f32 %v539_v13, 0.0  ;;  %v560_v28 = vmax.f32 %v540_v17, 0.0 }
  0x46   : > { %v750_v19 = vor.u32 %v748_v60, %v747_v10  ;;  %v3396_v20 = vsel %vm3175_vm15, %v747_v10, 0  ;;  %v706_v22 = vpack.c.b16 %v694_v12, %v693_v11  ;;  %vm3405_vm12 = vmand %vm610_vm10, %vm620_vm11  ;;  %v2683_v60 = vld [vmem:[%s3777_s3 + $0xb8] sm:$0xff] }
  0x47   : > { %1297 = vmatpush.bf16.msrb.mxu2 %v2701_v56  ;;  %1248 = vmatpush.bf16.msrb.mxu1 %v2693_v0  ;;  %v939_v35 = vshll.u32 %v3396_v20, 16  ;;  %v579_v38 = vpack.c.bf16 %v559_v23, %v559_v23  ;;  %v580_v26 = vpack.c.bf16 %v560_v28, %v560_v28  ;;  %v2722_v23 = vld [vmem:[%s3777_s3 + $0x1f0] sm:$0xff] }
  0x48   : > { %1490 = vmatpush.bf16.msrb.mxu3 %v2661_v51  ;;  %1539 = vmatpush.bf16.msrb.mxu0 %v2669_v9  ;;  %v3417_v33 = vsel %vm3175_vm15, 0, %v750_v19  ;;  %v759_v34 = vshrl.u32 %v706_v22, 16  ;;  %v762_v36 = vshll.u32 %v706_v22, 16  ;;  %v2714_v22 = vld [vmem:[%s3777_s3 + $0x1b0] sm:$0xff] }
  0x49   : > { %v932_v41 = vshrl.u32 %v3417_v33, 16  ;;  %v934_v42 = vshll.u32 %v3417_v33, 16  ;;  %v641_v43 = vsel %vm3405_vm12, %v579_v38, 0  ;;  %v941_v46 = vrot.slane %v939_v35, 1  ;;  %v2721_v38 = vld [vmem:[%s3777_s3 + $0x1e8] sm:$0xff] }
  0x4a   : > { %v761_v39 = vrot.slane %v759_v34, 7  ;;  %v642_v47 = vsel %vm3405_vm12, %v580_v26, 0  ;;  %v681_v48 = vunpack.c.l.b16 %v641_v43  ;;  %v2730_v34 = vld [vmem:[%s3777_s3 + $0x230] sm:$0xff]  ;;  %v2712_v26 = vld [vmem:[%s3777_s3 + $0x1a0] sm:$0xff] }
  0x4b   : > { %1298 = vmatpush.bf16.msrb.mxu2 %v2700_v18  ;;  %1249 = vmatpush.bf16.msrb.mxu1 %v2692_v24  ;;  %v936_v44 = vrot.slane %v934_v42, 1  ;;  %v682_v51 = vunpack.c.l.b16 %v642_v47  ;;  %v2729_v42 = vld [vmem:[%s3777_s3 + $0x228] sm:$0xff]  ;;  %v2728_v43 = vld [vmem:[%s3777_s3 + $0x220] sm:$0xff]  ;;  %v2679_v47 = vld [vmem:[%s3777_s3 + $0x98] sm:$0xff] }
  0x4c   : > { %1491 = vmatpush.bf16.msrb.mxu3 %v2660_v15  ;;  %1540 = vmatpush.bf16.msrb.mxu0 %v2668_v30  ;;  %v764_v49 = vor.u32 %v762_v36, %v761_v39  ;;  %v3427_v50 = vsel %vm3175_vm15, %v761_v39, 0  ;;  %v2713_v36 = vld [vmem:[%s3777_s3 + $0x1a8] sm:$0xff]  ;;  %v2680_v39 = vld [vmem:[%s3777_s3 + $0xa0] sm:$0xff] }
  0x4d   : > { %v937_v53 = vor.u32 %v936_v44, %v932_v41  ;;  %v963_v55 = vshll.u32 %v3427_v50, 16  ;;  %v700_v59 = vpack.c.b16 %v682_v51, %v681_v48  ;;  %v2681_v41 = vld [vmem:[%s3777_s3 + $0xa8] sm:$0xff]  ;;  %v2711_v44 = vld [vmem:[%s3777_s3 + $0x198] sm:$0xff] }
  0x4e   : > { %v3432_v56 = vsel %vm3175_vm15, 0, %v764_v49  ;;  %v2727_v48 = vld [vmem:[%s3777_s3 + $0x218] sm:$0xff] }
  0x4f   : > { %1884 = vmatpush.bf16.msra.mxu2 %v2715_v25  ;;  %v3441_v63 = vsel %vm870_vm14, %v937_v53, %v941_v46  ;;  %v956_v0 = vshrl.u32 %v3432_v56, 16  ;;  %v958_v5 = vshll.u32 %v3432_v56, 16  ;;  %v717_v6 = vshrl.u32 %v700_v59, 16  ;;  %1582 = vmatpush.bf16.msra.mxu1 %v2683_v60  ;;  %v2818_v46 = vld [vmem:[%s3049_s23 + $0x38] sm:$0xff]  }
  0x50   : > { %1933 = vmatpush.bf16.msra.mxu3 %v2723_v32  ;;  %1226 = vmatmul.bf16.gmra.mxu2 %v3441_v63  ;;  %v720_v8 = vshll.u32 %v700_v59, 16  ;;  %v965_v10 = vrot.slane %v963_v55, 1  ;;  %v2682_v32 = vld [vmem:[%s3777_s3 + $0xb0] sm:$0xff]  ;;  %v2766_v49 = vunpack.c.l.bf16 %v2818_v46  ;;  %v2767_v51 = vunpack.c.h.bf16 %v2818_v46 }
  0x51   : > { %v960_v9 = vrot.slane %v958_v5, 1  ;;  %1982 = vmatpush.bf16.msra.mxu0 %v2731_v62  ;;  %v719_v11 = vrot.slane %v717_v6, 7  ;;  %v2710_v5 = vld [vmem:[%s3777_s3 + $0x190] sm:$0xff] }
  0x52   : > { %v529_v53 = vmul.f32 %v3054_v7, %v2766_v49  ;;  %v530_v55 = vmul.f32 %v3054_v7, %v2767_v51  ;;  %v2718_v6 = vld [vmem:[%s3777_s3 + $0x1d0] sm:$0xff] }
  0x53   : > { %v961_v12 = vor.u32 %v960_v9, %v956_v0  ;;  %v722_v13 = vor.u32 %v720_v8, %v719_v11  ;;  %v3448_v15 = vsel %vm3175_vm15, %v719_v11, 0  ;;  %1885 = vmatpush.bf16.msra.mxu2 %v2714_v22  ;;  %1583 = vmatpush.bf16.msra.mxu1 %v2682_v32  ;;  %v607_v0 = vadd.s32 8, %v3020_v2  ;;  %v2678_v22 = vld [vmem:[%s3777_s3 + $0x90] sm:$0xff] }
  0x54   : > { %v891_v18 = vshll.u32 %v3448_v15, 16  ;;  %1934 = vmatpush.bf16.msra.mxu3 %v2722_v23  ;;  %v554_v59 = vadd.f32 %v3074_v14, %v530_v55  ;;  %v2726_v23 = vld [vmem:[%s3777_s3 + $0x210] sm:$0xff] }
  0x55   : > { %v3451_v17 = vsel %vm870_vm14, %v961_v12, %v965_v10  ;;  %v3457_v19 = vsel %vm3175_vm15, 0, %v722_v13  ;;  %1983 = vmatpush.bf16.msra.mxu0 %v2730_v34  ;;  %vm617_vm13 = vcmp.ge.s32.totalorder %v607_v0, 0  ;;  %vm627_vm0 = vcmp.lt.s32.totalorder %v607_v0, 16 }
  0x56   : > { %1236 = vmatmul.bf16.gmra.mxu3 %v3451_v17  ;;  %v884_v24 = vshrl.u32 %v3457_v19, 16  ;;  %v886_v25 = vshll.u32 %v3457_v19, 16  ;;  %v893_v28 = vrot.slane %v891_v18, 1  ;;  %v574_v62 = vmax.f32 %v554_v59, 0.0  ;;  %vm637_vm1 = vmand %vm617_vm13, %vm627_vm0  ;;  %v2769_v18 = vld [vmem:[%s444_s11] sm:$0xff]  }
  0x57   : > { %1886 = vmatpush.bf16.msra.mxu2 %v2713_v36  ;;  %1584 = vmatpush.bf16.msra.mxu1 %v2681_v41 }
  0x58   : > { %v888_v35 = vrot.slane %v886_v25, 1  ;;  %1935 = vmatpush.bf16.msra.mxu3 %v2721_v38  ;;  %v594_v9 = vpack.c.bf16 %v574_v62, %v574_v62  ;;  %v2770_v25 = vunpack.c.l.bf16 %v2769_v18  ;;  %v608_v38 = vadd.s32 9, %v3020_v2 }
  0x59   : > { %1984 = vmatpush.bf16.msra.mxu0 %v2729_v42 }
  0x5a   : > { %v889_v29 = vor.u32 %v888_v35, %v884_v24  ;;  %v656_v11 = vsel %vm637_vm1, %v594_v9, 0  ;;  %v2771_v35 = vunpack.c.h.bf16 %v2769_v18  ;;  %vm618_vm2 = vcmp.ge.s32.totalorder %v608_v38, 0  ;;  %v2708_v9 = vld [vmem:[%s3777_s3 + $0x180] sm:$0xff] }
  0x5b   : > { %1887 = vmatpush.bf16.msra.mxu2 %v2712_v26  ;;  %1585 = vmatpush.bf16.msra.mxu1 %v2680_v39  ;;  %v696_v13 = vunpack.c.l.b16 %v656_v11  ;;  %v2709_v26 = vld [vmem:[%s3777_s3 + $0x188] sm:$0xff]  ;;  %vm628_vm3 = vcmp.lt.s32.totalorder %v608_v38, 16 }
  0x5c   : > { %v894_v30 = vsel %vm870_vm14, %v889_v29, %v893_v28  ;;  %v531_v28 = vmul.f32 %v3054_v7, %v2770_v25  ;;  %v532_v29 = vmul.f32 %v3054_v7, %v2771_v35  ;;  %v2717_v7 = vld [vmem:[%s3777_s3 + $0x1c8] sm:$0xff]  ;;  %vm638_vm4 = vmand %vm618_vm2, %vm628_vm3 }
  0x5d   : > { %1206 = vmatmul.bf16.gmra.mxu0 %v894_v30  ;;  %1250 = vmatmul.bf16.vlgmr.msrb.gmra.mxu1 %v894_v30 }
  0x5e   : > { %1985 = vmatpush.bf16.msra.mxu0 %v2728_v43  ;;  %v555_v30 = vadd.f32 %v3074_v14, %v531_v28  ;;  %v556_v32 = vadd.f32 %v3074_v14, %v532_v29 }
  0x5f   : > { %1888 = vmatpush.bf16.msra.mxu2 %v2711_v44  ;;  %1586 = vmatpush.bf16.msra.mxu1 %v2679_v47  ;;  %v2677_v47 = vld [vmem:[%s3777_s3 + $0x88] sm:$0xff] }
  0x60   : > { %1299 = vmatmul.bf16.vlgmr.msrb.gmra.mxu2 %v3256_v27  ;;  %v575_v34 = vmax.f32 %v555_v30, 0.0  ;;  %v576_v36 = vmax.f32 %v556_v32, 0.0 }
  0x62   : > { %1986 = vmatpush.bf16.msra.mxu0 %v2727_v48  ;;  %v596_v39 = vpack.c.bf16 %v576_v36, %v576_v36  ;;  %v2725_v48 = vld [vmem:[%s3777_s3 + $0x208] sm:$0xff] }
  0x63   : > { %1889 = vmatpush.bf16.msra.mxu2 %v2710_v5  ;;  %1587 = vmatpush.bf16.msra.mxu1 %v2678_v22 }
  0x66   : > { %1492 = vmatmul.bf16.vlgmr.msrb.gmra.mxu3 %v3316_v3  ;;  %1987 = vmatpush.bf16.msra.mxu0 %v2726_v23 }
  0x67   : > { %1890 = vmatpush.bf16.msra.mxu2 %v2709_v26  ;;  %1588 = vmatpush.bf16.msra.mxu1 %v2677_v47  ;;  %v1656_v47 = vrot.slane %v3448_v15, 1 }
  0x6a   : > { %1988 = vmatpush.bf16.msra.mxu0 %v2725_v48 }
  0x6b   : > { %1891 = vmatpush.bf16.msra.mxu2 %v2708_v9 }
  0x6d   : > { %1541 = vmatmul.bf16.vlgmr.msrb.gmra.mxu0 %v3457_v19  ;;  %1255 = vmatmul.bf16.gmra.mxu1 %v3256_v27  ;;  %v2720_v27 = vld [vmem:[%s3777_s3 + $0x1e0] sm:$0xff] }
  0x6e   : > { %1936 = vmatpush.bf16.msra.mxu3 %v2720_v27  ;;  %v595_v27 = vpack.c.bf16 %v575_v34, %v575_v34 }
  0x70   : > { %1304 = vmatmul.bf16.gmra.mxu2 %v3379_v1  ;;  %v657_v2 = vsel %vm638_vm4, %v595_v27, 0 }
  0x71   : > { %v697_v44 = vunpack.c.l.b16 %v657_v2 }
  0x76   : > { %1497 = vmatmul.bf16.gmra.mxu3 %v3457_v19 }
  0x7d   : > { %1546 = vmatmul.bf16.gmra.mxu0 %v3209_v54  ;;  %1260 = vmatmul.bf16.gmra.mxu1 %v3379_v1  ;;  %v2719_v1 = vld [vmem:[%s3777_s3 + $0x1d8] sm:$0xff] }
  0x7e   : > { %1937 = vmatpush.bf16.msra.mxu3 %v2719_v1 }
  0x80   : > { %1309 = vmatmul.bf16.gmra.mxu2 %v3268_v31 }
  0x82   : > { %1938 = vmatpush.bf16.msra.mxu3 %v2718_v6 }
  0x86   : > { %1502 = vmatmul.bf16.gmra.mxu3 %v3209_v54 }
  0x87   : > { %1939 = vmatpush.bf16.msra.mxu3 %v2717_v7  ;;  %v1653_v7 = vrot.slane %v3302_v58, 1  ;;  %v1655_v58 = vrot.slane %v3457_v19, 1 }
  0x8d   : > { %1551 = vmatmul.bf16.gmra.mxu0 %v3341_v21  ;;  %1265 = vmatmul.bf16.gmra.mxu1 %v3268_v31  ;;  %v553_v31 = vadd.f32 %v3074_v14, %v529_v53  ;;  %v658_v14 = vsel %vm638_vm4, %v596_v39, 0  ;;  %v1652_v39 = vrot.slane %v3316_v3, 1 }
  0x8e   : > { %v698_v1 = vunpack.c.l.b16 %v658_v14 }
  0x8f   : > { %v573_v60 = vmax.f32 %v553_v31, 0.0 }
  0x90   : > { %1314 = vmatmul.bf16.gmra.mxu2 %v3441_v63  ;;  %v708_v49 = vpack.c.b16 %v698_v1, %v697_v44 }
  0x91   : > { %v593_v8 = vpack.c.bf16 %v573_v60, %v573_v60 }
  0x92   : > { %v773_v53 = vshrl.u32 %v708_v49, 16  ;;  %v776_v0 = vshll.u32 %v708_v49, 16 }
  0x93   : > { %v655_v10 = vsel %vm637_vm1, %v593_v8, 0 }
  0x94   : > { %v695_v12 = vunpack.c.l.b16 %v655_v10  ;;  %v775_v62 = vrot.slane %v773_v53, 7  ;;  %v2716_v10 = vld [vmem:[%s3777_s3 + $0x1c0] sm:$0xff] }
  0x95   : > { %1940 = vmatpush.bf16.msra.mxu3 %v2716_v10 }
  0x96   : > { %1507 = vmatmul.bf16.gmra.mxu3 %v3341_v21  ;;  %v707_v24 = vpack.c.b16 %v696_v13, %v695_v12  ;;  %v778_v8 = vor.u32 %v776_v0, %v775_v62  ;;  %v3606_v23 = vsel %vm3175_vm15, %v775_v62, 0  ;;  %v1659_v62 = vrot.slane %v3190_v45, 1 }
  0x97   : > { %v987_v29 = vshll.u32 %v3606_v23, 16 }
  0x98   : > { %v769_v42 = vshll.u32 %v707_v24, 16  ;;  %v3599_v13 = vsel %vm3175_vm15, 0, %v778_v8 }
  0x99   : > { %v982_v22 = vshll.u32 %v3599_v13, 16  ;;  %v980_v35 = vshrl.u32 %v3599_v13, 16  ;;  %v989_v34 = vrot.slane %v987_v29, 1 }
  0x9b   : > { %v984_v28 = vrot.slane %v982_v22, 1 }
  0x9d   : > { %1556 = vmatmul.bf16.gmra.mxu0 %v3220_v61  ;;  %1270 = vmatmul.bf16.gmra.mxu1 %v3441_v63  ;;  %v766_v63 = vshrl.u32 %v707_v24, 16  ;;  %v2676_v24 = vld [vmem:[%s3777_s3 + $0x80] sm:$0xff]  ;;  %v985_v32 = vor.u32 %v984_v28, %v980_v35 }
  0x9e   : > { %1589 = vmatpush.bf16.msra.mxu1 %v2676_v24 }
  0x9f   : > { %v768_v41 = vrot.slane %v766_v63, 7  ;;  %v990_v36 = vsel %vm870_vm14, %v985_v32, %v989_v34  ;;  %v1662_v32 = vrot.slane %v3334_v16, 1 }
  0xa0   : > { %1319 = vmatmul.bf16.gmra.mxu2 %v3279_v40 }
  0xa1   : > { %v771_v43 = vor.u32 %v769_v42, %v768_v41 }
  0xa3   : > { %v3567_v46 = vsel %vm3175_vm15, 0, %v771_v43 }
  0xa4   : > { %v970_v51 = vshll.u32 %v3567_v46, 16  ;;  %v968_v31 = vshrl.u32 %v3567_v46, 16 }
  0xa6   : > { %1512 = vmatmul.bf16.gmra.mxu3 %v3220_v61  ;;  %v972_v59 = vrot.slane %v970_v51, 1 }
  0xa8   : > { %v973_v5 = vor.u32 %v972_v59, %v968_v31 }
  0xad   : > { %1561 = vmatmul.bf16.gmra.mxu0 %v3417_v33  ;;  %1275 = vmatmul.bf16.gmra.mxu1 %v3279_v40  ;;  %v3579_v40 = vsel %vm3175_vm15, %v768_v41, 0 }
  0xae   : > { %v975_v60 = vshll.u32 %v3579_v40, 16 }
  0xb0   : > { %1324 = vmatmul.bf16.gmra.mxu2 %v3451_v17  ;;  %v977_v6 = vrot.slane %v975_v60, 1  ;;  %v1658_v60 = vrot.slane %v3209_v54, 1 }
  0xb2   : > { %v3581_v55 = vpop.f32.mrf.mxu1  ;;  %v978_v11 = vsel %vm870_vm14, %v973_v5, %v977_v6  ;;  %vm1651_vm14 = vcmask 1046528  }
  0xb3   : > { %v1654_v1 = vsel %vm1651_vm14, %v1652_v39, %v1653_v7  ;;  %v1657_v49 = vsel %vm1651_vm14, %v1655_v58, %v1656_v47  ;;  %v1660_v19 = vsel %vm1651_vm14, %v1658_v60, %v1659_v62 }
  0xb6   : > { %1517 = vmatmul.bf16.gmra.mxu3 %v3417_v33 }
  0xb8   : > { %v3601_v18 = vpop.f32.mrf.mxu2 }
  0xb9   : > { %v3614_v25 = vpop.f32.mrf.mxu3 }
  0xba   : > { %v3595_v12 = vpop.f32.mrf.mxu1 }
  0xbd   : > { %1566 = vmatmul.bf16.gmra.mxu0 %v3232_v4  ;;  %1280 = vmatmul.bf16.gmra.mxu1 %v3451_v17  ;;  %v2724_v17 = vld [vmem:[%s3777_s3 + $0x200] sm:$0xff] }
  0xbe   : > { %1989 = vmatpush.bf16.msra.mxu0 %v2724_v17  ;;  %v1202_v37 = vpop.f32.mrf.mxu0 }
  0xc0   : > { %1329 = vmatmul.bf16.gmra.mxu2 %v978_v11  ;;  %v3621_v30 = vpop.f32.mrf.mxu2 }
  0xc1   : > { %v3625_v38 = vpop.f32.mrf.mxu3 }
  0xc2   : > { %v3619_v63 = vpop.f32.mrf.mxu1 }
  0xc6   : > { %1522 = vmatmul.bf16.gmra.mxu3 %v3232_v4  ;;  %v1204_v41 = vpop.f32.mrf.mxu0 }
  0xca   : > { %v3627_v42 = vpop.f32.mrf.mxu1 }
  0xcd   : > { %1571 = vmatmul.bf16.gmra.mxu0 %v3432_v56  ;;  %1285 = vmatmul.bf16.gmra.mxu1 %v978_v11 }
  0xd0   : > { %1334 = vmatmul.bf16.gmra.mxu2 %v990_v36 }
  0xd3   : > { %v3629_v26 = vpop.f32.mrf.mxu2 }
  0xd6   : > { %1527 = vmatmul.bf16.gmra.mxu3 %v3432_v56 }
  0xd9   : > { %v3633_v27 = vpop.f32.mrf.mxu3 }
  0xda   : > { %v1207_v2 = vpop.f32.mrf.mxu0  ;;  %v1251_v43 = vpop.f32.mrf.mxu1 }
  0xdb   : > { %v3636_v14 = vpop.f32.mrf.mxu2  ;;  %v1252_v44 = vadd.f32 %v1251_v43, %v1202_v37  ;;  %v1661_v37 = vrot.slane %v3341_v21, 1 }
  0xdd   : > { %1576 = vmatmul.bf16.gmra.mxu0 %v3567_v46  ;;  %1590 = vmatmul.bf16.vlgmr.msra.gmra.mxu1 %v3209_v54  ;;  %v1663_v7 = vsel %vm1651_vm14, %v1661_v37, %v1662_v32 }
  0xe0   : > { %1892 = vmatmul.bf16.vlgmr.msra.gmra.mxu2 %v1654_v1 }
  0xe1   : > { %v3643_v48 = vpop.f32.mrf.mxu3 }
  0xe2   : > { %v1209_v3 = vpop.f32.mrf.mxu0  ;;  %v1253_v31 = vpop.f32.mrf.mxu1 }
  0xe3   : > { %v1300_v51 = vpop.f32.mrf.mxu2  ;;  %v1254_v59 = vadd.f32 %v1253_v31, %v1204_v41  ;;  %v1665_v31 = vrot.slane %v3203_v52, 1 }
  0xe4   : > { %v1301_v53 = vadd.f32 %v1300_v51, %v1252_v44 }
  0xe6   : > { %1941 = vmatmul.bf16.vlgmr.msra.gmra.mxu3 %v1657_v49 }
  0xe9   : > { %v1493_v0 = vpop.f32.mrf.mxu3 }
  0xea   : > { %v1494_v5 = vadd.f32 %v1493_v0, %v1301_v53  ;;  %v1542_v15 = vpop.f32.mrf.mxu0  ;;  %v1256_v9 = vpop.f32.mrf.mxu1  ;;  %v1664_v53 = vrot.slane %v3220_v61, 1 }
  0xeb   : > { %v1302_v6 = vpop.f32.mrf.mxu2  ;;  %v1257_v11 = vadd.f32 %v1256_v9, %v1207_v2 }
  0xec   : > { %v1303_v8 = vadd.f32 %v1302_v6, %v1254_v59  ;;  %v3649_v10 = vadd.f32 %v1542_v15, %v1494_v5  ;;  %v1666_v5 = vsel %vm1651_vm14, %v1664_v53, %v1665_v31 }
  0xed   : > { %1990 = vmatmul.bf16.vlgmr.msra.gmra.mxu0 %v1660_v19  ;;  %1595 = vmatmul.bf16.gmra.mxu1 %v3341_v21 }
  0xf0   : > { %1897 = vmatmul.bf16.gmra.mxu2 %v1657_v49 }
  0xf1   : > { %v1495_v22 = vpop.f32.mrf.mxu3 }
  0xf2   : > { %v1496_v24 = vadd.f32 %v1495_v22, %v1303_v8  ;;  %v1544_v54 = vpop.f32.mrf.mxu0  ;;  %v1258_v35 = vpop.f32.mrf.mxu1 }
  0xf3   : > { %v1305_v17 = vpop.f32.mrf.mxu2  ;;  %v1259_v29 = vadd.f32 %v1258_v35, %v1209_v3 }
  0xf4   : > { %v1306_v45 = vadd.f32 %v1305_v17, %v1257_v11  ;;  %v3652_v28 = vadd.f32 %v1544_v54, %v1496_v24  ;;  %v1667_v17 = vrot.slane %v3417_v33, 1 }
  0xf6   : > { %1946 = vmatmul.bf16.gmra.mxu3 %v1660_v19 }
  0xf9   : > { %v1498_v34 = vpop.f32.mrf.mxu3 }
  0xfa   : > { %v1499_v36 = vadd.f32 %v1498_v34, %v1306_v45  ;;  %v1547_v41 = vpop.f32.mrf.mxu0  ;;  %v1261_v43 = vpop.f32.mrf.mxu1  ;;  %v1668_v45 = vrot.slane %v3396_v20, 1 }
  0xfb   : > { %v1307_v39 = vpop.f32.mrf.mxu2  ;;  %v1262_v21 = vadd.f32 %v1261_v43, %v3581_v55 }
  0xfc   : > { %v1308_v2 = vadd.f32 %v1307_v39, %v1259_v29  ;;  %v3657_v44 = vadd.f32 %v1547_v41, %v1499_v36  ;;  %v1669_v32 = vsel %vm1651_vm14, %v1667_v17, %v1668_v45 }
  0xfd   : > { %1995 = vmatmul.bf16.gmra.mxu0 %v1663_v7  ;;  %1600 = vmatmul.bf16.gmra.mxu1 %v3220_v61 }
 0x100   : > { %1902 = vmatmul.bf16.gmra.mxu2 %v1660_v19 }
 0x101   : > { %v1500_v1 = vpop.f32.mrf.mxu3 }
 0x102   : > { %v1501_v47 = vadd.f32 %v1500_v1, %v1308_v2  ;;  %v1549_v58 = vpop.f32.mrf.mxu0  ;;  %v1263_v49 = vpop.f32.mrf.mxu1 }
 0x103   : > { %v1310_v16 = vpop.f32.mrf.mxu2  ;;  %v1264_v62 = vadd.f32 %v1263_v49, %v3595_v12 }
 0x104   : > { %v1311_v3 = vadd.f32 %v1310_v16, %v1262_v21  ;;  %v3661_v51 = vadd.f32 %v1549_v58, %v1501_v47  ;;  %v1670_v47 = vrot.slane %v3232_v4, 1  ;;  %v1671_v21 = vrot.slane %v3214_v57, 1 }
 0x106   : > { %1951 = vmatmul.bf16.gmra.mxu3 %v1663_v7  ;;  %v1672_v53 = vsel %vm1651_vm14, %v1670_v47, %v1671_v21 }
 0x109   : > { %v1503_v59 = vpop.f32.mrf.mxu3 }
 0x10a   : > { %v1504_v60 = vadd.f32 %v1503_v59, %v1311_v3  ;;  %v1552_v0 = vpop.f32.mrf.mxu0  ;;  %v1266_v19 = vpop.f32.mrf.mxu1 }
 0x10b   : > { %v1312_v15 = vpop.f32.mrf.mxu2  ;;  %v1267_v52 = vadd.f32 %v1266_v19, %v3619_v63  ;;  %v1673_v19 = vrot.slane %v3432_v56, 1 }
 0x10c   : > { %v1313_v55 = vadd.f32 %v1312_v15, %v1264_v62  ;;  %v3667_v6 = vadd.f32 %v1552_v0, %v1504_v60 }
 0x10d   : > { %2000 = vmatmul.bf16.gmra.mxu0 %v1666_v5  ;;  %1605 = vmatmul.bf16.gmra.mxu1 %v3417_v33 }
 0x110   : > { %1907 = vmatmul.bf16.gmra.mxu2 %v1663_v7 }
 0x111   : > { %v1505_v8 = vpop.f32.mrf.mxu3 }
 0x112   : > { %v1506_v61 = vadd.f32 %v1505_v8, %v1313_v55  ;;  %v1554_v9 = vpop.f32.mrf.mxu0  ;;  %v1268_v12 = vpop.f32.mrf.mxu1  ;;  %v1674_v8 = vrot.slane %v3427_v50, 1 }
 0x113   : > { %v1315_v11 = vpop.f32.mrf.mxu2  ;;  %v1269_v54 = vadd.f32 %v1268_v12, %v3627_v42 }
 0x114   : > { %v1316_v22 = vadd.f32 %v1315_v11, %v1267_v52  ;;  %v3671_v24 = vadd.f32 %v1554_v9, %v1506_v61 }
 0x116   : > { %1956 = vmatmul.bf16.gmra.mxu3 %v1666_v5 }
 0x119   : > { %v1508_v35 = vpop.f32.mrf.mxu3 }
 0x11a   : > { %v1509_v29 = vadd.f32 %v1508_v35, %v1316_v22  ;;  %v1557_v37 = vpop.f32.mrf.mxu0  ;;  %v1271_v36 = vpop.f32.mrf.mxu1  ;;  %v1675_v22 = vsel %vm1651_vm14, %v1673_v19, %v1674_v8 }
 0x11b   : > { %v1317_v34 = vpop.f32.mrf.mxu2  ;;  %v1272_v33 = vadd.f32 %v1271_v36, %v3601_v18 }
 0x11c   : > { %v1318_v63 = vadd.f32 %v1317_v34, %v1269_v54  ;;  %v3677_v41 = vadd.f32 %v1557_v37, %v1509_v29  ;;  %v1676_v34 = vrot.slane %v3567_v46, 1 }
 0x11d   : > { %2005 = vmatmul.bf16.gmra.mxu0 %v1669_v32  ;;  %1610 = vmatmul.bf16.gmra.mxu1 %v3232_v4 }
 0x120   : > { %1912 = vmatmul.bf16.gmra.mxu2 %v1666_v5 }
 0x121   : > { %v1510_v42 = vpop.f32.mrf.mxu3 }
 0x122   : > { %v1511_v7 = vadd.f32 %v1510_v42, %v1318_v63  ;;  %v1559_v39 = vpop.f32.mrf.mxu0  ;;  %v1273_v43 = vpop.f32.mrf.mxu1  ;;  %v1677_v63 = vrot.slane %v3579_v40, 1 }
 0x123   : > { %v1320_v20 = vpop.f32.mrf.mxu2  ;;  %v1274_v3 = vadd.f32 %v1273_v43, %v3621_v30 }
 0x124   : > { %v1321_v2 = vadd.f32 %v1320_v20, %v1272_v33  ;;  %v3681_v1 = vadd.f32 %v1559_v39, %v1511_v7  ;;  %v1678_v39 = vsel %vm1651_vm14, %v1676_v34, %v1677_v63 }
 0x126   : > { %1961 = vmatmul.bf16.gmra.mxu3 %v1669_v32 }
 0x129   : > { %v1513_v58 = vpop.f32.mrf.mxu3 }
 0x12a   : > { %v1514_v16 = vadd.f32 %v1513_v58, %v1321_v2  ;;  %v1562_v49 = vpop.f32.mrf.mxu0  ;;  %v1276_v59 = vpop.f32.mrf.mxu1 }
 0x12b   : > { %v1322_v31 = vpop.f32.mrf.mxu2  ;;  %v1277_v57 = vadd.f32 %v1276_v59, %v3629_v26 }
 0x12c   : > { %v1323_v18 = vadd.f32 %v1322_v31, %v1274_v3  ;;  %v3687_v60 = vadd.f32 %v1562_v49, %v1514_v16  ;;  %v1679_v49 = vrot.slane %v3599_v13, 1 }
 0x12d   : > { %2010 = vmatmul.bf16.gmra.mxu0 %v1672_v53  ;;  %1615 = vmatmul.bf16.gmra.mxu1 %v3432_v56 }
 0x130   : > { %1917 = vmatmul.bf16.gmra.mxu2 %v1669_v32 }
 0x131   : > { %v1515_v62 = vpop.f32.mrf.mxu3 }
 0x132   : > { %v1516_v4 = vadd.f32 %v1515_v62, %v1323_v18  ;;  %v1564_v0 = vpop.f32.mrf.mxu0  ;;  %v1278_v30 = vpop.f32.mrf.mxu1 }
 0x133   : > { %v1325_v5 = vpop.f32.mrf.mxu2  ;;  %v1279_v9 = vadd.f32 %v1278_v30, %v3636_v14 }
 0x134   : > { %v1326_v15 = vadd.f32 %v1325_v5, %v1277_v57  ;;  %v3691_v55 = vadd.f32 %v1564_v0, %v1516_v4 }
 0x136   : > { %1966 = vmatmul.bf16.gmra.mxu3 %v1672_v53 }
 0x139   : > { %v1518_v61 = vpop.f32.mrf.mxu3 }
 0x13a   : > { %v1519_v52 = vadd.f32 %v1518_v61, %v1326_v15  ;;  %v1567_v11 = vpop.f32.mrf.mxu0  ;;  %v1281_v54 = vpop.f32.mrf.mxu1 }
 0x13b   : > { %v1327_v12 = vpop.f32.mrf.mxu2  ;;  %v1282_v50 = vadd.f32 %v1281_v54, %v3614_v25 }
 0x13c   : > { %v1328_v26 = vadd.f32 %v1327_v12, %v1279_v9  ;;  %v3697_v17 = vadd.f32 %v1567_v11, %v1519_v52 }
 0x13d   : > { %2015 = vmatmul.bf16.gmra.mxu0 %v1675_v22  ;;  %1620 = vmatmul.bf16.gmra.mxu1 %v3567_v46 }
 0x140   : > { %1922 = vmatmul.bf16.gmra.mxu2 %v1672_v53  ;;  %v1680_v53 = vrot.slane %v3606_v23, 1 }
 0x141   : > { %v1520_v45 = vpop.f32.mrf.mxu3 }
 0x142   : > { %v1521_v56 = vadd.f32 %v1520_v45, %v1328_v26  ;;  %v1569_v35 = vpop.f32.mrf.mxu0  ;;  %v1283_v14 = vpop.f32.mrf.mxu1  ;;  %v1681_v4 = vsel %vm1651_vm14, %v1679_v49, %v1680_v53 }
 0x143   : > { %v1330_v29 = vpop.f32.mrf.mxu2  ;;  %v1284_v7 = vadd.f32 %v1283_v14, %v3625_v38 }
 0x144   : > { %v1331_v37 = vadd.f32 %v1330_v29, %v1282_v50  ;;  %v3701_v32 = vadd.f32 %v1569_v35, %v1521_v56 }
 0x146   : > { %1971 = vmatmul.bf16.gmra.mxu3 %v1675_v22 }
 0x149   : > { %v1523_v36 = vpop.f32.mrf.mxu3 }
 0x14a   : > { %v1524_v42 = vadd.f32 %v1523_v36, %v1331_v37  ;;  %v1572_v33 = vpop.f32.mrf.mxu0  ;;  %v1286_v2 = vpop.f32.mrf.mxu1 }
 0x14b   : > { %v1332_v20 = vpop.f32.mrf.mxu2  ;;  %v1287_v40 = vadd.f32 %v1286_v2, %v3633_v27 }
 0x14c   : > { %v1333_v25 = vadd.f32 %v1332_v20, %v1284_v7  ;;  %v3707_v43 = vadd.f32 %v1572_v33, %v1524_v42 }
 0x14d   : > { %2020 = vmatmul.bf16.gmra.mxu0 %v1678_v39  ;;  %1625 = vmatmul.bf16.gmra.mxu1 %v3599_v13 }
 0x150   : > { %1927 = vmatmul.bf16.gmra.mxu2 %v1675_v22 }
 0x151   : > { %v1525_v47 = vpop.f32.mrf.mxu3 }
 0x152   : > { %v1526_v46 = vadd.f32 %v1525_v47, %v1333_v25  ;;  %v1574_v21 = vpop.f32.mrf.mxu0  ;;  %v1288_v38 = vpop.f32.mrf.mxu1 }
 0x153   : > { %v1335_v58 = vpop.f32.mrf.mxu2  ;;  %v1289_v59 = vadd.f32 %v1288_v38, %v3643_v48 }
 0x154   : > { %v1336_v16 = vadd.f32 %v1335_v58, %v1287_v40  ;;  %v3711_v3 = vadd.f32 %v1574_v21, %v1526_v46 }
 0x156   : > { %1976 = vmatmul.bf16.gmra.mxu3 %v1678_v39 }
 0x159   : > { %v1528_v31 = vpop.f32.mrf.mxu3 }
 0x15a   : > { %v1529_v18 = vadd.f32 %v1528_v31, %v1336_v16  ;;  %v1577_v62 = vpop.f32.mrf.mxu0  ;;  %v1591_v0 = vpop.f32.mrf.mxu1 }
 0x15b   : > { %v1337_v57 = vpop.f32.mrf.mxu2  ;;  %v1592_v26 = vadd.f32 %v1591_v0, %v3649_v10 }
 0x15c   : > { %v1338_v27 = vadd.f32 %v1337_v57, %v1289_v59  ;;  %v3717_v5 = vadd.f32 %v1577_v62, %v1529_v18 }
 0x15d   : > { %2025 = vmatmul.bf16.gmra.mxu0 %v1681_v4 }
 0x161   : > { %v1530_v15 = vpop.f32.mrf.mxu3 }
 0x162   : > { %v1531_v30 = vadd.f32 %v1530_v15, %v1338_v27  ;;  %v1579_v19 = vpop.f32.mrf.mxu0  ;;  %v1593_v13 = vpop.f32.mrf.mxu1 }
 0x163   : > { %v1893_v8 = vpop.f32.mrf.mxu2  ;;  %v1594_v35 = vadd.f32 %v1593_v13, %v3652_v28 }
 0x164   : > { %v3719_v61 = vadd.f32 %v1579_v19, %v1531_v30 }
 0x169   : > { %v1942_v23 = vpop.f32.mrf.mxu3 }
 0x16a   : > { %v1991_v52 = vpop.f32.mrf.mxu0  ;;  %v1943_v9 = vadd.f32 %v1942_v23, %v1893_v8  ;;  %v1596_v11 = vpop.f32.mrf.mxu1 }
 0x16b   : > { %v1895_v48 = vpop.f32.mrf.mxu2  ;;  %v1597_v20 = vadd.f32 %v1596_v11, %v3657_v44 }
 0x16c   : > { %v1992_v22 = vadd.f32 %v1991_v52, %v1943_v9 }
 0x16e   : > { %v2031_v50 = vadd.f32 %v1992_v22, %v1592_v26 }
 0x170   : > { %v2100_v34 = vmul.f32 %v2031_v50, %v2031_v50 }
 0x171   : > { %v1944_v12 = vpop.f32.mrf.mxu3 }
 0x172   : > { %v1945_v54 = vadd.f32 %v1944_v12, %v1895_v48  ;;  %v1993_v45 = vpop.f32.mrf.mxu0  ;;  %v1598_v37 = vpop.f32.mrf.mxu1 }
 0x173   : > { %v1898_v56 = vpop.f32.mrf.mxu2  ;;  %v1599_v53 = vadd.f32 %v1598_v37, %v3661_v51 }
 0x174   : > { %v1994_v29 = vadd.f32 %v1993_v45, %v1945_v54 }
 0x176   : > { %v2032_v14 = vadd.f32 %v1994_v29, %v1594_v35 }
 0x178   : > { %v2775_v63 = vpack.c.bf16 %v2032_v14, %v2031_v50  ;;  %v2079_v36 = vadd.f32 %v2032_v14, %v2031_v50  ;;  %v2101_v10 = vmul.f32 %v2032_v14, %v2032_v14 }
 0x179   : > { %v1947_v42 = vpop.f32.mrf.mxu3 }
 0x17a   : > { %2776 = vst [vmem:[%s3728_s10] sm:$0xff] %v2775_v63   ;;  %v2116_v7 = vadd.f32 %v2101_v10, %v2100_v34  ;;  %v1948_v33 = vadd.f32 %v1947_v42, %v1898_v56  ;;  %v1996_v39 = vpop.f32.mrf.mxu0  ;;  %v1601_v2 = vpop.f32.mrf.mxu1 }
 0x17b   : > { %v1900_v28 = vpop.f32.mrf.mxu2  ;;  %v1602_v19 = vadd.f32 %v1601_v2, %v3667_v6 }
 0x17c   : > { %v1997_v25 = vadd.f32 %v1996_v39, %v1948_v33 }
 0x17e   : > { %v2033_v47 = vadd.f32 %v1997_v25, %v1597_v20 }
 0x180   : > { %v2080_v46 = vadd.f32 %v2079_v36, %v2033_v47  ;;  %v2102_v40 = vmul.f32 %v2033_v47, %v2033_v47 }
 0x181   : > { %v1949_v21 = vpop.f32.mrf.mxu3 }
 0x182   : > { %v2117_v58 = vadd.f32 %v2116_v7, %v2102_v40  ;;  %v1950_v16 = vadd.f32 %v1949_v21, %v1900_v28  ;;  %v1998_v38 = vpop.f32.mrf.mxu0  ;;  %v1603_v18 = vpop.f32.mrf.mxu1 }
 0x183   : > { %v1903_v49 = vpop.f32.mrf.mxu2  ;;  %v1604_v26 = vadd.f32 %v1603_v18, %v3671_v24 }
 0x184   : > { %v1999_v31 = vadd.f32 %v1998_v38, %v1950_v16 }
 0x186   : > { %v2034_v59 = vadd.f32 %v1999_v31, %v1599_v53 }
 0x188   : > { %v2780_v62 = vpack.c.bf16 %v2034_v59, %v2033_v47  ;;  %v2081_v4 = vadd.f32 %v2080_v46, %v2034_v59  ;;  %v2103_v57 = vmul.f32 %v2034_v59, %v2034_v59 }
 0x189   : > { %v1952_v44 = vpop.f32.mrf.mxu3 }
 0x18a   : > { %2819 = vst [vmem:[%s3728_s10 + $0x8] sm:$0xff] %v2780_v62   ;;  %v2118_v27 = vadd.f32 %v2117_v58, %v2103_v57  ;;  %v1953_v0 = vadd.f32 %v1952_v44, %v1903_v49  ;;  %v2001_v15 = vpop.f32.mrf.mxu0  ;;  %v1606_v13 = vpop.f32.mrf.mxu1 }
 0x18b   : > { %v1905_v30 = vpop.f32.mrf.mxu2  ;;  %v1607_v36 = vadd.f32 %v1606_v13, %v3677_v41 }
 0x18c   : > { %v2002_v8 = vadd.f32 %v2001_v15, %v1953_v0 }
 0x18e   : > { %v2035_v23 = vadd.f32 %v2002_v8, %v1602_v19 }
 0x190   : > { %v2082_v52 = vadd.f32 %v2081_v4, %v2035_v23  ;;  %v2104_v51 = vmul.f32 %v2035_v23, %v2035_v23 }
 0x191   : > { %v1954_v48 = vpop.f32.mrf.mxu3 }
 0x192   : > { %v2119_v9 = vadd.f32 %v2118_v27, %v2104_v51  ;;  %v1955_v11 = vadd.f32 %v1954_v48, %v1905_v30  ;;  %v2003_v22 = vpop.f32.mrf.mxu0  ;;  %v1608_v45 = vpop.f32.mrf.mxu1 }
 0x193   : > { %v1908_v12 = vpop.f32.mrf.mxu2  ;;  %v1609_v47 = vadd.f32 %v1608_v45, %v3681_v1 }
 0x194   : > { %v2004_v54 = vadd.f32 %v2003_v22, %v1955_v11 }
 0x196   : > { %v2036_v56 = vadd.f32 %v2004_v54, %v1604_v26 }
 0x198   : > { %v2785_v50 = vpack.c.bf16 %v2036_v56, %v2035_v23  ;;  %v2083_v35 = vadd.f32 %v2082_v52, %v2036_v56  ;;  %v2105_v29 = vmul.f32 %v2036_v56, %v2036_v56 }
 0x199   : > { %v1957_v6 = vpop.f32.mrf.mxu3 }
 0x19a   : > { %2820 = vst [vmem:[%s3728_s10 + $0x10] sm:$0xff] %v2785_v50   ;;  %v2120_v37 = vadd.f32 %v2119_v9, %v2105_v29  ;;  %v1958_v14 = vadd.f32 %v1957_v6, %v1908_v12  ;;  %v2006_v34 = vpop.f32.mrf.mxu0  ;;  %v1611_v42 = vpop.f32.mrf.mxu1 }
 0x19b   : > { %v1910_v63 = vpop.f32.mrf.mxu2  ;;  %v1612_v59 = vadd.f32 %v1611_v42, %v3687_v60 }
 0x19c   : > { %v2007_v10 = vadd.f32 %v2006_v34, %v1958_v14 }
 0x19e   : > { %v2037_v7 = vadd.f32 %v2007_v10, %v1607_v36 }
 0x1a0   : > { %v2084_v33 = vadd.f32 %v2083_v35, %v2037_v7  ;;  %v2106_v24 = vmul.f32 %v2037_v7, %v2037_v7 }
 0x1a1   : > { %v1959_v39 = vpop.f32.mrf.mxu3 }
 0x1a2   : > { %v2121_v28 = vadd.f32 %v2120_v37, %v2106_v24  ;;  %v1960_v20 = vadd.f32 %v1959_v39, %v1910_v63  ;;  %v2008_v25 = vpop.f32.mrf.mxu0  ;;  %v1613_v40 = vpop.f32.mrf.mxu1 }
 0x1a3   : > { %v1913_v2 = vpop.f32.mrf.mxu2  ;;  %v1614_v8 = vadd.f32 %v1613_v40, %v3691_v55 }
 0x1a4   : > { %v2009_v46 = vadd.f32 %v2008_v25, %v1960_v20 }
 0x1a6   : > { %v2038_v21 = vadd.f32 %v2009_v46, %v1609_v47 }
 0x1a8   : > { %v2790_v58 = vpack.c.bf16 %v2038_v21, %v2037_v7  ;;  %v2085_v16 = vadd.f32 %v2084_v33, %v2038_v21  ;;  %v2107_v38 = vmul.f32 %v2038_v21, %v2038_v21 }
 0x1a9   : > { %v1962_v41 = vpop.f32.mrf.mxu3 }
 0x1aa   : > { %2821 = vst [vmem:[%s3728_s10 + $0x18] sm:$0xff] %v2790_v58   ;;  %v2122_v49 = vadd.f32 %v2121_v28, %v2107_v38  ;;  %v1963_v53 = vadd.f32 %v1962_v41, %v1913_v2  ;;  %v2011_v31 = vpop.f32.mrf.mxu0  ;;  %v1616_v57 = vpop.f32.mrf.mxu1 }
 0x1ab   : > { %v1915_v18 = vpop.f32.mrf.mxu2  ;;  %v1617_v54 = vadd.f32 %v1616_v57, %v3697_v17 }
 0x1ac   : > { %v2012_v62 = vadd.f32 %v2011_v31, %v1963_v53 }
 0x1ae   : > { %v2039_v4 = vadd.f32 %v2012_v62, %v1612_v59 }
 0x1b0   : > { %v2086_v44 = vadd.f32 %v2085_v16, %v2039_v4  ;;  %v2108_v1 = vmul.f32 %v2039_v4, %v2039_v4 }
 0x1b1   : > { %v1964_v27 = vpop.f32.mrf.mxu3 }
 0x1b2   : > { %v2123_v0 = vadd.f32 %v2122_v49, %v2108_v1  ;;  %v1965_v15 = vadd.f32 %v1964_v27, %v1915_v18  ;;  %v2013_v30 = vpop.f32.mrf.mxu0  ;;  %v1618_v9 = vpop.f32.mrf.mxu1 }
 0x1b3   : > { %v1918_v19 = vpop.f32.mrf.mxu2  ;;  %v1619_v63 = vadd.f32 %v1618_v9, %v3701_v32 }
 0x1b4   : > { %v2014_v13 = vadd.f32 %v2013_v30, %v1965_v15 }
 0x1b6   : > { %v2040_v23 = vadd.f32 %v2014_v13, %v1614_v8 }
 0x1b8   : > { %v2795_v52 = vpack.c.bf16 %v2040_v23, %v2039_v4  ;;  %v2087_v51 = vadd.f32 %v2086_v44, %v2040_v23  ;;  %v2109_v48 = vmul.f32 %v2040_v23, %v2040_v23 }
 0x1b9   : > { %v1967_v60 = vpop.f32.mrf.mxu3 }
 0x1ba   : > { %2822 = vst [vmem:[%s3728_s10 + $0x20] sm:$0xff] %v2795_v52   ;;  %v2124_v11 = vadd.f32 %v2123_v0, %v2109_v48  ;;  %v1968_v22 = vadd.f32 %v1967_v60, %v1918_v19  ;;  %v2016_v12 = vpop.f32.mrf.mxu0  ;;  %v1621_v37 = vpop.f32.mrf.mxu1 }
 0x1bb   : > { %v1920_v26 = vpop.f32.mrf.mxu2  ;;  %v1622_v25 = vadd.f32 %v1621_v37, %v3707_v43 }
 0x1bc   : > { %v2017_v45 = vadd.f32 %v2016_v12, %v1968_v22 }
 0x1be   : > { %v2041_v56 = vadd.f32 %v2017_v45, %v1617_v54 }
 0x1c0   : > { %v2088_v50 = vadd.f32 %v2087_v51, %v2041_v56  ;;  %v2110_v35 = vmul.f32 %v2041_v56, %v2041_v56 }
 0x1c1   : > { %v1969_v55 = vpop.f32.mrf.mxu3 }
 0x1c2   : > { %v2125_v29 = vadd.f32 %v2124_v11, %v2110_v35  ;;  %v1970_v6 = vadd.f32 %v1969_v55, %v1920_v26  ;;  %v2018_v14 = vpop.f32.mrf.mxu0  ;;  %v1623_v47 = vpop.f32.mrf.mxu1 }
 0x1c3   : > { %v1923_v34 = vpop.f32.mrf.mxu2  ;;  %v1624_v41 = vadd.f32 %v1623_v47, %v3711_v3 }
 0x1c4   : > { %v2019_v36 = vadd.f32 %v2018_v14, %v1970_v6 }
 0x1c6   : > { %v2042_v10 = vadd.f32 %v2019_v36, %v1619_v63 }
 0x1c8   : > { %v2800_v42 = vpack.c.bf16 %v2042_v10, %v2041_v56  ;;  %v2089_v7 = vadd.f32 %v2088_v50, %v2042_v10  ;;  %v2111_v33 = vmul.f32 %v2042_v10, %v2042_v10 }
 0x1c9   : > { %v1972_v24 = vpop.f32.mrf.mxu3 }
 0x1ca   : > { %2823 = vst [vmem:[%s3728_s10 + $0x28] sm:$0xff] %v2800_v42   ;;  %v2126_v17 = vadd.f32 %v2125_v29, %v2111_v33  ;;  %v1973_v39 = vadd.f32 %v1972_v24, %v1923_v34  ;;  %v2021_v28 = vpop.f32.mrf.mxu0  ;;  %v1626_v18 = vpop.f32.mrf.mxu1 }
 0x1cb   : > { %v1925_v20 = vpop.f32.mrf.mxu2  ;;  %v1627_v27 = vadd.f32 %v1626_v18, %v3717_v5 }
 0x1cc   : > { %v2022_v2 = vadd.f32 %v2021_v28, %v1973_v39 }
 0x1ce   : > { %v2043_v46 = vadd.f32 %v2022_v2, %v1622_v25 }
 0x1d0   : > { %v2090_v40 = vadd.f32 %v2089_v7, %v2043_v46  ;;  %v2112_v21 = vmul.f32 %v2043_v46, %v2043_v46 }
 0x1d1   : > { %v1974_v32 = vpop.f32.mrf.mxu3 }
 0x1d2   : > { %v2127_v58 = vadd.f32 %v2126_v17, %v2112_v21  ;;  %v1975_v16 = vadd.f32 %v1974_v32, %v1925_v20  ;;  %v2023_v38 = vpop.f32.mrf.mxu0  ;;  %v1628_v8 = vpop.f32.mrf.mxu1 }
 0x1d3   : > { %v1928_v53 = vpop.f32.mrf.mxu2  ;;  %v1629_v48 = vadd.f32 %v1628_v8, %v3719_v61 }
 0x1d4   : > { %v2024_v49 = vadd.f32 %v2023_v38, %v1975_v16 }
 0x1d6   : > { %v2044_v31 = vadd.f32 %v2024_v49, %v1624_v41 }
 0x1d8   : > { %v2805_v59 = vpack.c.bf16 %v2044_v31, %v2043_v46  ;;  %v2091_v62 = vadd.f32 %v2090_v40, %v2044_v31  ;;  %v2113_v4 = vmul.f32 %v2044_v31, %v2044_v31 }
 0x1d9   : > { %v1977_v43 = vpop.f32.mrf.mxu3 }
 0x1da   : > { %2824 = vst [vmem:[%s3728_s10 + $0x30] sm:$0xff] %v2805_v59   ;;  %v2128_v57 = vadd.f32 %v2127_v58, %v2113_v4  ;;  %v1978_v44 = vadd.f32 %v1977_v43, %v1928_v53  ;;  %v2026_v1 = vpop.f32.mrf.mxu0 }
 0x1db   : > { %v1930_v30 = vpop.f32.mrf.mxu2 }
 0x1dc   : > { %v2027_v0 = vadd.f32 %v2026_v1, %v1978_v44 }
 0x1de   : > { %v2045_v15 = vadd.f32 %v2027_v0, %v1627_v27 }
 0x1e0   : > { %v2092_v3 = vadd.f32 %v2091_v62, %v2045_v15  ;;  %v2114_v19 = vmul.f32 %v2045_v15, %v2045_v15 }
 0x1e1   : > { %v1979_v13 = vpop.f32.mrf.mxu3 }
 0x1e2   : > { %v2129_v23 = vadd.f32 %v2128_v57, %v2114_v19  ;;  %v1980_v52 = vadd.f32 %v1979_v13, %v1930_v30  ;;  %v2028_v51 = vpop.f32.mrf.mxu0 }
 0x1e4   : > { %v2029_v9 = vadd.f32 %v2028_v51, %v1980_v52 }
 0x1e6   : > { %v2046_v60 = vadd.f32 %v2029_v9, %v1629_v48 }
 0x1e8   : > { %v2810_v11 = vpack.c.bf16 %v2046_v60, %v2045_v15  ;;  %v2093_v5 = vadd.f32 %v2092_v3, %v2046_v60  ;;  %v2115_v22 = vmul.f32 %v2046_v60, %v2046_v60 }
 0x1ea   : > { %2825 = vst [vmem:[%s3728_s10 + $0x38] sm:$0xff] %v2810_v11   ;;  %v2094_v12 = vrot.slane %v2093_v5, 4  ;;  %v2130_v26 = vadd.f32 %v2129_v23, %v2115_v22 }
 0x1ec   : > { %v2095_v54 = vadd.f32 %v2094_v12, %v2093_v5  ;;  %v2131_v45 = vrot.slane %v2130_v26, 4 }
 0x1ee   : > { %v2096_v56 = vrot.slane %v2095_v54, 2  ;;  %v2132_v50 = vadd.f32 %v2131_v45, %v2130_v26 }
 0x1f0   : > { %v2097_v35 = vadd.f32 %v2096_v56, %v2095_v54  ;;  %v2133_v55 = vrot.slane %v2132_v50, 2 }
 0x1f2   : > { %v2098_v29 = vrot.slane %v2097_v35, 1  ;;  %v2134_v61 = vadd.f32 %v2133_v55, %v2132_v50 }
 0x1f4   : > { %v2135_v6 = vrot.slane %v2134_v61, 1  ;;  %v2099_v37 = vadd.f32 %v2098_v29, %v2097_v35 }
 0x1f6   : > { %v2136_v14 = vadd.f32 %v2135_v6, %v2134_v61 }
 0x1f8   : > { %v2138_v34 = vsel %vm799_vm9, %v2099_v37, %v2136_v14 }
 0x1f9   : > { %2139 = vst [vmem:[%s467_s18] sm:$0x3] %v2138_v34 }
 0x1fa PF: > { %s18_s28 = sadd.s32 1, %s2930_s28   ;;  %s3797_s24 = smov %s2922_s26 }
 0x1fb   : > { %p15_p11 = scmp.ge.s32.totalorder %s18_s28, 6   ;;  %s3798_s25 = smov %s2926_s27 }
 0x1fc   : > { %s3799_s26 = smov %s3802_s29  ;;  %s3800_s27 = smov %s3806_s30 }
 0x1fd   :  { %17 = sbr.rel (!%p15_p11) target bundleno = 3 (0x3), region = 92 }

</bundles_post_ra>
